<compile_context>
chip_gen: v5e
topology: v5e:2x2
jax: 0.10.0
libtpu: 0.0.40
codegen_flags: <defaults>
</compile_context>

<pallas_src>
import jax
import jax.numpy as jnp
from jax.experimental import pallas as pl
from jax.experimental.pallas import tpu as pltpu

# Small, module-consistent sizes.
B, LX, LM, D, DFF, H, NLAYERS = 2, 8, 8, 32, 64, 4, 4
DK = D // H
N = B * LX            # flattened query rows
M = B * LM            # flattened memory rows
EPS = 1e-6
NEG_INF = -1e9


def _layer_norm(h, gamma, beta):
    mu = jnp.mean(h, axis=-1, keepdims=True)
    var = jnp.mean((h - mu) ** 2, axis=-1, keepdims=True)
    return (h - mu) * jax.lax.rsqrt(var + EPS) * gamma + beta


# ------------------------------- the fused kernel -------------------------------
def cr_encoder_kernel(x_ref, m_ref, bias_ref, qmask_ref,
                      wqk_ref, wvo_ref, w1_ref, w2_ref, small_ref,
                      o_ref):
    x = x_ref[...]              # (N, D)  activation, carried in registers/VMEM across layers
    m = m_ref[...]              # (M, D)
    qmask = qmask_ref[...]      # (N, 1)

    # Hoisted once for all layers (JAX does not CSE broadcast_in_dim).
    mh = jnp.broadcast_to(m[None], (H, M, D))                       # (H, M, D)
    bias3 = jnp.broadcast_to(bias_ref[...][None], (H, N, M))        # (H, N, M) additive mask

    for layer in range(NLAYERS):                                    # static unroll: 4 tiny layers
        wqk = wqk_ref[layer]        # (H, D, D)  == (wq_h / sqrt(dk)) @ wk_h^T
        wvo = wvo_ref[layer]        # (H, D, D)  ==  wv_h @ wo_h
        w1 = w1_ref[layer]          # (D, DFF)
        w2 = w2_ref[layer]          # (DFF, D)
        small = small_ref[layer]    # (8, DFF) packed small params
        b1 = small[0:1, :]          # (1, DFF)
        b2 = small[1:2, :D]         # (1, D)
        g1 = small[2:3, :D]
        be1 = small[3:4, :D]
        g2 = small[4:5, :D]
        be2 = small[5:6, :D]

        # --- multi-head cross-attention, heads as one leading batch axis ---
        xh = jnp.broadcast_to(x[None], (H, N, D))
        t = jnp.einsum('hnd,hde->hne', xh, wqk, preferred_element_type=jnp.float32)   # (H, N, D)
        s = jnp.einsum('hne,hme->hnm', t, mh, preferred_element_type=jnp.float32)     # (H, N, M)
        s = s + bias3
        s = s - jnp.max(s, axis=-1, keepdims=True)
        p = jnp.exp(s)
        p = p * pl.reciprocal(jnp.sum(p, axis=-1, keepdims=True), approx=True)        # one softmax

        vo = jnp.einsum('hmd,hde->hme', mh, wvo, preferred_element_type=jnp.float32)  # (H, M, D)
        ctx = jnp.einsum('hnm,hme->hne', p, vo, preferred_element_type=jnp.float32)   # (H, N, D)
        attn_out = jnp.sum(ctx, axis=0)                                               # (N, D)

        # --- sublayer 1: residual + LayerNorm ---
        h1 = _layer_norm(x + attn_out, g1, be1)

        # --- sublayer 2: position-wise FFN + residual + LayerNorm ---
        ff = jnp.maximum(jnp.dot(h1, w1, preferred_element_type=jnp.float32) + b1, 0.0)
        ff = jnp.dot(ff, w2, preferred_element_type=jnp.float32) + b2
        x = _layer_norm(h1 + ff, g2, be2) * qmask

    o_ref[...] = x.astype(o_ref.dtype)


# ------------------------- parameter preparation (one-time) -------------------------
def prepare_params(layer_params):
    """Fold scale/wq·wk^T and wv·wo per head, pack small vectors, stack layers."""
    scale = 1.0 / jnp.sqrt(jnp.float32(DK))

    def per_layer(p):
        wq, wk, wv, wo, w1, b1, w2, b2, g1, be1, g2, be2 = p
        wq_h = (wq * scale).reshape(D, H, DK).transpose(1, 0, 2)   # (H, D, DK)
        wk_h = wk.reshape(D, H, DK).transpose(1, 0, 2)             # (H, D, DK)
        wv_h = wv.reshape(D, H, DK).transpose(1, 0, 2)             # (H, D, DK)
        wo_h = wo.reshape(H, DK, D)                                # (H, DK, D)
        wqk = jnp.einsum('hdk,hek->hde', wq_h, wk_h)               # (H, D, D)
        wvo = jnp.einsum('hdk,hke->hde', wv_h, wo_h)               # (H, D, D)
        small = jnp.zeros((8, DFF), jnp.float32)
        small = small.at[0, :DFF].set(b1.reshape(DFF))
        small = small.at[1, :D].set(b2.reshape(D))
        small = small.at[2, :D].set(g1.reshape(D))
        small = small.at[3, :D].set(be1.reshape(D))
        small = small.at[4, :D].set(g2.reshape(D))
        small = small.at[5, :D].set(be2.reshape(D))
        return wqk, wvo, w1, w2, small

    per = [per_layer(p) for p in layer_params]
    return tuple(jnp.stack([per[l][i] for l in range(NLAYERS)], axis=0)
                 for i in range(5))


# ------------------------------- forward wrapper -------------------------------
def _cr_encoder_forward(x, m, qmask, amask, prepped):
    wqk_s, wvo_s, w1_s, w2_s, small_s = prepped
    x2 = x.reshape(N, D)
    m2 = m.reshape(M, D)
    qmask2 = qmask.reshape(N, 1)

    # Additive attention bias on the flattened batch: a query may only attend to memory rows of
    # its own batch element where amask == 1; everything else gets -1e9.
    q_batch = jnp.repeat(jnp.arange(B), LX)                        # (N,)
    k_batch = jnp.repeat(jnp.arange(B), LM)                        # (M,)
    allowed = (q_batch[:, None] == k_batch[None, :]) & (amask.reshape(M)[None, :] > 0)
    bias = jnp.where(allowed, 0.0, NEG_INF).astype(jnp.float32)    # (N, M)

    vmem = pl.BlockSpec(memory_space=pltpu.MemorySpace.VMEM)
    out2 = pl.pallas_call(
        cr_encoder_kernel,
        out_shape=jax.ShapeDtypeStruct((N, D), x.dtype),
        in_specs=[vmem] * 9,          # everything (activations + all-layer weights) resident in VMEM
        out_specs=vmem,
    )(x2, m2, bias, qmask2, wqk_s, wvo_s, w1_s, w2_s, small_s)
    return out2.reshape(B, LX, D)


cr_encoder_forward = jax.jit(_cr_encoder_forward)


# ------------------------- pure-JAX reference (same math, original params) -------------------------
def ref_layer(x, m, amask, qmask, params):
    wq, wk, wv, wo, w1, b1, w2, b2, g1, be1, g2, be2 = params
    q = jnp.einsum('bld,de->ble', x, wq)
    k = jnp.einsum('bld,de->ble', m, wk)
    v = jnp.einsum('bld,de->ble', m, wv)
    qh = q.reshape(B, LX, H, DK).transpose(0, 2, 1, 3)
    kh = k.reshape(B, LM, H, DK).transpose(0, 2, 1, 3)
    vh = v.reshape(B, LM, H, DK).transpose(0, 2, 1, 3)
    s = jnp.einsum('bhqd,bhkd->bhqk', qh, kh) / jnp.sqrt(jnp.float32(DK))
    s = jnp.where(amask[:, None, :, :] > 0.0, s, NEG_INF)
    p = jax.nn.softmax(s, axis=-1)
    ctx = jnp.einsum('bhqk,bhkd->bhqd', p, vh).transpose(0, 2, 1, 3).reshape(B, LX, D)
    attn_out = jnp.einsum('bld,de->ble', ctx, wo)
    h1 = _layer_norm(x + attn_out, g1, be1)
    ff = jnp.maximum(jnp.einsum('bld,df->blf', h1, w1) + b1, 0.0)
    ff = jnp.einsum('blf,fd->bld', ff, w2) + b2
    return _layer_norm(h1 + ff, g2, be2) * qmask


def ref_encoder(x, m, qmask, amask, layer_params):
    for params in layer_params:
        x = ref_layer(x, m, amask, qmask, params)
    return x


# ------------------------------ parameter init ------------------------------
def init_layer_params(key):
    ks = jax.random.split(key, 6)
    scale = 0.05
    wq = jax.random.normal(ks[0], (D, D), jnp.float32) * scale
    wk = jax.random.normal(ks[1], (D, D), jnp.float32) * scale
    wv = jax.random.normal(ks[2], (D, D), jnp.float32) * scale
    wo = jax.random.normal(ks[3], (D, D), jnp.float32) * scale
    w1 = jax.random.normal(ks[4], (D, DFF), jnp.float32) * scale
    b1 = jnp.zeros((1, DFF), jnp.float32)
    w2 = jax.random.normal(ks[5], (DFF, D), jnp.float32) * scale
    b2 = jnp.zeros((1, D), jnp.float32)
    g1 = jnp.ones((1, D), jnp.float32)
    be1 = jnp.zeros((1, D), jnp.float32)
    g2 = jnp.ones((1, D), jnp.float32)
    be2 = jnp.zeros((1, D), jnp.float32)
    return (wq, wk, wv, wo, w1, b1, w2, b2, g1, be1, g2, be2)


if __name__ == "__main__":
    key = jax.random.PRNGKey(0)
    kx, km, kp = jax.random.split(key, 3)

    x = jax.random.normal(kx, (B, LX, D), jnp.float32)
    m = jax.random.normal(km, (B, LM, D), jnp.float32)

    # amask: batch 1 cannot attend to its last two memory positions; qmask: all queries valid.
    amask = jnp.ones((B, 1, LM), jnp.float32).at[1, 0, LM - 2:].set(0.0)
    qmask = jnp.ones((B, LX, 1), jnp.float32)

    layer_params = [init_layer_params(jax.random.fold_in(kp, i)) for i in range(NLAYERS)]
    prepped = prepare_params(layer_params)   # one-time fold/pack/stack of weights

    out = jax.block_until_ready(cr_encoder_forward(x, m, qmask, amask, prepped))
    ref = jax.block_until_ready(ref_encoder(x, m, qmask, amask, layer_params))

    assert out.shape == (B, LX, D)
    assert jnp.allclose(out, ref, rtol=1e-2, atol=1e-2), "Pallas output diverges from reference"

    print("KERNEL_OK")
</pallas_src>

<mosaic_0001>
module attributes {stable_mosaic.version = 11 : i64} {
  func.func @cr_encoder_kernel(%arg0: memref<16x32xf32, #tpu.memory_space<vmem>>, %arg1: memref<16x32xf32, #tpu.memory_space<vmem>>, %arg2: memref<16x16xf32, #tpu.memory_space<vmem>>, %arg3: memref<16x1xf32, #tpu.memory_space<vmem>>, %arg4: memref<4x4x32x32xf32, #tpu.memory_space<vmem>>, %arg5: memref<4x4x32x32xf32, #tpu.memory_space<vmem>>, %arg6: memref<4x32x64xf32, #tpu.memory_space<vmem>>, %arg7: memref<4x64x32xf32, #tpu.memory_space<vmem>>, %arg8: memref<4x8x64xf32, #tpu.memory_space<vmem>>, %arg9: memref<16x32xf32, #tpu.memory_space<vmem>>) attributes {dimension_semantics = [], scalar_prefetch = 0 : i64, scratch_operands = 0 : i64, tpu.core_type = #tpu.core_type<tc>} {
    %c0 = arith.constant 0 : index
    %c0_0 = arith.constant 0 : index
    %0 = vector.load %arg0[%c0, %c0_0] : memref<16x32xf32, #tpu.memory_space<vmem>>, vector<16x32xf32>
    %c0_1 = arith.constant 0 : index
    %c0_2 = arith.constant 0 : index
    %1 = vector.load %arg1[%c0_1, %c0_2] : memref<16x32xf32, #tpu.memory_space<vmem>>, vector<16x32xf32>
    %c0_3 = arith.constant 0 : index
    %c0_4 = arith.constant 0 : index
    %2 = vector.load %arg3[%c0_3, %c0_4] : memref<16x1xf32, #tpu.memory_space<vmem>>, vector<16x1xf32>
    %3 = vector.shape_cast %1 : vector<16x32xf32> to vector<1x16x32xf32>
    %4 = vector.shape_cast %3 : vector<1x16x32xf32> to vector<1x16x32xf32>
    %5 = vector.broadcast %4 : vector<1x16x32xf32> to vector<4x16x32xf32>
    %c0_5 = arith.constant 0 : index
    %c0_6 = arith.constant 0 : index
    %6 = vector.load %arg2[%c0_5, %c0_6] : memref<16x16xf32, #tpu.memory_space<vmem>>, vector<16x16xf32>
    %7 = vector.shape_cast %6 : vector<16x16xf32> to vector<1x16x16xf32>
    %8 = vector.shape_cast %7 : vector<1x16x16xf32> to vector<1x16x16xf32>
    %9 = vector.broadcast %8 : vector<1x16x16xf32> to vector<4x16x16xf32>
    %c0_7 = arith.constant 0 : index
    %c0_8 = arith.constant 0 : index
    %c0_9 = arith.constant 0 : index
    %c0_10 = arith.constant 0 : index
    %10 = vector.load %arg4[%c0_7, %c0_8, %c0_9, %c0_10] : memref<4x4x32x32xf32, #tpu.memory_space<vmem>>, vector<1x4x32x32xf32>
    %11 = vector.shape_cast %10 : vector<1x4x32x32xf32> to vector<4x32x32xf32>
    %c0_11 = arith.constant 0 : index
    %c0_12 = arith.constant 0 : index
    %c0_13 = arith.constant 0 : index
    %c0_14 = arith.constant 0 : index
    %12 = vector.load %arg5[%c0_11, %c0_12, %c0_13, %c0_14] : memref<4x4x32x32xf32, #tpu.memory_space<vmem>>, vector<1x4x32x32xf32>
    %13 = vector.shape_cast %12 : vector<1x4x32x32xf32> to vector<4x32x32xf32>
    %c0_15 = arith.constant 0 : index
    %c0_16 = arith.constant 0 : index
    %c0_17 = arith.constant 0 : index
    %14 = vector.load %arg6[%c0_15, %c0_16, %c0_17] : memref<4x32x64xf32, #tpu.memory_space<vmem>>, vector<1x32x64xf32>
    %15 = vector.shape_cast %14 : vector<1x32x64xf32> to vector<32x64xf32>
    %c0_18 = arith.constant 0 : index
    %c0_19 = arith.constant 0 : index
    %c0_20 = arith.constant 0 : index
    %16 = vector.load %arg7[%c0_18, %c0_19, %c0_20] : memref<4x64x32xf32, #tpu.memory_space<vmem>>, vector<1x64x32xf32>
    %17 = vector.shape_cast %16 : vector<1x64x32xf32> to vector<64x32xf32>
    %c0_21 = arith.constant 0 : index
    %c0_22 = arith.constant 0 : index
    %c0_23 = arith.constant 0 : index
    %18 = vector.load %arg8[%c0_21, %c0_22, %c0_23] : memref<4x8x64xf32, #tpu.memory_space<vmem>>, vector<1x8x64xf32>
    %19 = vector.shape_cast %18 : vector<1x8x64xf32> to vector<8x64xf32>
    %20 = vector.extract_strided_slice %19 {offsets = [0, 0], sizes = [1, 64], strides = [1, 1]} : vector<8x64xf32> to vector<1x64xf32>
    %21 = vector.extract_strided_slice %19 {offsets = [1, 0], sizes = [1, 32], strides = [1, 1]} : vector<8x64xf32> to vector<1x32xf32>
    %22 = vector.extract_strided_slice %19 {offsets = [2, 0], sizes = [1, 32], strides = [1, 1]} : vector<8x64xf32> to vector<1x32xf32>
    %23 = vector.extract_strided_slice %19 {offsets = [3, 0], sizes = [1, 32], strides = [1, 1]} : vector<8x64xf32> to vector<1x32xf32>
    %24 = vector.extract_strided_slice %19 {offsets = [4, 0], sizes = [1, 32], strides = [1, 1]} : vector<8x64xf32> to vector<1x32xf32>
    %25 = vector.extract_strided_slice %19 {offsets = [5, 0], sizes = [1, 32], strides = [1, 1]} : vector<8x64xf32> to vector<1x32xf32>
    %26 = vector.shape_cast %0 : vector<16x32xf32> to vector<1x16x32xf32>
    %27 = vector.shape_cast %26 : vector<1x16x32xf32> to vector<1x16x32xf32>
    %28 = vector.broadcast %27 : vector<1x16x32xf32> to vector<4x16x32xf32>
    "tpu.trace_start"() <{level = 10 : i32, message = "hnd,hde->hne"}> : () -> ()
    %cst = arith.constant dense<0.000000e+00> : vector<4x16x32xf32>
    %29 = tpu.matmul %28, %11, %cst {dimension_numbers = #tpu.dot_dimension_numbers<[2], [1], [1], [2], [0, 0, 0, 1, 1, 2], [0], [0]>} : vector<4x16x32xf32>, vector<4x32x32xf32>, vector<4x16x32xf32> -> vector<4x16x32xf32>
    "tpu.trace_stop"() : () -> ()
    "tpu.trace_start"() <{level = 10 : i32, message = "hne,hme->hnm"}> : () -> ()
    %cst_24 = arith.constant dense<0.000000e+00> : vector<4x16x16xf32>
    %30 = tpu.matmul %29, %5, %cst_24 {dimension_numbers = #tpu.dot_dimension_numbers<[2], [2], [1], [1], [0, 0, 0, 1, 1, 1], [0], [0]>} : vector<4x16x32xf32>, vector<4x16x32xf32>, vector<4x16x16xf32> -> vector<4x16x16xf32>
    "tpu.trace_stop"() : () -> ()
    %31 = arith.addf %30, %9 : vector<4x16x16xf32>
    %cst_25 = arith.constant dense<0xFF800000> : vector<4x16xf32>
    %32 = vector.multi_reduction <maximumf>, %31, %cst_25 [2] : vector<4x16x16xf32> to vector<4x16xf32>
    %33 = vector.shape_cast %32 : vector<4x16xf32> to vector<4x16x1xf32>
    %34 = vector.broadcast %33 : vector<4x16x1xf32> to vector<4x16x16xf32>
    %35 = arith.subf %31, %34 : vector<4x16x16xf32>
    %36 = math.exp %35 : vector<4x16x16xf32>
    %cst_26 = arith.constant dense<0.000000e+00> : vector<4x16xf32>
    %37 = vector.multi_reduction <add>, %36, %cst_26 [2] : vector<4x16x16xf32> to vector<4x16xf32>
    %38 = vector.shape_cast %37 : vector<4x16xf32> to vector<4x16x1xf32>
    %39 = tpu.reciprocal %38 {approx = true} : vector<4x16x1xf32> -> vector<4x16x1xf32>
    %40 = vector.broadcast %39 : vector<4x16x1xf32> to vector<4x16x16xf32>
    %41 = arith.mulf %36, %40 : vector<4x16x16xf32>
    "tpu.trace_start"() <{level = 10 : i32, message = "hmd,hde->hme"}> : () -> ()
    %cst_27 = arith.constant dense<0.000000e+00> : vector<4x16x32xf32>
    %42 = tpu.matmul %5, %13, %cst_27 {dimension_numbers = #tpu.dot_dimension_numbers<[2], [1], [1], [2], [0, 0, 0, 1, 1, 2], [0], [0]>} : vector<4x16x32xf32>, vector<4x32x32xf32>, vector<4x16x32xf32> -> vector<4x16x32xf32>
    "tpu.trace_stop"() : () -> ()
    "tpu.trace_start"() <{level = 10 : i32, message = "hnm,hme->hne"}> : () -> ()
    %cst_28 = arith.constant dense<0.000000e+00> : vector<4x16x32xf32>
    %43 = tpu.matmul %41, %42, %cst_28 {dimension_numbers = #tpu.dot_dimension_numbers<[2], [1], [1], [2], [0, 0, 0, 1, 1, 2], [0], [0]>} : vector<4x16x16xf32>, vector<4x16x32xf32>, vector<4x16x32xf32> -> vector<4x16x32xf32>
    "tpu.trace_stop"() : () -> ()
    %cst_29 = arith.constant dense<0.000000e+00> : vector<16x32xf32>
    %44 = vector.multi_reduction <add>, %43, %cst_29 [0] : vector<4x16x32xf32> to vector<16x32xf32>
    %45 = arith.addf %0, %44 : vector<16x32xf32>
    %cst_30 = arith.constant dense<0.000000e+00> : vector<16xf32>
    %46 = vector.multi_reduction <add>, %45, %cst_30 [1] : vector<16x32xf32> to vector<16xf32>
    %47 = vector.shape_cast %46 : vector<16xf32> to vector<16x1xf32>
    %cst_31 = arith.constant 3.200000e+01 : f32
    %48 = vector.broadcast %cst_31 : f32 to vector<16x1xf32>
    %49 = arith.divf %47, %48 : vector<16x1xf32>
    %50 = vector.broadcast %49 : vector<16x1xf32> to vector<16x32xf32>
    %51 = arith.subf %45, %50 : vector<16x32xf32>
    %52 = arith.mulf %51, %51 : vector<16x32xf32>
    %cst_32 = arith.constant dense<0.000000e+00> : vector<16xf32>
    %53 = vector.multi_reduction <add>, %52, %cst_32 [1] : vector<16x32xf32> to vector<16xf32>
    %54 = vector.shape_cast %53 : vector<16xf32> to vector<16x1xf32>
    %cst_33 = arith.constant 3.200000e+01 : f32
    %55 = vector.broadcast %cst_33 : f32 to vector<16x1xf32>
    %56 = arith.divf %54, %55 : vector<16x1xf32>
    %57 = vector.broadcast %49 : vector<16x1xf32> to vector<16x32xf32>
    %58 = arith.subf %45, %57 : vector<16x32xf32>
    %cst_34 = arith.constant 9.99999997E-7 : f32
    %59 = vector.broadcast %cst_34 : f32 to vector<16x1xf32>
    %60 = arith.addf %56, %59 : vector<16x1xf32>
    %61 = math.rsqrt %60 : vector<16x1xf32>
    %62 = vector.broadcast %61 : vector<16x1xf32> to vector<16x32xf32>
    %63 = arith.mulf %58, %62 : vector<16x32xf32>
    %64 = vector.broadcast %22 : vector<1x32xf32> to vector<16x32xf32>
    %65 = arith.mulf %63, %64 : vector<16x32xf32>
    %66 = vector.broadcast %23 : vector<1x32xf32> to vector<16x32xf32>
    %67 = arith.addf %65, %66 : vector<16x32xf32>
    %cst_35 = arith.constant dense<0.000000e+00> : vector<16x64xf32>
    %68 = tpu.matmul %67, %15, %cst_35 {dimension_numbers = #tpu.dot_dimension_numbers<[1], [0], [0], [1], [0, 0, 1, 1], [], []>} : vector<16x32xf32>, vector<32x64xf32>, vector<16x64xf32> -> vector<16x64xf32>
    %69 = vector.broadcast %20 : vector<1x64xf32> to vector<16x64xf32>
    %70 = arith.addf %68, %69 : vector<16x64xf32>
    %cst_36 = arith.constant 0.000000e+00 : f32
    %71 = vector.broadcast %cst_36 : f32 to vector<16x64xf32>
    %72 = arith.maximumf %70, %71 : vector<16x64xf32>
    %cst_37 = arith.constant dense<0.000000e+00> : vector<16x32xf32>
    %73 = tpu.matmul %72, %17, %cst_37 {dimension_numbers = #tpu.dot_dimension_numbers<[1], [0], [0], [1], [0, 0, 1, 1], [], []>} : vector<16x64xf32>, vector<64x32xf32>, vector<16x32xf32> -> vector<16x32xf32>
    %74 = vector.broadcast %21 : vector<1x32xf32> to vector<16x32xf32>
    %75 = arith.addf %73, %74 : vector<16x32xf32>
    %76 = arith.addf %67, %75 : vector<16x32xf32>
    %cst_38 = arith.constant dense<0.000000e+00> : vector<16xf32>
    %77 = vector.multi_reduction <add>, %76, %cst_38 [1] : vector<16x32xf32> to vector<16xf32>
    %78 = vector.shape_cast %77 : vector<16xf32> to vector<16x1xf32>
    %cst_39 = arith.constant 3.200000e+01 : f32
    %79 = vector.broadcast %cst_39 : f32 to vector<16x1xf32>
    %80 = arith.divf %78, %79 : vector<16x1xf32>
    %81 = vector.broadcast %80 : vector<16x1xf32> to vector<16x32xf32>
    %82 = arith.subf %76, %81 : vector<16x32xf32>
    %83 = arith.mulf %82, %82 : vector<16x32xf32>
    %cst_40 = arith.constant dense<0.000000e+00> : vector<16xf32>
    %84 = vector.multi_reduction <add>, %83, %cst_40 [1] : vector<16x32xf32> to vector<16xf32>
    %85 = vector.shape_cast %84 : vector<16xf32> to vector<16x1xf32>
    %cst_41 = arith.constant 3.200000e+01 : f32
    %86 = vector.broadcast %cst_41 : f32 to vector<16x1xf32>
    %87 = arith.divf %85, %86 : vector<16x1xf32>
    %88 = vector.broadcast %80 : vector<16x1xf32> to vector<16x32xf32>
    %89 = arith.subf %76, %88 : vector<16x32xf32>
    %cst_42 = arith.constant 9.99999997E-7 : f32
    %90 = vector.broadcast %cst_42 : f32 to vector<16x1xf32>
    %91 = arith.addf %87, %90 : vector<16x1xf32>
    %92 = math.rsqrt %91 : vector<16x1xf32>
    %93 = vector.broadcast %92 : vector<16x1xf32> to vector<16x32xf32>
    %94 = arith.mulf %89, %93 : vector<16x32xf32>
    %95 = vector.broadcast %24 : vector<1x32xf32> to vector<16x32xf32>
    %96 = arith.mulf %94, %95 : vector<16x32xf32>
    %97 = vector.broadcast %25 : vector<1x32xf32> to vector<16x32xf32>
    %98 = arith.addf %96, %97 : vector<16x32xf32>
    %99 = vector.broadcast %2 : vector<16x1xf32> to vector<16x32xf32>
    %100 = arith.mulf %98, %99 : vector<16x32xf32>
    %c1 = arith.constant 1 : index
    %c0_43 = arith.constant 0 : index
    %c0_44 = arith.constant 0 : index
    %c0_45 = arith.constant 0 : index
    %101 = vector.load %arg4[%c1, %c0_43, %c0_44, %c0_45] : memref<4x4x32x32xf32, #tpu.memory_space<vmem>>, vector<1x4x32x32xf32>
    %102 = vector.shape_cast %101 : vector<1x4x32x32xf32> to vector<4x32x32xf32>
    %c1_46 = arith.constant 1 : index
    %c0_47 = arith.constant 0 : index
    %c0_48 = arith.constant 0 : index
    %c0_49 = arith.constant 0 : index
    %103 = vector.load %arg5[%c1_46, %c0_47, %c0_48, %c0_49] : memref<4x4x32x32xf32, #tpu.memory_space<vmem>>, vector<1x4x32x32xf32>
    %104 = vector.shape_cast %103 : vector<1x4x32x32xf32> to vector<4x32x32xf32>
    %c1_50 = arith.constant 1 : index
    %c0_51 = arith.constant 0 : index
    %c0_52 = arith.constant 0 : index
    %105 = vector.load %arg6[%c1_50, %c0_51, %c0_52] : memref<4x32x64xf32, #tpu.memory_space<vmem>>, vector<1x32x64xf32>
    %106 = vector.shape_cast %105 : vector<1x32x64xf32> to vector<32x64xf32>
    %c1_53 = arith.constant 1 : index
    %c0_54 = arith.constant 0 : index
    %c0_55 = arith.constant 0 : index
    %107 = vector.load %arg7[%c1_53, %c0_54, %c0_55] : memref<4x64x32xf32, #tpu.memory_space<vmem>>, vector<1x64x32xf32>
    %108 = vector.shape_cast %107 : vector<1x64x32xf32> to vector<64x32xf32>
    %c1_56 = arith.constant 1 : index
    %c0_57 = arith.constant 0 : index
    %c0_58 = arith.constant 0 : index
    %109 = vector.load %arg8[%c1_56, %c0_57, %c0_58] : memref<4x8x64xf32, #tpu.memory_space<vmem>>, vector<1x8x64xf32>
    %110 = vector.shape_cast %109 : vector<1x8x64xf32> to vector<8x64xf32>
    %111 = vector.extract_strided_slice %110 {offsets = [0, 0], sizes = [1, 64], strides = [1, 1]} : vector<8x64xf32> to vector<1x64xf32>
    %112 = vector.extract_strided_slice %110 {offsets = [1, 0], sizes = [1, 32], strides = [1, 1]} : vector<8x64xf32> to vector<1x32xf32>
    %113 = vector.extract_strided_slice %110 {offsets = [2, 0], sizes = [1, 32], strides = [1, 1]} : vector<8x64xf32> to vector<1x32xf32>
    %114 = vector.extract_strided_slice %110 {offsets = [3, 0], sizes = [1, 32], strides = [1, 1]} : vector<8x64xf32> to vector<1x32xf32>
    %115 = vector.extract_strided_slice %110 {offsets = [4, 0], sizes = [1, 32], strides = [1, 1]} : vector<8x64xf32> to vector<1x32xf32>
    %116 = vector.extract_strided_slice %110 {offsets = [5, 0], sizes = [1, 32], strides = [1, 1]} : vector<8x64xf32> to vector<1x32xf32>
    %117 = vector.shape_cast %100 : vector<16x32xf32> to vector<1x16x32xf32>
    %118 = vector.shape_cast %117 : vector<1x16x32xf32> to vector<1x16x32xf32>
    %119 = vector.broadcast %118 : vector<1x16x32xf32> to vector<4x16x32xf32>
    "tpu.trace_start"() <{level = 10 : i32, message = "hnd,hde->hne"}> : () -> ()
    %cst_59 = arith.constant dense<0.000000e+00> : vector<4x16x32xf32>
    %120 = tpu.matmul %119, %102, %cst_59 {dimension_numbers = #tpu.dot_dimension_numbers<[2], [1], [1], [2], [0, 0, 0, 1, 1, 2], [0], [0]>} : vector<4x16x32xf32>, vector<4x32x32xf32>, vector<4x16x32xf32> -> vector<4x16x32xf32>
    "tpu.trace_stop"() : () -> ()
    "tpu.trace_start"() <{level = 10 : i32, message = "hne,hme->hnm"}> : () -> ()
    %cst_60 = arith.constant dense<0.000000e+00> : vector<4x16x16xf32>
    %121 = tpu.matmul %120, %5, %cst_60 {dimension_numbers = #tpu.dot_dimension_numbers<[2], [2], [1], [1], [0, 0, 0, 1, 1, 1], [0], [0]>} : vector<4x16x32xf32>, vector<4x16x32xf32>, vector<4x16x16xf32> -> vector<4x16x16xf32>
    "tpu.trace_stop"() : () -> ()
    %122 = arith.addf %121, %9 : vector<4x16x16xf32>
    %cst_61 = arith.constant dense<0xFF800000> : vector<4x16xf32>
    %123 = vector.multi_reduction <maximumf>, %122, %cst_61 [2] : vector<4x16x16xf32> to vector<4x16xf32>
    %124 = vector.shape_cast %123 : vector<4x16xf32> to vector<4x16x1xf32>
    %125 = vector.broadcast %124 : vector<4x16x1xf32> to vector<4x16x16xf32>
    %126 = arith.subf %122, %125 : vector<4x16x16xf32>
    %127 = math.exp %126 : vector<4x16x16xf32>
    %cst_62 = arith.constant dense<0.000000e+00> : vector<4x16xf32>
    %128 = vector.multi_reduction <add>, %127, %cst_62 [2] : vector<4x16x16xf32> to vector<4x16xf32>
    %129 = vector.shape_cast %128 : vector<4x16xf32> to vector<4x16x1xf32>
    %130 = tpu.reciprocal %129 {approx = true} : vector<4x16x1xf32> -> vector<4x16x1xf32>
    %131 = vector.broadcast %130 : vector<4x16x1xf32> to vector<4x16x16xf32>
    %132 = arith.mulf %127, %131 : vector<4x16x16xf32>
    "tpu.trace_start"() <{level = 10 : i32, message = "hmd,hde->hme"}> : () -> ()
    %cst_63 = arith.constant dense<0.000000e+00> : vector<4x16x32xf32>
    %133 = tpu.matmul %5, %104, %cst_63 {dimension_numbers = #tpu.dot_dimension_numbers<[2], [1], [1], [2], [0, 0, 0, 1, 1, 2], [0], [0]>} : vector<4x16x32xf32>, vector<4x32x32xf32>, vector<4x16x32xf32> -> vector<4x16x32xf32>
    "tpu.trace_stop"() : () -> ()
    "tpu.trace_start"() <{level = 10 : i32, message = "hnm,hme->hne"}> : () -> ()
    %cst_64 = arith.constant dense<0.000000e+00> : vector<4x16x32xf32>
    %134 = tpu.matmul %132, %133, %cst_64 {dimension_numbers = #tpu.dot_dimension_numbers<[2], [1], [1], [2], [0, 0, 0, 1, 1, 2], [0], [0]>} : vector<4x16x16xf32>, vector<4x16x32xf32>, vector<4x16x32xf32> -> vector<4x16x32xf32>
    "tpu.trace_stop"() : () -> ()
    %cst_65 = arith.constant dense<0.000000e+00> : vector<16x32xf32>
    %135 = vector.multi_reduction <add>, %134, %cst_65 [0] : vector<4x16x32xf32> to vector<16x32xf32>
    %136 = arith.addf %100, %135 : vector<16x32xf32>
    %cst_66 = arith.constant dense<0.000000e+00> : vector<16xf32>
    %137 = vector.multi_reduction <add>, %136, %cst_66 [1] : vector<16x32xf32> to vector<16xf32>
    %138 = vector.shape_cast %137 : vector<16xf32> to vector<16x1xf32>
    %cst_67 = arith.constant 3.200000e+01 : f32
    %139 = vector.broadcast %cst_67 : f32 to vector<16x1xf32>
    %140 = arith.divf %138, %139 : vector<16x1xf32>
    %141 = vector.broadcast %140 : vector<16x1xf32> to vector<16x32xf32>
    %142 = arith.subf %136, %141 : vector<16x32xf32>
    %143 = arith.mulf %142, %142 : vector<16x32xf32>
    %cst_68 = arith.constant dense<0.000000e+00> : vector<16xf32>
    %144 = vector.multi_reduction <add>, %143, %cst_68 [1] : vector<16x32xf32> to vector<16xf32>
    %145 = vector.shape_cast %144 : vector<16xf32> to vector<16x1xf32>
    %cst_69 = arith.constant 3.200000e+01 : f32
    %146 = vector.broadcast %cst_69 : f32 to vector<16x1xf32>
    %147 = arith.divf %145, %146 : vector<16x1xf32>
    %148 = vector.broadcast %140 : vector<16x1xf32> to vector<16x32xf32>
    %149 = arith.subf %136, %148 : vector<16x32xf32>
    %cst_70 = arith.constant 9.99999997E-7 : f32
    %150 = vector.broadcast %cst_70 : f32 to vector<16x1xf32>
    %151 = arith.addf %147, %150 : vector<16x1xf32>
    %152 = math.rsqrt %151 : vector<16x1xf32>
    %153 = vector.broadcast %152 : vector<16x1xf32> to vector<16x32xf32>
    %154 = arith.mulf %149, %153 : vector<16x32xf32>
    %155 = vector.broadcast %113 : vector<1x32xf32> to vector<16x32xf32>
    %156 = arith.mulf %154, %155 : vector<16x32xf32>
    %157 = vector.broadcast %114 : vector<1x32xf32> to vector<16x32xf32>
    %158 = arith.addf %156, %157 : vector<16x32xf32>
    %cst_71 = arith.constant dense<0.000000e+00> : vector<16x64xf32>
    %159 = tpu.matmul %158, %106, %cst_71 {dimension_numbers = #tpu.dot_dimension_numbers<[1], [0], [0], [1], [0, 0, 1, 1], [], []>} : vector<16x32xf32>, vector<32x64xf32>, vector<16x64xf32> -> vector<16x64xf32>
    %160 = vector.broadcast %111 : vector<1x64xf32> to vector<16x64xf32>
    %161 = arith.addf %159, %160 : vector<16x64xf32>
    %cst_72 = arith.constant 0.000000e+00 : f32
    %162 = vector.broadcast %cst_72 : f32 to vector<16x64xf32>
    %163 = arith.maximumf %161, %162 : vector<16x64xf32>
    %cst_73 = arith.constant dense<0.000000e+00> : vector<16x32xf32>
    %164 = tpu.matmul %163, %108, %cst_73 {dimension_numbers = #tpu.dot_dimension_numbers<[1], [0], [0], [1], [0, 0, 1, 1], [], []>} : vector<16x64xf32>, vector<64x32xf32>, vector<16x32xf32> -> vector<16x32xf32>
    %165 = vector.broadcast %112 : vector<1x32xf32> to vector<16x32xf32>
    %166 = arith.addf %164, %165 : vector<16x32xf32>
    %167 = arith.addf %158, %166 : vector<16x32xf32>
    %cst_74 = arith.constant dense<0.000000e+00> : vector<16xf32>
    %168 = vector.multi_reduction <add>, %167, %cst_74 [1] : vector<16x32xf32> to vector<16xf32>
    %169 = vector.shape_cast %168 : vector<16xf32> to vector<16x1xf32>
    %cst_75 = arith.constant 3.200000e+01 : f32
    %170 = vector.broadcast %cst_75 : f32 to vector<16x1xf32>
    %171 = arith.divf %169, %170 : vector<16x1xf32>
    %172 = vector.broadcast %171 : vector<16x1xf32> to vector<16x32xf32>
    %173 = arith.subf %167, %172 : vector<16x32xf32>
    %174 = arith.mulf %173, %173 : vector<16x32xf32>
    %cst_76 = arith.constant dense<0.000000e+00> : vector<16xf32>
    %175 = vector.multi_reduction <add>, %174, %cst_76 [1] : vector<16x32xf32> to vector<16xf32>
    %176 = vector.shape_cast %175 : vector<16xf32> to vector<16x1xf32>
    %cst_77 = arith.constant 3.200000e+01 : f32
    %177 = vector.broadcast %cst_77 : f32 to vector<16x1xf32>
    %178 = arith.divf %176, %177 : vector<16x1xf32>
    %179 = vector.broadcast %171 : vector<16x1xf32> to vector<16x32xf32>
    %180 = arith.subf %167, %179 : vector<16x32xf32>
    %cst_78 = arith.constant 9.99999997E-7 : f32
    %181 = vector.broadcast %cst_78 : f32 to vector<16x1xf32>
    %182 = arith.addf %178, %181 : vector<16x1xf32>
    %183 = math.rsqrt %182 : vector<16x1xf32>
    %184 = vector.broadcast %183 : vector<16x1xf32> to vector<16x32xf32>
    %185 = arith.mulf %180, %184 : vector<16x32xf32>
    %186 = vector.broadcast %115 : vector<1x32xf32> to vector<16x32xf32>
    %187 = arith.mulf %185, %186 : vector<16x32xf32>
    %188 = vector.broadcast %116 : vector<1x32xf32> to vector<16x32xf32>
    %189 = arith.addf %187, %188 : vector<16x32xf32>
    %190 = vector.broadcast %2 : vector<16x1xf32> to vector<16x32xf32>
    %191 = arith.mulf %189, %190 : vector<16x32xf32>
    %c2 = arith.constant 2 : index
    %c0_79 = arith.constant 0 : index
    %c0_80 = arith.constant 0 : index
    %c0_81 = arith.constant 0 : index
    %192 = vector.load %arg4[%c2, %c0_79, %c0_80, %c0_81] : memref<4x4x32x32xf32, #tpu.memory_space<vmem>>, vector<1x4x32x32xf32>
    %193 = vector.shape_cast %192 : vector<1x4x32x32xf32> to vector<4x32x32xf32>
    %c2_82 = arith.constant 2 : index
    %c0_83 = arith.constant 0 : index
    %c0_84 = arith.constant 0 : index
    %c0_85 = arith.constant 0 : index
    %194 = vector.load %arg5[%c2_82, %c0_83, %c0_84, %c0_85] : memref<4x4x32x32xf32, #tpu.memory_space<vmem>>, vector<1x4x32x32xf32>
    %195 = vector.shape_cast %194 : vector<1x4x32x32xf32> to vector<4x32x32xf32>
    %c2_86 = arith.constant 2 : index
    %c0_87 = arith.constant 0 : index
    %c0_88 = arith.constant 0 : index
    %196 = vector.load %arg6[%c2_86, %c0_87, %c0_88] : memref<4x32x64xf32, #tpu.memory_space<vmem>>, vector<1x32x64xf32>
    %197 = vector.shape_cast %196 : vector<1x32x64xf32> to vector<32x64xf32>
    %c2_89 = arith.constant 2 : index
    %c0_90 = arith.constant 0 : index
    %c0_91 = arith.constant 0 : index
    %198 = vector.load %arg7[%c2_89, %c0_90, %c0_91] : memref<4x64x32xf32, #tpu.memory_space<vmem>>, vector<1x64x32xf32>
    %199 = vector.shape_cast %198 : vector<1x64x32xf32> to vector<64x32xf32>
    %c2_92 = arith.constant 2 : index
    %c0_93 = arith.constant 0 : index
    %c0_94 = arith.constant 0 : index
    %200 = vector.load %arg8[%c2_92, %c0_93, %c0_94] : memref<4x8x64xf32, #tpu.memory_space<vmem>>, vector<1x8x64xf32>
    %201 = vector.shape_cast %200 : vector<1x8x64xf32> to vector<8x64xf32>
    %202 = vector.extract_strided_slice %201 {offsets = [0, 0], sizes = [1, 64], strides = [1, 1]} : vector<8x64xf32> to vector<1x64xf32>
    %203 = vector.extract_strided_slice %201 {offsets = [1, 0], sizes = [1, 32], strides = [1, 1]} : vector<8x64xf32> to vector<1x32xf32>
    %204 = vector.extract_strided_slice %201 {offsets = [2, 0], sizes = [1, 32], strides = [1, 1]} : vector<8x64xf32> to vector<1x32xf32>
    %205 = vector.extract_strided_slice %201 {offsets = [3, 0], sizes = [1, 32], strides = [1, 1]} : vector<8x64xf32> to vector<1x32xf32>
    %206 = vector.extract_strided_slice %201 {offsets = [4, 0], sizes = [1, 32], strides = [1, 1]} : vector<8x64xf32> to vector<1x32xf32>
    %207 = vector.extract_strided_slice %201 {offsets = [5, 0], sizes = [1, 32], strides = [1, 1]} : vector<8x64xf32> to vector<1x32xf32>
    %208 = vector.shape_cast %191 : vector<16x32xf32> to vector<1x16x32xf32>
    %209 = vector.shape_cast %208 : vector<1x16x32xf32> to vector<1x16x32xf32>
    %210 = vector.broadcast %209 : vector<1x16x32xf32> to vector<4x16x32xf32>
    "tpu.trace_start"() <{level = 10 : i32, message = "hnd,hde->hne"}> : () -> ()
    %cst_95 = arith.constant dense<0.000000e+00> : vector<4x16x32xf32>
    %211 = tpu.matmul %210, %193, %cst_95 {dimension_numbers = #tpu.dot_dimension_numbers<[2], [1], [1], [2], [0, 0, 0, 1, 1, 2], [0], [0]>} : vector<4x16x32xf32>, vector<4x32x32xf32>, vector<4x16x32xf32> -> vector<4x16x32xf32>
    "tpu.trace_stop"() : () -> ()
    "tpu.trace_start"() <{level = 10 : i32, message = "hne,hme->hnm"}> : () -> ()
    %cst_96 = arith.constant dense<0.000000e+00> : vector<4x16x16xf32>
    %212 = tpu.matmul %211, %5, %cst_96 {dimension_numbers = #tpu.dot_dimension_numbers<[2], [2], [1], [1], [0, 0, 0, 1, 1, 1], [0], [0]>} : vector<4x16x32xf32>, vector<4x16x32xf32>, vector<4x16x16xf32> -> vector<4x16x16xf32>
    "tpu.trace_stop"() : () -> ()
    %213 = arith.addf %212, %9 : vector<4x16x16xf32>
    %cst_97 = arith.constant dense<0xFF800000> : vector<4x16xf32>
    %214 = vector.multi_reduction <maximumf>, %213, %cst_97 [2] : vector<4x16x16xf32> to vector<4x16xf32>
    %215 = vector.shape_cast %214 : vector<4x16xf32> to vector<4x16x1xf32>
    %216 = vector.broadcast %215 : vector<4x16x1xf32> to vector<4x16x16xf32>
    %217 = arith.subf %213, %216 : vector<4x16x16xf32>
    %218 = math.exp %217 : vector<4x16x16xf32>
    %cst_98 = arith.constant dense<0.000000e+00> : vector<4x16xf32>
    %219 = vector.multi_reduction <add>, %218, %cst_98 [2] : vector<4x16x16xf32> to vector<4x16xf32>
    %220 = vector.shape_cast %219 : vector<4x16xf32> to vector<4x16x1xf32>
    %221 = tpu.reciprocal %220 {approx = true} : vector<4x16x1xf32> -> vector<4x16x1xf32>
    %222 = vector.broadcast %221 : vector<4x16x1xf32> to vector<4x16x16xf32>
    %223 = arith.mulf %218, %222 : vector<4x16x16xf32>
    "tpu.trace_start"() <{level = 10 : i32, message = "hmd,hde->hme"}> : () -> ()
    %cst_99 = arith.constant dense<0.000000e+00> : vector<4x16x32xf32>
    %224 = tpu.matmul %5, %195, %cst_99 {dimension_numbers = #tpu.dot_dimension_numbers<[2], [1], [1], [2], [0, 0, 0, 1, 1, 2], [0], [0]>} : vector<4x16x32xf32>, vector<4x32x32xf32>, vector<4x16x32xf32> -> vector<4x16x32xf32>
    "tpu.trace_stop"() : () -> ()
    "tpu.trace_start"() <{level = 10 : i32, message = "hnm,hme->hne"}> : () -> ()
    %cst_100 = arith.constant dense<0.000000e+00> : vector<4x16x32xf32>
    %225 = tpu.matmul %223, %224, %cst_100 {dimension_numbers = #tpu.dot_dimension_numbers<[2], [1], [1], [2], [0, 0, 0, 1, 1, 2], [0], [0]>} : vector<4x16x16xf32>, vector<4x16x32xf32>, vector<4x16x32xf32> -> vector<4x16x32xf32>
    "tpu.trace_stop"() : () -> ()
    %cst_101 = arith.constant dense<0.000000e+00> : vector<16x32xf32>
    %226 = vector.multi_reduction <add>, %225, %cst_101 [0] : vector<4x16x32xf32> to vector<16x32xf32>
    %227 = arith.addf %191, %226 : vector<16x32xf32>
    %cst_102 = arith.constant dense<0.000000e+00> : vector<16xf32>
    %228 = vector.multi_reduction <add>, %227, %cst_102 [1] : vector<16x32xf32> to vector<16xf32>
    %229 = vector.shape_cast %228 : vector<16xf32> to vector<16x1xf32>
    %cst_103 = arith.constant 3.200000e+01 : f32
    %230 = vector.broadcast %cst_103 : f32 to vector<16x1xf32>
    %231 = arith.divf %229, %230 : vector<16x1xf32>
    %232 = vector.broadcast %231 : vector<16x1xf32> to vector<16x32xf32>
    %233 = arith.subf %227, %232 : vector<16x32xf32>
    %234 = arith.mulf %233, %233 : vector<16x32xf32>
    %cst_104 = arith.constant dense<0.000000e+00> : vector<16xf32>
    %235 = vector.multi_reduction <add>, %234, %cst_104 [1] : vector<16x32xf32> to vector<16xf32>
    %236 = vector.shape_cast %235 : vector<16xf32> to vector<16x1xf32>
    %cst_105 = arith.constant 3.200000e+01 : f32
    %237 = vector.broadcast %cst_105 : f32 to vector<16x1xf32>
    %238 = arith.divf %236, %237 : vector<16x1xf32>
    %239 = vector.broadcast %231 : vector<16x1xf32> to vector<16x32xf32>
    %240 = arith.subf %227, %239 : vector<16x32xf32>
    %cst_106 = arith.constant 9.99999997E-7 : f32
    %241 = vector.broadcast %cst_106 : f32 to vector<16x1xf32>
    %242 = arith.addf %238, %241 : vector<16x1xf32>
    %243 = math.rsqrt %242 : vector<16x1xf32>
    %244 = vector.broadcast %243 : vector<16x1xf32> to vector<16x32xf32>
    %245 = arith.mulf %240, %244 : vector<16x32xf32>
    %246 = vector.broadcast %204 : vector<1x32xf32> to vector<16x32xf32>
    %247 = arith.mulf %245, %246 : vector<16x32xf32>
    %248 = vector.broadcast %205 : vector<1x32xf32> to vector<16x32xf32>
    %249 = arith.addf %247, %248 : vector<16x32xf32>
    %cst_107 = arith.constant dense<0.000000e+00> : vector<16x64xf32>
    %250 = tpu.matmul %249, %197, %cst_107 {dimension_numbers = #tpu.dot_dimension_numbers<[1], [0], [0], [1], [0, 0, 1, 1], [], []>} : vector<16x32xf32>, vector<32x64xf32>, vector<16x64xf32> -> vector<16x64xf32>
    %251 = vector.broadcast %202 : vector<1x64xf32> to vector<16x64xf32>
    %252 = arith.addf %250, %251 : vector<16x64xf32>
    %cst_108 = arith.constant 0.000000e+00 : f32
    %253 = vector.broadcast %cst_108 : f32 to vector<16x64xf32>
    %254 = arith.maximumf %252, %253 : vector<16x64xf32>
    %cst_109 = arith.constant dense<0.000000e+00> : vector<16x32xf32>
    %255 = tpu.matmul %254, %199, %cst_109 {dimension_numbers = #tpu.dot_dimension_numbers<[1], [0], [0], [1], [0, 0, 1, 1], [], []>} : vector<16x64xf32>, vector<64x32xf32>, vector<16x32xf32> -> vector<16x32xf32>
    %256 = vector.broadcast %203 : vector<1x32xf32> to vector<16x32xf32>
    %257 = arith.addf %255, %256 : vector<16x32xf32>
    %258 = arith.addf %249, %257 : vector<16x32xf32>
    %cst_110 = arith.constant dense<0.000000e+00> : vector<16xf32>
    %259 = vector.multi_reduction <add>, %258, %cst_110 [1] : vector<16x32xf32> to vector<16xf32>
    %260 = vector.shape_cast %259 : vector<16xf32> to vector<16x1xf32>
    %cst_111 = arith.constant 3.200000e+01 : f32
    %261 = vector.broadcast %cst_111 : f32 to vector<16x1xf32>
    %262 = arith.divf %260, %261 : vector<16x1xf32>
    %263 = vector.broadcast %262 : vector<16x1xf32> to vector<16x32xf32>
    %264 = arith.subf %258, %263 : vector<16x32xf32>
    %265 = arith.mulf %264, %264 : vector<16x32xf32>
    %cst_112 = arith.constant dense<0.000000e+00> : vector<16xf32>
    %266 = vector.multi_reduction <add>, %265, %cst_112 [1] : vector<16x32xf32> to vector<16xf32>
    %267 = vector.shape_cast %266 : vector<16xf32> to vector<16x1xf32>
    %cst_113 = arith.constant 3.200000e+01 : f32
    %268 = vector.broadcast %cst_113 : f32 to vector<16x1xf32>
    %269 = arith.divf %267, %268 : vector<16x1xf32>
    %270 = vector.broadcast %262 : vector<16x1xf32> to vector<16x32xf32>
    %271 = arith.subf %258, %270 : vector<16x32xf32>
    %cst_114 = arith.constant 9.99999997E-7 : f32
    %272 = vector.broadcast %cst_114 : f32 to vector<16x1xf32>
    %273 = arith.addf %269, %272 : vector<16x1xf32>
    %274 = math.rsqrt %273 : vector<16x1xf32>
    %275 = vector.broadcast %274 : vector<16x1xf32> to vector<16x32xf32>
    %276 = arith.mulf %271, %275 : vector<16x32xf32>
    %277 = vector.broadcast %206 : vector<1x32xf32> to vector<16x32xf32>
    %278 = arith.mulf %276, %277 : vector<16x32xf32>
    %279 = vector.broadcast %207 : vector<1x32xf32> to vector<16x32xf32>
    %280 = arith.addf %278, %279 : vector<16x32xf32>
    %281 = vector.broadcast %2 : vector<16x1xf32> to vector<16x32xf32>
    %282 = arith.mulf %280, %281 : vector<16x32xf32>
    %c3 = arith.constant 3 : index
    %c0_115 = arith.constant 0 : index
    %c0_116 = arith.constant 0 : index
    %c0_117 = arith.constant 0 : index
    %283 = vector.load %arg4[%c3, %c0_115, %c0_116, %c0_117] : memref<4x4x32x32xf32, #tpu.memory_space<vmem>>, vector<1x4x32x32xf32>
    %284 = vector.shape_cast %283 : vector<1x4x32x32xf32> to vector<4x32x32xf32>
    %c3_118 = arith.constant 3 : index
    %c0_119 = arith.constant 0 : index
    %c0_120 = arith.constant 0 : index
    %c0_121 = arith.constant 0 : index
    %285 = vector.load %arg5[%c3_118, %c0_119, %c0_120, %c0_121] : memref<4x4x32x32xf32, #tpu.memory_space<vmem>>, vector<1x4x32x32xf32>
    %286 = vector.shape_cast %285 : vector<1x4x32x32xf32> to vector<4x32x32xf32>
    %c3_122 = arith.constant 3 : index
    %c0_123 = arith.constant 0 : index
    %c0_124 = arith.constant 0 : index
    %287 = vector.load %arg6[%c3_122, %c0_123, %c0_124] : memref<4x32x64xf32, #tpu.memory_space<vmem>>, vector<1x32x64xf32>
    %288 = vector.shape_cast %287 : vector<1x32x64xf32> to vector<32x64xf32>
    %c3_125 = arith.constant 3 : index
    %c0_126 = arith.constant 0 : index
    %c0_127 = arith.constant 0 : index
    %289 = vector.load %arg7[%c3_125, %c0_126, %c0_127] : memref<4x64x32xf32, #tpu.memory_space<vmem>>, vector<1x64x32xf32>
    %290 = vector.shape_cast %289 : vector<1x64x32xf32> to vector<64x32xf32>
    %c3_128 = arith.constant 3 : index
    %c0_129 = arith.constant 0 : index
    %c0_130 = arith.constant 0 : index
    %291 = vector.load %arg8[%c3_128, %c0_129, %c0_130] : memref<4x8x64xf32, #tpu.memory_space<vmem>>, vector<1x8x64xf32>
    %292 = vector.shape_cast %291 : vector<1x8x64xf32> to vector<8x64xf32>
    %293 = vector.extract_strided_slice %292 {offsets = [0, 0], sizes = [1, 64], strides = [1, 1]} : vector<8x64xf32> to vector<1x64xf32>
    %294 = vector.extract_strided_slice %292 {offsets = [1, 0], sizes = [1, 32], strides = [1, 1]} : vector<8x64xf32> to vector<1x32xf32>
    %295 = vector.extract_strided_slice %292 {offsets = [2, 0], sizes = [1, 32], strides = [1, 1]} : vector<8x64xf32> to vector<1x32xf32>
    %296 = vector.extract_strided_slice %292 {offsets = [3, 0], sizes = [1, 32], strides = [1, 1]} : vector<8x64xf32> to vector<1x32xf32>
    %297 = vector.extract_strided_slice %292 {offsets = [4, 0], sizes = [1, 32], strides = [1, 1]} : vector<8x64xf32> to vector<1x32xf32>
    %298 = vector.extract_strided_slice %292 {offsets = [5, 0], sizes = [1, 32], strides = [1, 1]} : vector<8x64xf32> to vector<1x32xf32>
    %299 = vector.shape_cast %282 : vector<16x32xf32> to vector<1x16x32xf32>
    %300 = vector.shape_cast %299 : vector<1x16x32xf32> to vector<1x16x32xf32>
    %301 = vector.broadcast %300 : vector<1x16x32xf32> to vector<4x16x32xf32>
    "tpu.trace_start"() <{level = 10 : i32, message = "hnd,hde->hne"}> : () -> ()
    %cst_131 = arith.constant dense<0.000000e+00> : vector<4x16x32xf32>
    %302 = tpu.matmul %301, %284, %cst_131 {dimension_numbers = #tpu.dot_dimension_numbers<[2], [1], [1], [2], [0, 0, 0, 1, 1, 2], [0], [0]>} : vector<4x16x32xf32>, vector<4x32x32xf32>, vector<4x16x32xf32> -> vector<4x16x32xf32>
    "tpu.trace_stop"() : () -> ()
    "tpu.trace_start"() <{level = 10 : i32, message = "hne,hme->hnm"}> : () -> ()
    %cst_132 = arith.constant dense<0.000000e+00> : vector<4x16x16xf32>
    %303 = tpu.matmul %302, %5, %cst_132 {dimension_numbers = #tpu.dot_dimension_numbers<[2], [2], [1], [1], [0, 0, 0, 1, 1, 1], [0], [0]>} : vector<4x16x32xf32>, vector<4x16x32xf32>, vector<4x16x16xf32> -> vector<4x16x16xf32>
    "tpu.trace_stop"() : () -> ()
    %304 = arith.addf %303, %9 : vector<4x16x16xf32>
    %cst_133 = arith.constant dense<0xFF800000> : vector<4x16xf32>
    %305 = vector.multi_reduction <maximumf>, %304, %cst_133 [2] : vector<4x16x16xf32> to vector<4x16xf32>
    %306 = vector.shape_cast %305 : vector<4x16xf32> to vector<4x16x1xf32>
    %307 = vector.broadcast %306 : vector<4x16x1xf32> to vector<4x16x16xf32>
    %308 = arith.subf %304, %307 : vector<4x16x16xf32>
    %309 = math.exp %308 : vector<4x16x16xf32>
    %cst_134 = arith.constant dense<0.000000e+00> : vector<4x16xf32>
    %310 = vector.multi_reduction <add>, %309, %cst_134 [2] : vector<4x16x16xf32> to vector<4x16xf32>
    %311 = vector.shape_cast %310 : vector<4x16xf32> to vector<4x16x1xf32>
    %312 = tpu.reciprocal %311 {approx = true} : vector<4x16x1xf32> -> vector<4x16x1xf32>
    %313 = vector.broadcast %312 : vector<4x16x1xf32> to vector<4x16x16xf32>
    %314 = arith.mulf %309, %313 : vector<4x16x16xf32>
    "tpu.trace_start"() <{level = 10 : i32, message = "hmd,hde->hme"}> : () -> ()
    %cst_135 = arith.constant dense<0.000000e+00> : vector<4x16x32xf32>
    %315 = tpu.matmul %5, %286, %cst_135 {dimension_numbers = #tpu.dot_dimension_numbers<[2], [1], [1], [2], [0, 0, 0, 1, 1, 2], [0], [0]>} : vector<4x16x32xf32>, vector<4x32x32xf32>, vector<4x16x32xf32> -> vector<4x16x32xf32>
    "tpu.trace_stop"() : () -> ()
    "tpu.trace_start"() <{level = 10 : i32, message = "hnm,hme->hne"}> : () -> ()
    %cst_136 = arith.constant dense<0.000000e+00> : vector<4x16x32xf32>
    %316 = tpu.matmul %314, %315, %cst_136 {dimension_numbers = #tpu.dot_dimension_numbers<[2], [1], [1], [2], [0, 0, 0, 1, 1, 2], [0], [0]>} : vector<4x16x16xf32>, vector<4x16x32xf32>, vector<4x16x32xf32> -> vector<4x16x32xf32>
    "tpu.trace_stop"() : () -> ()
    %cst_137 = arith.constant dense<0.000000e+00> : vector<16x32xf32>
    %317 = vector.multi_reduction <add>, %316, %cst_137 [0] : vector<4x16x32xf32> to vector<16x32xf32>
    %318 = arith.addf %282, %317 : vector<16x32xf32>
    %cst_138 = arith.constant dense<0.000000e+00> : vector<16xf32>
    %319 = vector.multi_reduction <add>, %318, %cst_138 [1] : vector<16x32xf32> to vector<16xf32>
    %320 = vector.shape_cast %319 : vector<16xf32> to vector<16x1xf32>
    %cst_139 = arith.constant 3.200000e+01 : f32
    %321 = vector.broadcast %cst_139 : f32 to vector<16x1xf32>
    %322 = arith.divf %320, %321 : vector<16x1xf32>
    %323 = vector.broadcast %322 : vector<16x1xf32> to vector<16x32xf32>
    %324 = arith.subf %318, %323 : vector<16x32xf32>
    %325 = arith.mulf %324, %324 : vector<16x32xf32>
    %cst_140 = arith.constant dense<0.000000e+00> : vector<16xf32>
    %326 = vector.multi_reduction <add>, %325, %cst_140 [1] : vector<16x32xf32> to vector<16xf32>
    %327 = vector.shape_cast %326 : vector<16xf32> to vector<16x1xf32>
    %cst_141 = arith.constant 3.200000e+01 : f32
    %328 = vector.broadcast %cst_141 : f32 to vector<16x1xf32>
    %329 = arith.divf %327, %328 : vector<16x1xf32>
    %330 = vector.broadcast %322 : vector<16x1xf32> to vector<16x32xf32>
    %331 = arith.subf %318, %330 : vector<16x32xf32>
    %cst_142 = arith.constant 9.99999997E-7 : f32
    %332 = vector.broadcast %cst_142 : f32 to vector<16x1xf32>
    %333 = arith.addf %329, %332 : vector<16x1xf32>
    %334 = math.rsqrt %333 : vector<16x1xf32>
    %335 = vector.broadcast %334 : vector<16x1xf32> to vector<16x32xf32>
    %336 = arith.mulf %331, %335 : vector<16x32xf32>
    %337 = vector.broadcast %295 : vector<1x32xf32> to vector<16x32xf32>
    %338 = arith.mulf %336, %337 : vector<16x32xf32>
    %339 = vector.broadcast %296 : vector<1x32xf32> to vector<16x32xf32>
    %340 = arith.addf %338, %339 : vector<16x32xf32>
    %cst_143 = arith.constant dense<0.000000e+00> : vector<16x64xf32>
    %341 = tpu.matmul %340, %288, %cst_143 {dimension_numbers = #tpu.dot_dimension_numbers<[1], [0], [0], [1], [0, 0, 1, 1], [], []>} : vector<16x32xf32>, vector<32x64xf32>, vector<16x64xf32> -> vector<16x64xf32>
    %342 = vector.broadcast %293 : vector<1x64xf32> to vector<16x64xf32>
    %343 = arith.addf %341, %342 : vector<16x64xf32>
    %cst_144 = arith.constant 0.000000e+00 : f32
    %344 = vector.broadcast %cst_144 : f32 to vector<16x64xf32>
    %345 = arith.maximumf %343, %344 : vector<16x64xf32>
    %cst_145 = arith.constant dense<0.000000e+00> : vector<16x32xf32>
    %346 = tpu.matmul %345, %290, %cst_145 {dimension_numbers = #tpu.dot_dimension_numbers<[1], [0], [0], [1], [0, 0, 1, 1], [], []>} : vector<16x64xf32>, vector<64x32xf32>, vector<16x32xf32> -> vector<16x32xf32>
    %347 = vector.broadcast %294 : vector<1x32xf32> to vector<16x32xf32>
    %348 = arith.addf %346, %347 : vector<16x32xf32>
    %349 = arith.addf %340, %348 : vector<16x32xf32>
    %cst_146 = arith.constant dense<0.000000e+00> : vector<16xf32>
    %350 = vector.multi_reduction <add>, %349, %cst_146 [1] : vector<16x32xf32> to vector<16xf32>
    %351 = vector.shape_cast %350 : vector<16xf32> to vector<16x1xf32>
    %cst_147 = arith.constant 3.200000e+01 : f32
    %352 = vector.broadcast %cst_147 : f32 to vector<16x1xf32>
    %353 = arith.divf %351, %352 : vector<16x1xf32>
    %354 = vector.broadcast %353 : vector<16x1xf32> to vector<16x32xf32>
    %355 = arith.subf %349, %354 : vector<16x32xf32>
    %356 = arith.mulf %355, %355 : vector<16x32xf32>
    %cst_148 = arith.constant dense<0.000000e+00> : vector<16xf32>
    %357 = vector.multi_reduction <add>, %356, %cst_148 [1] : vector<16x32xf32> to vector<16xf32>
    %358 = vector.shape_cast %357 : vector<16xf32> to vector<16x1xf32>
    %cst_149 = arith.constant 3.200000e+01 : f32
    %359 = vector.broadcast %cst_149 : f32 to vector<16x1xf32>
    %360 = arith.divf %358, %359 : vector<16x1xf32>
    %361 = vector.broadcast %353 : vector<16x1xf32> to vector<16x32xf32>
    %362 = arith.subf %349, %361 : vector<16x32xf32>
    %cst_150 = arith.constant 9.99999997E-7 : f32
    %363 = vector.broadcast %cst_150 : f32 to vector<16x1xf32>
    %364 = arith.addf %360, %363 : vector<16x1xf32>
    %365 = math.rsqrt %364 : vector<16x1xf32>
    %366 = vector.broadcast %365 : vector<16x1xf32> to vector<16x32xf32>
    %367 = arith.mulf %362, %366 : vector<16x32xf32>
    %368 = vector.broadcast %297 : vector<1x32xf32> to vector<16x32xf32>
    %369 = arith.mulf %367, %368 : vector<16x32xf32>
    %370 = vector.broadcast %298 : vector<1x32xf32> to vector<16x32xf32>
    %371 = arith.addf %369, %370 : vector<16x32xf32>
    %372 = vector.broadcast %2 : vector<16x1xf32> to vector<16x32xf32>
    %373 = arith.mulf %371, %372 : vector<16x32xf32>
    %c0_151 = arith.constant 0 : index
    %c0_152 = arith.constant 0 : index
    %374 = vector.load %arg9[%c0_151, %c0_152] : memref<16x32xf32, #tpu.memory_space<vmem>>, vector<16x32xf32>
    tpu.vector_store %arg9[%c0_151, %c0_152], %373 {strides = array<i32>} : memref<16x32xf32, #tpu.memory_space<vmem>>, vector<16x32xf32>,
    return
  }
}

</mosaic_0001>

<bundles_post_ra>
// kernel: eq.8
= control target key start
LH: loop header
LB: loop body
LE: loop exit
PB: predicated region body
PF: predicated region fallthrough
CT: control target
= control target key end

     0   :  { %vm7_vm0 = vcmask 64512   ;;  %vm13_vm1 = vcmask 130112   ;;  %s39_s0 = inlined_call_operand.vmem [shape: s32[2,8], index: 0, kind: input, shape index: {}]   ;;  %s40_s1 = inlined_call_operand.vmem [shape: s32[16], index: 1, kind: output, shape index: {}]  }
   0x1   :  { %v4_v0 = vld [vmem:[%s39_s0] sm:$0x3]  ;;  %s22_s0 = smov 8  }
   0x2   :  { %5 = vst [vmem:[#allocation1] sm:$0x3] %v4_v0 }
   0x9   :  { %v10_v1 = vld [vmem:[#allocation1 + $0x1] sm:$0x1]   ;;  %v6_v2 = vld [vmem:[#allocation1] sm:$0x1]  }
   0xa   :  { %11 = vrot.lane.b32.xlu0 %v10_v1, %s22_s0  ;;  %8 = vst.msk [vmem:[#allocation0] sm:$0x1] %vm7_vm0, %v6_v2  }
  0x7c   :  { %v12_v3 = vpop.permute.xlu0 %11  }
  0x7d   :  { %14 = vst.msk [vmem:[#allocation0] sm:$0x1] %vm13_vm1, %v12_v3  }
  0x84   :  { %v17_v4 = vld [vmem:[#allocation0] sm:$0x1] }
  0x85   :  { %20 = vst [vmem:[%s40_s1] sm:$0x1] %v17_v4 }

// kernel: _cr_encoder_forward.1
= control target key start
LH: loop header
LB: loop body
LE: loop exit
PB: predicated region body
PF: predicated region fallthrough
CT: control target
= control target key end

     0   :  { %14 = vsyncpa [#allocation3], 0  ;;  %s4489_s0 = inlined_call_operand.vmem [shape: f32[16,32], index: 0, kind: input, shape index: {}]   ;;  %s4490_s1 = inlined_call_operand.vmem [shape: f32[16,32], index: 1, kind: input, shape index: {}]   ;;  %s4491_s2 = inlined_call_operand.vmem [shape: f32[16,16], index: 2, kind: input, shape index: {}]   ;;  %s4492_s3 = inlined_call_operand.vmem [shape: f32[16,1], index: 3, kind: input, shape index: {}]   ;;  %s4493_s4 = inlined_call_operand.hbm [shape: f32[4,4,32,32], index: 4, kind: input, shape index: {}]   ;;  %s4494_s5 = inlined_call_operand.hbm [shape: f32[4,4,32,32], index: 5, kind: input, shape index: {}]   ;;  %s4495_s6 = inlined_call_operand.vmem [shape: f32[4,32,64], index: 6, kind: input, shape index: {}]   ;;  %s4496_s7 = inlined_call_operand.vmem [shape: f32[4,64,32], index: 7, kind: input, shape index: {}]   ;;  %s4497_s8 = inlined_call_operand.vmem [shape: f32[4,8,64], index: 8, kind: input, shape index: {}]   ;;  %s4498_s9 = inlined_call_operand.hbm [shape: f32[16,32], index: 9, kind: output, shape index: {}]  }
   0x1   :  { %15 = vsyncpa [#allocation6], 0 }
   0x2   :  { %16 = vsyncpa [#allocation4], 0  ;;  %s29_s11 = sshll.u32 %s4493_s4, 4  ;;  %s3554_s12 = smov [#allocation2]   ;;  %s30_s11 = int_to_ptr.hbm [resolvable:$true] %s29_s11 }
   0x3   :  { %s31_s13 = sshll.u32 %s3554_s12, 4  ;;  %s42_s16 = sshll.u32 %s4494_s5, 4  ;;  %s32_s13 = int_to_ptr.vmem [resolvable:$true] %s31_s13  ;;  %s43_s16 = int_to_ptr.hbm [resolvable:$true] %s42_s16 }
   0x4   :  { %s3555_s17 = smov 128   ;;  %s3556_s18 = smov 8  }
   0x5   :  { %37 = dma.hbm_to_vmem [thread:$0]  %s30_s11, 8192, %s32_s13, [#allocation3], %s3555_s17, %s3555_s17, %s3556_s18  }
   0x6   :  { %s3557_s19 = smov [#allocation5]  }
   0x7   :  { %s44_s20 = sshll.u32 %s3557_s19, 4  ;;  %s45_s20 = int_to_ptr.vmem [resolvable:$true] %s44_s20 }
   0x8   :  { %50 = dma.hbm_to_vmem [thread:$0]  %s43_s16, 8192, %s45_s20, [#allocation6], %s3555_s17, %s3555_s17, %s3556_s18  }
   0x9   :  { %3548 = dma.done.wait [#allocation3], 8192  }
   0xa   :  { %3549 = vsyncadd [#allocation3], 4294959104 }
   0xb   :  { %3550 = dma.done.wait [#allocation6], 8192  }
   0xc   :  { %3551 = vsyncadd [#allocation6], 4294959104  ;;  %v76_v0 = vld [vmem:[#allocation2 + $0x18] sm:$0xff]  ;;  %v75_v2 = vld [vmem:[#allocation2 + $0x10] sm:$0xff]  ;;  %vm118_vm0 = vcmask 261120   ;;  %vm339_vm1 = vcmask 130048  }
   0xd   :  { %v84_v1 = vld [vmem:[#allocation2 + $0x58] sm:$0xff]  ;;  %137 = vmatpush.msra.mxu0 %v76_v0  ;;  %v83_v3 = vld [vmem:[#allocation2 + $0x50] sm:$0xff]  ;;  %v74_v4 = vld [vmem:[#allocation2 + $0x8] sm:$0xff]  ;;  %vm742_vm9 = vcmask 523264   ;;  %s3070_s11 = sshll.u32 %s4498_s9, 4  ;;  %s3071_s11 = int_to_ptr.hbm [resolvable:$true] %s3070_s11 }
   0xe   :  { %183 = vmatpush.msra.mxu2 %v84_v1  ;;  %v82_v5 = vld [vmem:[#allocation2 + $0x48] sm:$0xff]  ;;  %v80_v6 = vld [vmem:[#allocation2 + $0x38] sm:$0xff]  ;;  %v79_v8 = vld [vmem:[#allocation2 + $0x30] sm:$0xff] }
   0xf   :  { %138 = vmatpush.msra.mxu0 %v75_v2  ;;  %v88_v7 = vld [vmem:[#allocation2 + $0x78] sm:$0xff]  ;;  %v73_v9 = vld [vmem:[#allocation2] sm:$0xff]  ;;  %160 = vmatpush.msra.mxu1 %v80_v6  ;;  %v87_v11 = vld [vmem:[#allocation2 + $0x70] sm:$0xff] }
  0x10   :  { %184 = vmatpush.msra.mxu2 %v83_v3  ;;  %v81_v10 = vld [vmem:[#allocation2 + $0x40] sm:$0xff]  ;;  %206 = vmatpush.msra.mxu3 %v88_v7  ;;  %v78_v13 = vld [vmem:[#allocation2 + $0x28] sm:$0xff]  ;;  %v100_v30 = vld [vmem:[#allocation5 + $0x58] sm:$0xff] }
  0x11   :  { %139 = vmatpush.msra.mxu0 %v74_v4  ;;  %v3626_v12 = vld [vmem:[%s4489_s0] sm:$0xff]  ;;  %161 = vmatpush.msra.mxu1 %v79_v8  ;;  %v86_v14 = vld [vmem:[#allocation2 + $0x68] sm:$0xff]  ;;  %v99_v31 = vld [vmem:[#allocation5 + $0x50] sm:$0xff] }
  0x12   :  { %185 = vmatpush.msra.mxu2 %v82_v5  ;;  %207 = vmatpush.msra.mxu3 %v87_v11  ;;  %v3631_v15 = vld [vmem:[%s4490_s1 + $0x8] sm:$0xff]  ;;  %v77_v16 = vld [vmem:[#allocation2 + $0x20] sm:$0xff]  ;;  %v104_v32 = vld [vmem:[#allocation5 + $0x78] sm:$0xff] }
  0x13   :  { %140 = vmatpush.msra.mxu0 %v73_v9  ;;  %v85_v17 = vld [vmem:[#allocation2 + $0x60] sm:$0xff]  ;;  %162 = vmatpush.msra.mxu1 %v78_v13  ;;  %v3653_v19 = vld [vmem:[%s4489_s0 + $0x8] sm:$0xff]  ;;  %v103_v34 = vld [vmem:[#allocation5 + $0x70] sm:$0xff] }
  0x14   :  { %186 = vmatpush.msra.mxu2 %v81_v10  ;;  %3084 = vmatmul.msk.f32.vlgmr.msra.gmra.mxu0 %vm118_vm0, %v3626_v12  ;;  %v3644_v18 = vld [vmem:[%s4490_s1] sm:$0xff]  ;;  %v98_v35 = vld [vmem:[#allocation5 + $0x48] sm:$0xff]  ;;  %v92_v37 = vld [vmem:[#allocation5 + $0x18] sm:$0xff] }
  0x15   :  { %3088 = vmatmul.msk.f32.vlgmr.msra.gmra.mxu2 %vm118_vm0, %v3626_v12  ;;  %208 = vmatpush.msra.mxu3 %v86_v14  ;;  %v3686_v28 = vld [vmem:[%s4491_s2] sm:$0xff]  ;;  %v102_v36 = vld [vmem:[#allocation5 + $0x68] sm:$0xff]  ;;  %v96_v39 = vld [vmem:[#allocation5 + $0x38] sm:$0xff] }
  0x16   :  { %3100 = vmatpush.xpose.msk.msrb.mxu2 %vm118_vm0, %v3631_v15  ;;  %3092 = vmatpush.xpose.msk.msrb.mxu0 %vm118_vm0, %v3631_v15  ;;  %v91_v40 = vld [vmem:[#allocation5 + $0x10] sm:$0xff]  ;;  %v97_v42 = vld [vmem:[#allocation5 + $0x40] sm:$0xff]  ;;  %v90_v46 = vld [vmem:[#allocation5 + $0x8] sm:$0xff] }
  0x17   :  { %163 = vmatpush.msra.mxu1 %v77_v16  ;;  %209 = vmatpush.msra.mxu3 %v85_v17  ;;  %v101_v43 = vld [vmem:[#allocation5 + $0x60] sm:$0xff]  ;;  %v95_v45 = vld [vmem:[#allocation5 + $0x30] sm:$0xff]  ;;  %v94_v47 = vld [vmem:[#allocation5 + $0x28] sm:$0xff] }
  0x18   :  { %3086 = vmatmul.msk.f32.vlgmr.msra.gmra.mxu1 %vm118_vm0, %v3626_v12  ;;  %3090 = vmatmul.msk.f32.vlgmr.msra.gmra.mxu3 %vm118_vm0, %v3626_v12  ;;  %v89_v48 = vld [vmem:[#allocation5] sm:$0xff]  ;;  %v3705_v50 = vld [vmem:[%s4491_s2 + $0x8] sm:$0xff] }
  0x19   :  { %3104 = vmatpush.xpose.msk.msrb.mxu3 %vm118_vm0, %v3631_v15  ;;  %3096 = vmatpush.xpose.msk.msrb.mxu1 %vm118_vm0, %v3631_v15  ;;  %v93_v51 = vld [vmem:[#allocation5 + $0x20] sm:$0xff] }
  0x1a   :  { %3093 = vmatpush.xpose.msk.msrb.mxu0 %vm118_vm0, %v3644_v18  ;;  %3101 = vmatpush.xpose.msk.msrb.mxu2 %vm118_vm0, %v3644_v18 }
  0x1c   :  { %3085 = vmatmul.msk.f32.gmra.mxu0 %vm118_vm0, %v3653_v19 }
  0x1d   :  { %3089 = vmatmul.msk.f32.gmra.mxu2 %vm118_vm0, %v3653_v19  ;;  %3097 = vmatpush.xpose.msk.msrb.mxu1 %vm118_vm0, %v3644_v18 }
  0x1e   :  { %3105 = vmatpush.xpose.msk.msrb.mxu3 %vm118_vm0, %v3644_v18  ;;  %486 = vmatpush.msra.mxu2 %v100_v30 }
  0x1f   :  { %440 = vmatpush.msra.mxu0 %v92_v37 }
  0x20   :  { %3087 = vmatmul.msk.f32.gmra.mxu1 %vm118_vm0, %v3653_v19  ;;  %3091 = vmatmul.msk.f32.gmra.mxu3 %vm118_vm0, %v3653_v19 }
  0x21   :  { %487 = vmatpush.msra.mxu2 %v99_v31  ;;  %463 = vmatpush.msra.mxu1 %v96_v39 }
  0x22   :  { %509 = vmatpush.msra.mxu3 %v104_v32  ;;  %441 = vmatpush.msra.mxu0 %v91_v40 }
  0x23   :  { %488 = vmatpush.msra.mxu2 %v98_v35  ;;  %464 = vmatpush.msra.mxu1 %v95_v45 }
  0x24   :  { %510 = vmatpush.msra.mxu3 %v103_v34  ;;  %442 = vmatpush.msra.mxu0 %v90_v46 }
  0x25   :  { %489 = vmatpush.msra.mxu2 %v97_v42  ;;  %465 = vmatpush.msra.mxu1 %v94_v47 }
  0x26   :  { %511 = vmatpush.msra.mxu3 %v102_v36  ;;  %443 = vmatpush.msra.mxu0 %v89_v48 }
  0x27   :  { %466 = vmatpush.msra.mxu1 %v93_v51 }
  0x28   :  { %512 = vmatpush.msra.mxu3 %v101_v43 }
  0x91   :  { %v142_v20 = vpop.f32.mrf.mxu0 }
  0x92   :  { %3094 = vmatmul.msk.f32.vlgmr.msrb.gmra.mxu0 %vm118_vm0, %v142_v20 }
  0x95   :  { %v165_v21 = vpop.f32.mrf.mxu1 }
  0x96   :  { %3098 = vmatmul.msk.f32.vlgmr.msrb.gmra.mxu1 %vm118_vm0, %v165_v21 }
  0x98   :  { %v188_v22 = vpop.f32.mrf.mxu2 }
  0x99   :  { %3102 = vmatmul.msk.f32.vlgmr.msrb.gmra.mxu2 %vm118_vm0, %v188_v22  ;;  %v145_v23 = vpop.f32.mrf.mxu0 }
  0x9a   :  { %3095 = vmatmul.msk.f32.gmra.mxu0 %vm118_vm0, %v145_v23 }
  0x9b   :  { %v211_v24 = vpop.f32.mrf.mxu3 }
  0x9c   :  { %3106 = vmatmul.msk.f32.vlgmr.msrb.gmra.mxu3 %vm118_vm0, %v211_v24 }
  0x9d   :  { %v168_v25 = vpop.f32.mrf.mxu1 }
  0x9e   :  { %3099 = vmatmul.msk.f32.gmra.mxu1 %vm118_vm0, %v168_v25 }
  0xa0   :  { %v191_v26 = vpop.f32.mrf.mxu2 }
  0xa1   :  { %3103 = vmatmul.msk.f32.gmra.mxu2 %vm118_vm0, %v191_v26 }
  0xa2   :  { %3108 = vmatmul.msk.f32.vlgmr.msra.gmra.mxu0 %vm118_vm0, %v3644_v18 }
  0xa3   :  { %v214_v27 = vpop.f32.mrf.mxu3 }
  0xa4   :  { %3107 = vmatmul.msk.f32.gmra.mxu3 %vm118_vm0, %v214_v27 }
  0xa6   :  { %3110 = vmatmul.msk.f32.vlgmr.msra.gmra.mxu1 %vm118_vm0, %v3644_v18 }
  0xa9   :  { %3112 = vmatmul.msk.f32.vlgmr.msra.gmra.mxu2 %vm118_vm0, %v3644_v18 }
  0xaa   :  { %3109 = vmatmul.msk.f32.gmra.mxu0 %vm118_vm0, %v3631_v15 }
  0xac   :  { %3114 = vmatmul.msk.f32.vlgmr.msra.gmra.mxu3 %vm118_vm0, %v3644_v18 }
  0xae   :  { %3111 = vmatmul.msk.f32.gmra.mxu1 %vm118_vm0, %v3631_v15 }
  0xb1   :  { %3113 = vmatmul.msk.f32.gmra.mxu2 %vm118_vm0, %v3631_v15 }
  0xb4   :  { %3115 = vmatmul.msk.f32.gmra.mxu3 %vm118_vm0, %v3631_v15 }
 0x10f   :  { %v246_v29 = vpop.f32.mrf.mxu0 }
 0x110   :  { %v3689_v33 = vadd.f32 %v246_v29, %v3686_v28 }
 0x112   :  { %v340_v38 = vsel %vm339_vm1, %v3689_v33, -inf }
 0x113   :  { %341 = vmax.xlane.f32.xlu1 %v340_v38  ;;  %v275_v41 = vpop.f32.mrf.mxu1 }
 0x114   :  { %v3694_v44 = vadd.f32 %v275_v41, %v3686_v28 }
 0x116   :  { %v346_v49 = vsel %vm339_vm1, %v3694_v44, -inf }
 0x117   :  { %v249_v63 = vpop.f32.mrf.mxu0 }
 0x118   :  { %v250_v2 = vadd.f32 %v249_v63, %v3705_v50 }
 0x11a   :  { %v343_v5 = vsel %vm339_vm1, %v250_v2, -inf }
 0x11b   :  { %347 = vmax.xlane.f32.xlu1 %v346_v49  ;;  %v278_v53 = vpop.f32.mrf.mxu1 }
 0x11c   :  { %v304_v52 = vpop.f32.mrf.mxu2  ;;  %v3711_v55 = vadd.f32 %v278_v53, %v3705_v50 }
 0x11d   :  { %v305_v54 = vadd.f32 %v304_v52, %v3686_v28 }
 0x11e   :  { %v349_v59 = vsel %vm339_vm1, %v3711_v55, -inf }
 0x11f   :  { %v352_v56 = vsel %vm339_vm1, %v305_v54, -inf  ;;  %v333_v57 = vpop.f32.mrf.mxu3  ;;  %v445_v52 = vpop.f32.mrf.mxu0 }
 0x120   :  { %353 = vmax.xlane.f32.xlu0 %v352_v56  ;;  %v334_v58 = vadd.f32 %v333_v57, %v3686_v28 }
 0x122   :  { %v358_v62 = vsel %vm339_vm1, %v334_v58, -inf }
 0x123   :  { %350 = vmax.xlane.f32.xlu1 %v349_v59 }
 0x124   :  { %v307_v60 = vpop.f32.mrf.mxu2 }
 0x125   :  { %v308_v61 = vadd.f32 %v307_v60, %v3705_v50 }
 0x127   :  { %v355_v0 = vsel %vm339_vm1, %v308_v61, -inf  ;;  %v336_v1 = vpop.f32.mrf.mxu3  ;;  %v448_v56 = vpop.f32.mrf.mxu0 }
 0x128   :  { %356 = vmax.xlane.f32.xlu2 %v355_v0  ;;  %359 = vmax.xlane.f32.xlu0 %v358_v62  ;;  %v337_v3 = vadd.f32 %v336_v1, %v3705_v50 }
 0x129   :  { %540 = vmatpush.msrb.mxu0 %v448_v56 }
 0x12a   :  { %v361_v4 = vsel %vm339_vm1, %v337_v3, -inf }
 0x12b   :  { %541 = vmatpush.msrb.mxu0 %v445_v52 }
 0x12c   :  { %v491_v53 = vpop.f32.mrf.mxu2 }
 0x130   :  { %362 = vmax.xlane.f32.xlu2 %v361_v4  ;;  %344 = vmax.xlane.f32.xlu0 %v343_v5 }
 0x134   :  { %v494_v57 = vpop.f32.mrf.mxu2 }
 0x135   :  { %598 = vmatpush.msrb.mxu2 %v494_v57 }
 0x137   :  { %599 = vmatpush.msrb.mxu2 %v491_v53 }
 0x186   :  { %v342_v6 = vpop.xlane.xlu1 %341 }
 0x187   :  { %v364_v7 = vsub.f32 %v3689_v33, %v342_v6 }
 0x189   :  { %v372_v8 = vmul.f32 1.442695, %v364_v7 }
 0x18b   :  { %3308 = vpow2.f32 %v372_v8 }
 0x18e   :  { %v348_v10 = vpop.xlane.xlu1 %347 }
 0x18f   :  { %v366_v16 = vsub.f32 %v3694_v44, %v348_v10 }
 0x191   :  { %v3735_v9 = vpop.eup %3308  ;;  %v376_v20 = vmul.f32 1.442695, %v366_v16 }
 0x192   :  { %v388_v13 = vsel %vm339_vm1, %v3735_v9, 0.0 }
 0x193   :  { %v354_v11 = vpop.xlane.xlu0 %353  ;;  %389 = vadd.xlane.f32.xlu1 %v388_v13 }
 0x194   :  { %v368_v14 = vsub.f32 %v305_v54, %v354_v11  ;;  %v514_v54 = vpop.f32.mrf.mxu3 }
 0x196   :  { %v380_v17 = vmul.f32 1.442695, %v368_v14  ;;  %v351_v33 = vpop.xlane.xlu1 %350 }
 0x197   :  { %v367_v39 = vsub.f32 %v3711_v55, %v351_v33  ;;  %v468_v55 = vpop.f32.mrf.mxu1 }
 0x198   :  { %3310 = vpow2.f32 %v380_v17 }
 0x199   :  { %3312 = vpow2.f32 %v376_v20  ;;  %v378_v42 = vmul.f32 1.442695, %v367_v39 }
 0x19b   :  { %v357_v21 = vpop.xlane.xlu2 %356  ;;  %v360_v22 = vpop.xlane.xlu0 %359 }
 0x19c   :  { %v370_v23 = vsub.f32 %v334_v58, %v360_v22  ;;  %v369_v26 = vsub.f32 %v308_v61, %v357_v21  ;;  %v517_v58 = vpop.f32.mrf.mxu3 }
 0x19d   :  { %627 = vmatpush.msrb.mxu3 %v517_v58 }
 0x19e   :  { %v3740_v24 = vpop.eup %3310  ;;  %v384_v25 = vmul.f32 1.442695, %v370_v23  ;;  %v382_v29 = vmul.f32 1.442695, %v369_v26 }
 0x19f   :  { %v400_v27 = vsel %vm339_vm1, %v3740_v24, 0.0  ;;  %v3313_v32 = vpop.eup %3312  ;;  %v471_v59 = vpop.f32.mrf.mxu1  ;;  %628 = vmatpush.msrb.mxu3 %v514_v54 }
 0x1a0   :  { %401 = vadd.xlane.f32.xlu2 %v400_v27  ;;  %3314 = vpow2.f32 %v384_v25  ;;  %v394_v40 = vsel %vm339_vm1, %v3313_v32, 0.0  ;;  %569 = vmatpush.msrb.mxu1 %v471_v59 }
 0x1a1   :  { %3316 = vpow2.f32 %v382_v29 }
 0x1a2   :  { %570 = vmatpush.msrb.mxu1 %v468_v55 }
 0x1a3   :  { %v363_v30 = vpop.xlane.xlu2 %362  ;;  %v345_v31 = vpop.xlane.xlu0 %344 }
 0x1a4   :  { %v371_v34 = vsub.f32 %v337_v3, %v363_v30  ;;  %v365_v35 = vsub.f32 %v250_v2, %v345_v31 }
 0x1a6   :  { %v386_v36 = vmul.f32 1.442695, %v371_v34  ;;  %v374_v37 = vmul.f32 1.442695, %v365_v35  ;;  %v3315_v38 = vpop.eup %3314 }
 0x1a7   :  { %v406_v41 = vsel %vm339_vm1, %v3315_v38, 0.0  ;;  %v3317_v43 = vpop.eup %3316 }
 0x1a8   :  { %3318 = vpow2.f32 %v386_v36  ;;  %395 = vadd.xlane.f32.xlu2 %v394_v40  ;;  %407 = vadd.xlane.f32.xlu0 %v406_v41  ;;  %v403_v47 = vsel %vm339_vm1, %v3317_v43, 0.0 }
 0x1a9   :  { %3320 = vpow2.f32 %v374_v37 }
 0x1aa   :  { %3322 = vpow2.f32 %v378_v42 }
 0x1ae   :  { %v3319_v44 = vpop.eup %3318 }
 0x1af   :  { %v3321_v45 = vpop.eup %3320  ;;  %v409_v46 = vsel %vm339_vm1, %v3319_v44, 0.0 }
 0x1b0   :  { %410 = vadd.xlane.f32.xlu1 %v409_v46  ;;  %v391_v48 = vsel %vm339_vm1, %v3321_v45, 0.0  ;;  %404 = vadd.xlane.f32.xlu0 %v403_v47  ;;  %v3323_v49 = vpop.eup %3322 }
 0x1b1   :  { %392 = vadd.xlane.f32.xlu2 %v391_v48  ;;  %v397_v51 = vsel %vm339_vm1, %v3323_v49, 0.0 }
 0x1b8   :  { %398 = vadd.xlane.f32.xlu0 %v397_v51  ;;  %v3558_v51 = vmov 32.0  }
 0x206   :  { %v390_v60 = vpop.xlane.xlu1 %389 }
 0x207   :  { %3324 = vrcp.f32 %v390_v60 }
 0x20d   :  { %v3325_v61 = vpop.eup %3324 }
 0x20e   :  { %v420_v62 = vmul.f32 %v3325_v61, %v3735_v9 }
 0x210   :  { %3116 = vmatmul.msk.f32.vlgmr.msrb.gmra.mxu0 %vm339_vm1, %v420_v62 }
 0x213   :  { %v402_v63 = vpop.xlane.xlu2 %401 }
 0x214   :  { %3326 = vrcp.f32 %v402_v63 }
 0x21a   :  { %v3327_v0 = vpop.eup %3326 }
 0x21b   :  { %v424_v1 = vmul.f32 %v3327_v0, %v3740_v24  ;;  %v396_v2 = vpop.xlane.xlu2 %395  ;;  %v408_v3 = vpop.xlane.xlu0 %407 }
 0x21c   :  { %3328 = vrcp.f32 %v396_v2 }
 0x21d   :  { %3330 = vrcp.f32 %v408_v3  ;;  %3120 = vmatmul.msk.f32.vlgmr.msrb.gmra.mxu2 %vm339_vm1, %v424_v1  ;;  %v108_v3 = vld [vmem:[%s4495_s6 + $0x18] sm:$0xff] }
 0x21e   :  { %728 = vmatpush.msra.mxu0 %v108_v3 }
 0x222   :  { %v3329_v4 = vpop.eup %3328 }
 0x223   :  { %v3331_v5 = vpop.eup %3330  ;;  %v422_v6 = vmul.f32 %v3329_v4, %v3313_v32  ;;  %v411_v7 = vpop.xlane.xlu1 %410  ;;  %v107_v4 = vld [vmem:[%s4495_s6 + $0x10] sm:$0xff] }
 0x224   :  { %v426_v8 = vmul.f32 %v3331_v5, %v3315_v38  ;;  %v405_v10 = vpop.xlane.xlu0 %404  ;;  %v393_v9 = vpop.xlane.xlu2 %392  ;;  %3332 = vrcp.f32 %v411_v7  ;;  %729 = vmatpush.msra.mxu0 %v107_v4  ;;  %v106_v5 = vld [vmem:[%s4495_s6 + $0x8] sm:$0xff] }
 0x225   :  { %3334 = vrcp.f32 %v405_v10  ;;  %3118 = vmatmul.msk.f32.vlgmr.msrb.gmra.mxu1 %vm339_vm1, %v422_v6  ;;  %v105_v6 = vld [vmem:[%s4495_s6] sm:$0xff] }
 0x226   :  { %3336 = vrcp.f32 %v393_v9  ;;  %3122 = vmatmul.msk.f32.vlgmr.msrb.gmra.mxu3 %vm339_vm1, %v426_v8  ;;  %730 = vmatpush.msra.mxu0 %v106_v5 }
 0x228   :  { %731 = vmatpush.msra.mxu0 %v105_v6 }
 0x22a   :  { %v3333_v11 = vpop.eup %3332 }
 0x22b   :  { %v3335_v13 = vpop.eup %3334  ;;  %v427_v14 = vmul.f32 %v3333_v11, %v3319_v44  ;;  %v116_v11 = vld [vmem:[%s4496_s7 + $0x38] sm:$0xff] }
 0x22c   :  { %v3337_v16 = vpop.eup %3336  ;;  %v399_v17 = vpop.xlane.xlu0 %398  ;;  %v425_v20 = vmul.f32 %v3335_v13, %v3317_v43  ;;  %v115_v13 = vld [vmem:[%s4496_s7 + $0x30] sm:$0xff]  ;;  %757 = vmatpush.msra.mxu1 %v116_v11 }
 0x22d   :  { %3338 = vrcp.f32 %v399_v17  ;;  %v421_v21 = vmul.f32 %v3337_v16, %v3321_v45  ;;  %v114_v16 = vld [vmem:[%s4496_s7 + $0x28] sm:$0xff] }
 0x22e   :  { %3121 = vmatmul.msk.f32.gmra.mxu2 %vm339_vm1, %v425_v20  ;;  %3123 = vmatmul.msk.f32.gmra.mxu3 %vm339_vm1, %v427_v14  ;;  %3340 = vrcp.f32 %v3558_v51 }
 0x22f   :  { %3117 = vmatmul.msk.f32.gmra.mxu0 %vm339_vm1, %v421_v21  ;;  %758 = vmatpush.msra.mxu1 %v115_v13 }
 0x231   :  { %759 = vmatpush.msra.mxu1 %v114_v16  ;;  %v840_v16 = vld [vmem:[#allocation2 + $0x98] sm:$0xff] }
 0x232   :  { %904 = vmatpush.msra.mxu2 %v840_v16 }
 0x233   :  { %v3339_v22 = vpop.eup %3338 }
 0x234   :  { %v423_v23 = vmul.f32 %v3339_v22, %v3323_v49  ;;  %v3341_v52 = vpop.eup %3340  ;;  %v113_v22 = vld [vmem:[%s4496_s7 + $0x20] sm:$0xff] }
 0x235   :  { %v659_v53 = vmul.f32 32.0, %v3341_v52  ;;  %vm663_vm2 = vweird.f32 %v3341_v52  ;;  %760 = vmatpush.msra.mxu1 %v113_v22  ;;  %v839_v22 = vld [vmem:[#allocation2 + $0x90] sm:$0xff] }
 0x236   :  { %3119 = vmatmul.msk.f32.gmra.mxu1 %vm339_vm1, %v423_v23  ;;  %905 = vmatpush.msra.mxu2 %v839_v22 }
 0x237   :  { %v660_v54 = vsub.f32 1.0, %v659_v53 }
 0x239   :  { %v661_v55 = vmul.f32 %v3341_v52, %v660_v54 }
 0x23b   :  { %v662_v56 = vadd.f32 %v3341_v52, %v661_v55 }
 0x23d   :  { %v3773_v57 = vsel %vm663_vm2, %v3341_v52, %v662_v56 }
 0x28d   :  { %v543_v24 = vpop.f32.mrf.mxu0 }
 0x28e   :  { %v636_v27 = vsel %vm118_vm0, %v543_v24, 0.0 }
 0x2a0   :  { %v601_v29 = vpop.f32.mrf.mxu2 }
 0x2a1   :  { %v639_v31 = vsel %vm118_vm0, %v601_v29, 0.0  ;;  %v111_v29 = vld [vmem:[%s4496_s7 + $0x10] sm:$0xff] }
 0x2a2   :  { %v572_v25 = vpop.f32.mrf.mxu1 }
 0x2a3   :  { %v637_v26 = vsel %vm118_vm0, %v572_v25, 0.0  ;;  %v112_v25 = vld [vmem:[%s4496_s7 + $0x18] sm:$0xff] }
 0x2a4   :  { %v638_v30 = vadd.f32 %v637_v26, %v636_v27  ;;  %v3811_v26 = vld [vmem:[%s4497_s8] sm:$0xff]  ;;  %761 = vmatpush.msra.mxu1 %v112_v25  ;;  %v851_v25 = vld [vmem:[#allocation2 + $0xf0] sm:$0xff] }
 0x2a5   :  { %v741_v56 = vperm.slane %v3811_v26, 1 }
 0x2a6   :  { %v640_v33 = vadd.f32 %v639_v31, %v638_v30  ;;  %v703_v31 = vperm.slane %v3811_v26, 2  ;;  %762 = vmatpush.msra.mxu1 %v111_v29  ;;  %v842_v29 = vld [vmem:[#allocation2 + $0xa8] sm:$0xff] }
 0x2a9   :  { %v630_v32 = vpop.f32.mrf.mxu3 }
 0x2aa   :  { %v641_v34 = vsel %vm118_vm0, %v630_v32, 0.0 }
 0x2ab   :  { %v642_v35 = vadd.f32 %v641_v34, %v640_v33  ;;  %v706_v34 = vperm.slane %v3811_v26, 3 }
 0x2ac   :  { %v546_v38 = vpop.f32.mrf.mxu0 }
 0x2ad   :  { %v650_v36 = vadd.f32 %v642_v35, %v3626_v12  ;;  %v643_v41 = vsel %vm118_vm0, %v546_v38, 0.0 }
 0x2af   :  { %v652_v37 = vsel %vm118_vm0, %v650_v36, 0.0 }
 0x2b0   :  { %653 = vadd.xlane.f32.xlu1 %v652_v37 }
 0x2b1   :  { %v604_v39 = vpop.f32.mrf.mxu2  ;;  %v633_v43 = vpop.f32.mrf.mxu3 }
 0x2b2   :  { %v646_v45 = vsel %vm118_vm0, %v604_v39, 0.0  ;;  %v648_v47 = vsel %vm118_vm0, %v633_v43, 0.0 }
 0x2b3   :  { %v575_v40 = vpop.f32.mrf.mxu1 }
 0x2b4   :  { %v644_v42 = vsel %vm118_vm0, %v575_v40, 0.0 }
 0x2b5   :  { %v645_v44 = vadd.f32 %v644_v42, %v643_v41 }
 0x2b7   :  { %v647_v46 = vadd.f32 %v646_v45, %v645_v44 }
 0x2b9   :  { %v649_v48 = vadd.f32 %v648_v47, %v647_v46  ;;  %v110_v47 = vld [vmem:[%s4496_s7 + $0x8] sm:$0xff] }
 0x2ba   :  { %763 = vmatpush.msra.mxu1 %v110_v47  ;;  %v818_v47 = vperm.slane %v3811_v26, 4 }
 0x2bb   :  { %v651_v12 = vadd.f32 %v649_v48, %v3653_v19  ;;  %v109_v48 = vld [vmem:[%s4496_s7] sm:$0xff] }
 0x2bc   :  { %764 = vmatpush.msra.mxu1 %v109_v48 }
 0x2bd   :  { %v655_v49 = vsel %vm118_vm0, %v651_v12, 0.0 }
 0x2be   :  { %656 = vadd.xlane.f32.xlu2 %v655_v49 }
 0x323   :  { %v654_v58 = vpop.xlane.xlu1 %653 }
 0x324   :  { %v665_v59 = vmul.f32 %v3773_v57, %v654_v58 }
 0x326   :  { %v667_v60 = vsub.f32 %v650_v36, %v665_v59 }
 0x328   :  { %v669_v61 = vmul.f32 %v667_v60, %v667_v60 }
 0x32a   :  { %v671_v19 = vsel %vm118_vm0, %v669_v61, 0.0 }
 0x32b   :  { %672 = vadd.xlane.f32.xlu0 %v671_v19 }
 0x331   :  { %v657_v62 = vpop.xlane.xlu2 %656 }
 0x332   :  { %v666_v63 = vmul.f32 %v3773_v57, %v657_v62 }
 0x334   :  { %v668_v0 = vsub.f32 %v651_v12, %v666_v63  ;;  %v709_v12 = vperm.slane %v3811_v26, 0 }
 0x336   :  { %v670_v1 = vmul.f32 %v668_v0, %v668_v0 }
 0x338   :  { %v674_v2 = vsel %vm118_vm0, %v670_v1, 0.0  ;;  %v69_v1 = vld [vmem:[%s4492_s3] sm:$0xff] }
 0x339   :  { %675 = vadd.xlane.f32.xlu1 %v674_v2  ;;  %v3559_v2 = vmov 0  }
 0x33a   :  { %3306 = vset.pattern.permute.xlu0 %v3559_v2  ;;  %3307 = vset.pattern.permute.xlu1 %v3559_v2 }
 0x39e   :  { %v673_v7 = vpop.xlane.xlu0 %672 }
 0x39f   :  { %v677_v8 = vmul.f32 %v673_v7, %v3773_v57 }
 0x3a1   :  { %v679_v10 = vadd.f32 1e-06, %v677_v8 }
 0x3a3   :  { %3342 = vrsqrt.f32 %v679_v10  ;;  %vm687_vm4 = vweird.f32 %v679_v10 }
 0x3a9   :  { %v3343_v9 = vpop.eup %3342 }
 0x3aa   :  { %v682_v14 = vmul.f32 %v3343_v9, %v679_v10  ;;  %vm688_vm3 = vweird.f32 %v3343_v9 }
 0x3ab   :  { %vm689_vm5 = vmor %vm687_vm4, %vm688_vm3 }
 0x3ac   :  { %v683_v17 = vmul.f32 %v3343_v9, %v682_v14  ;;  %v676_v20 = vpop.xlane.xlu1 %675  ;;  %v70_v14 = vld [vmem:[%s4492_s3 + $0x8] sm:$0xff] }
 0x3ad   :  { %v678_v21 = vmul.f32 %v676_v20, %v3773_v57  ;;  %v848_v20 = vld [vmem:[#allocation2 + $0xd8] sm:$0xff] }
 0x3ae   :  { %v684_v23 = vmul.f32 0.5, %v683_v17  ;;  %v844_v17 = vld [vmem:[#allocation2 + $0xb8] sm:$0xff]  ;;  %950 = vmatpush.msrb.mxu0 %v848_v20 }
 0x3af   :  { %v680_v24 = vadd.f32 1e-06, %v678_v21  ;;  %927 = vmatpush.msra.mxu3 %v844_v17  ;;  %v852_v21 = vld [vmem:[#allocation2 + $0xf8] sm:$0xff] }
 0x3b0   :  { %v685_v27 = vsub.f32 1.5, %v684_v23  ;;  %973 = vmatpush.msrb.mxu1 %v852_v21  ;;  %v843_v23 = vld [vmem:[#allocation2 + $0xb0] sm:$0xff] }
 0x3b1   :  { %3344 = vrsqrt.f32 %v680_v24  ;;  %vm697_vm7 = vweird.f32 %v680_v24  ;;  %928 = vmatpush.msra.mxu3 %v843_v23 }
 0x3b2   :  { %v686_v30 = vmul.f32 %v3343_v9, %v685_v27  ;;  %v838_v27 = vld [vmem:[#allocation2 + $0x88] sm:$0xff]  ;;  %974 = vmatpush.msrb.mxu1 %v851_v25 }
 0x3b3   :  { %906 = vmatpush.msra.mxu2 %v838_v27  ;;  %929 = vmatpush.msra.mxu3 %v842_v29  ;;  %v865_v27 = vld [vmem:[#allocation5 + $0xd8] sm:$0xff]  ;;  %v864_v29 = vld [vmem:[#allocation5 + $0xd0] sm:$0xff] }
 0x3b4   :  { %v690_v32 = vsel %vm689_vm5, %v3343_v9, %v686_v30  ;;  %v846_v30 = vld [vmem:[#allocation2 + $0xc8] sm:$0xff] }
 0x3b5   :  { %v701_v33 = vmul.f32 %v690_v32, %v667_v60  ;;  %v837_v32 = vld [vmem:[#allocation2 + $0x80] sm:$0xff] }
 0x3b6   :  { %907 = vmatpush.msra.mxu2 %v837_v32 }
 0x3b7   :  { %v3345_v35 = vpop.eup %3344  ;;  %v704_v36 = vmul.f32 %v703_v31, %v701_v33  ;;  %v841_v33 = vld [vmem:[#allocation2 + $0xa0] sm:$0xff] }
 0x3b8   :  { %v692_v37 = vmul.f32 %v3345_v35, %v680_v24  ;;  %vm698_vm6 = vweird.f32 %v3345_v35  ;;  %v847_v24 = vld [vmem:[#allocation2 + $0xd0] sm:$0xff]  ;;  %930 = vmatpush.msra.mxu3 %v841_v33  ;;  %3149 = vmatpush.xpose.msk.msrb.mxu2 %vm118_vm0, %v3631_v15  ;;  %v863_v33 = vld [vmem:[#allocation5 + $0xc8] sm:$0xff] }
 0x3b9   :  { %v707_v38 = vadd.f32 %v706_v34, %v704_v36  ;;  %vm699_vm8 = vmor %vm697_vm7, %vm698_vm6  ;;  %951 = vmatpush.msrb.mxu0 %v847_v24 }
 0x3ba   :  { %v693_v39 = vmul.f32 %v3345_v35, %v692_v37  ;;  %3153 = vmatpush.xpose.msk.msrb.mxu3 %vm118_vm0, %v3631_v15 }
 0x3bb   :  { %3124 = vmatmul.msk.f32.vlgmr.msra.gmra.mxu0 %vm118_vm0, %v707_v38 }
 0x3bc   :  { %v694_v40 = vmul.f32 0.5, %v693_v39  ;;  %952 = vmatpush.msrb.mxu0 %v846_v30  ;;  %3150 = vmatpush.xpose.msk.msrb.mxu2 %vm118_vm0, %v3644_v18  ;;  %v857_v30 = vld [vmem:[#allocation5 + $0x98] sm:$0xff] }
 0x3be   :  { %v695_v41 = vsub.f32 1.5, %v694_v40  ;;  %3154 = vmatpush.xpose.msk.msrb.mxu3 %vm118_vm0, %v3644_v18 }
 0x3c0   :  { %v696_v42 = vmul.f32 %v3345_v35, %v695_v41 }
 0x3c2   :  { %v700_v43 = vsel %vm699_vm8, %v3345_v35, %v696_v42  ;;  %v849_v35 = vld [vmem:[#allocation2 + $0xe0] sm:$0xff] }
 0x3c3   :  { %v702_v44 = vmul.f32 %v700_v43, %v668_v0 }
 0x3c5   :  { %v705_v45 = vmul.f32 %v703_v31, %v702_v44  ;;  %v850_v31 = vld [vmem:[#allocation2 + $0xe8] sm:$0xff] }
 0x3c6   :  { %975 = vmatpush.msrb.mxu1 %v850_v31  ;;  %v861_v31 = vld [vmem:[#allocation5 + $0xb8] sm:$0xff] }
 0x3c7   :  { %v708_v46 = vadd.f32 %v706_v34, %v705_v45  ;;  %v845_v34 = vld [vmem:[#allocation2 + $0xc0] sm:$0xff] }
 0x3c8   :  { %953 = vmatpush.msrb.mxu0 %v845_v34  ;;  %976 = vmatpush.msrb.mxu1 %v849_v35  ;;  %v862_v35 = vld [vmem:[#allocation5 + $0xc0] sm:$0xff] }
 0x3c9   :  { %3125 = vmatmul.msk.f32.gmra.mxu0 %vm118_vm0, %v708_v46 }
 0x3ca   :  { %3157 = vmatpush.xpose.msk.msra.mxu0 %vm118_vm0, %v3631_v15 }
 0x3ce   :  { %3158 = vmatpush.xpose.msk.msra.mxu0 %vm118_vm0, %v3644_v18 }
 0x438   :  { %v733_v49 = vpop.f32.mrf.mxu0 }
 0x439   :  { %v734_v51 = vadd.f32 %v733_v49, %v709_v12  ;;  %v821_v49 = vperm.slane %v3811_v26, 5 }
 0x43b   :  { %v739_v52 = vmax.f32 %v734_v51, 0.0 }
 0x43d   :  { %3126 = vmatmul.msk.f32.vlgmr.msra.gmra.mxu1 %vm742_vm9, %v739_v52 }
 0x43e   :  { %3161 = vmatpush.xpose.msk.msra.mxu1 %vm118_vm0, %v3631_v15 }
 0x442   :  { %3162 = vmatpush.xpose.msk.msra.mxu1 %vm118_vm0, %v3644_v18 }
 0x446   :  { %v736_v53 = vpop.f32.mrf.mxu0 }
 0x447   :  { %v737_v54 = vadd.f32 %v736_v53, %v709_v12 }
 0x449   :  { %v740_v55 = vmax.f32 %v737_v54, 0.0 }
 0x44b   :  { %3127 = vmatmul.msk.f32.gmra.mxu1 %vm742_vm9, %v740_v55 }
 0x4ba   :  { %v766_v58 = vpop.f32.mrf.mxu1 }
 0x4bb   :  { %v767_v59 = vadd.f32 %v766_v58, %v741_v56 }
 0x4bd   :  { %v772_v60 = vadd.f32 %v767_v59, %v707_v38 }
 0x4bf   :  { %v774_v61 = vsel %vm118_vm0, %v772_v60, 0.0 }
 0x4c0   :  { %775 = vadd.xlane.f32.xlu2 %v774_v61 }
 0x4c8   :  { %v769_v19 = vpop.f32.mrf.mxu1 }
 0x4c9   :  { %v770_v62 = vadd.f32 %v769_v19, %v741_v56 }
 0x4cb   :  { %v773_v63 = vadd.f32 %v770_v62, %v708_v46 }
 0x4cd   :  { %v777_v0 = vsel %vm118_vm0, %v773_v63, 0.0 }
 0x4ce   :  { %778 = vadd.xlane.f32.xlu0 %v777_v0 }
 0x4e2   :  { %826 = vperm.xlu0 %3306, %v69_v1  }
 0x533   :  { %v776_v3 = vpop.xlane.xlu2 %775 }
 0x534   :  { %v780_v4 = vmul.f32 %v776_v3, %v3773_v57 }
 0x536   :  { %v3836_v5 = vsub.f32 %v772_v60, %v780_v4 }
 0x538   :  { %v784_v6 = vmul.f32 %v3836_v5, %v3836_v5 }
 0x53a   :  { %v786_v7 = vsel %vm118_vm0, %v784_v6, 0.0 }
 0x53b   :  { %787 = vadd.xlane.f32.xlu1 %v786_v7 }
 0x541   :  { %v779_v8 = vpop.xlane.xlu0 %778 }
 0x542   :  { %v781_v10 = vmul.f32 %v779_v8, %v3773_v57 }
 0x544   :  { %v3842_v9 = vsub.f32 %v773_v63, %v781_v10 }
 0x546   :  { %v785_v11 = vmul.f32 %v3842_v9, %v3842_v9 }
 0x548   :  { %v789_v13 = vsel %vm118_vm0, %v785_v11, 0.0 }
 0x549   :  { %790 = vadd.xlane.f32.xlu2 %v789_v13 }
 0x554   :  { %831 = vperm.xlu1 %3307, %v70_v14   ;;  %v3871_v54 = vpop.permute.xlu0 %826 }
 0x5ae   :  { %v788_v36 = vpop.xlane.xlu1 %787 }
 0x5af   :  { %v792_v37 = vmul.f32 %v788_v36, %v3773_v57 }
 0x5b1   :  { %v794_v38 = vadd.f32 1e-06, %v792_v37 }
 0x5b3   :  { %3346 = vrsqrt.f32 %v794_v38  ;;  %vm802_vm11 = vweird.f32 %v794_v38 }
 0x5b9   :  { %v3347_v39 = vpop.eup %3346 }
 0x5ba   :  { %v797_v40 = vmul.f32 %v3347_v39, %v794_v38  ;;  %vm803_vm10 = vweird.f32 %v3347_v39 }
 0x5bb   :  { %vm804_vm12 = vmor %vm802_vm11, %vm803_vm10 }
 0x5bc   :  { %v798_v41 = vmul.f32 %v3347_v39, %v797_v40  ;;  %v791_v42 = vpop.xlane.xlu2 %790 }
 0x5bd   :  { %v793_v15 = vmul.f32 %v791_v42, %v3773_v57 }
 0x5be   :  { %v799_v43 = vmul.f32 0.5, %v798_v41  ;;  %v3941_v41 = vld [vmem:[%s4490_s1 + $0x8] sm:$0xff] }
 0x5bf   :  { %v795_v44 = vadd.f32 1e-06, %v793_v15 }
 0x5c0   :  { %v800_v45 = vsub.f32 1.5, %v799_v43 }
 0x5c1   :  { %3348 = vrsqrt.f32 %v795_v44  ;;  %vm812_vm14 = vweird.f32 %v795_v44 }
 0x5c2   :  { %v801_v46 = vmul.f32 %v3347_v39, %v800_v45  ;;  %v856_v45 = vld [vmem:[#allocation5 + $0x90] sm:$0xff] }
 0x5c4   :  { %v805_v48 = vsel %vm804_vm12, %v3347_v39, %v801_v46  ;;  %v855_v46 = vld [vmem:[#allocation5 + $0x88] sm:$0xff] }
 0x5c5   :  { %v816_v12 = vmul.f32 %v805_v48, %v3836_v5  ;;  %v859_v48 = vld [vmem:[#allocation5 + $0xa8] sm:$0xff] }
 0x5c6   :  { %v3885_v63 = vpop.permute.xlu1 %831 }
 0x5c7   :  { %v3349_v51 = vpop.eup %3348  ;;  %v819_v52 = vmul.f32 %v818_v47, %v816_v12  ;;  %v858_v12 = vld [vmem:[#allocation5 + $0xa0] sm:$0xff] }
 0x5c8   :  { %v807_v53 = vmul.f32 %v3349_v51, %v795_v44  ;;  %vm813_vm13 = vweird.f32 %v3349_v51 }
 0x5c9   :  { %v822_v55 = vadd.f32 %v821_v49, %v819_v52  ;;  %vm814_vm15 = vmor %vm812_vm14, %vm813_vm13  ;;  %v867_v52 = vld [vmem:[#allocation5 + $0xe8] sm:$0xff] }
 0x5ca   :  { %v808_v56 = vmul.f32 %v3349_v51, %v807_v53  ;;  %v866_v53 = vld [vmem:[#allocation5 + $0xe0] sm:$0xff] }
 0x5cb   :  { %v3874_v58 = vmul.f32 %v3871_v54, %v822_v55 }
 0x5cc   :  { %v809_v59 = vmul.f32 0.5, %v808_v56 }
 0x5cd   :  { %3141 = vmatmul.msk.f32.vlgmr.msra.gmra.mxu2 %vm118_vm0, %v3874_v58  ;;  %3143 = vmatmul.msk.f32.vlgmr.msra.gmra.mxu3 %vm118_vm0, %v3874_v58 }
 0x5ce   :  { %v810_v60 = vsub.f32 1.5, %v809_v59  ;;  %3145 = vmatmul.msk.f32.vlgmr.msrb.gmra.mxu0 %vm118_vm0, %v3874_v58  ;;  %3147 = vmatmul.msk.f32.vlgmr.msrb.gmra.mxu1 %vm118_vm0, %v3874_v58 }
 0x5cf   :  { %1246 = vmatpush.msrb.mxu0 %v865_v27  ;;  %1200 = vmatpush.msra.mxu2 %v857_v30 }
 0x5d0   :  { %v811_v26 = vmul.f32 %v3349_v51, %v810_v60  ;;  %1223 = vmatpush.msra.mxu3 %v861_v31 }
 0x5d1   :  { %1247 = vmatpush.msrb.mxu0 %v864_v29  ;;  %1201 = vmatpush.msra.mxu2 %v856_v45 }
 0x5d2   :  { %v815_v61 = vsel %vm814_vm15, %v3349_v51, %v811_v26  ;;  %v868_v51 = vld [vmem:[#allocation5 + $0xf0] sm:$0xff] }
 0x5d3   :  { %v817_v19 = vmul.f32 %v815_v61, %v3842_v9  ;;  %1248 = vmatpush.msrb.mxu0 %v863_v33  ;;  %1202 = vmatpush.msra.mxu2 %v855_v46 }
 0x5d5   :  { %v820_v62 = vmul.f32 %v818_v47, %v817_v19  ;;  %1249 = vmatpush.msrb.mxu0 %v862_v35  ;;  %v860_v47 = vld [vmem:[#allocation5 + $0xb0] sm:$0xff] }
 0x5d6   :  { %1224 = vmatpush.msra.mxu3 %v860_v47 }
 0x5d7   :  { %v823_v0 = vadd.f32 %v821_v49, %v820_v62  ;;  %v3958_v49 = vld [vmem:[%s4490_s1] sm:$0xff] }
 0x5d8   :  { %1225 = vmatpush.msra.mxu3 %v859_v48 }
 0x5d9   :  { %v3888_v1 = vmul.f32 %v3885_v63, %v823_v0 }
 0x5da   :  { %1226 = vmatpush.msra.mxu3 %v858_v12 }
 0x5db   :  { %3142 = vmatmul.msk.f32.gmra.mxu2 %vm118_vm0, %v3888_v1  ;;  %3144 = vmatmul.msk.f32.gmra.mxu3 %vm118_vm0, %v3888_v1 }
 0x5dc   :  { %3146 = vmatmul.msk.f32.gmra.mxu0 %vm118_vm0, %v3888_v1  ;;  %3148 = vmatmul.msk.f32.gmra.mxu1 %vm118_vm0, %v3888_v1 }
 0x64b   :  { %v955_v2 = vpop.f32.mrf.mxu0  ;;  %v978_v3 = vpop.f32.mrf.mxu1 }
 0x64c   :  { %3159 = vmatmul.msk.f32.vlgmr.msra.gmra.mxu0 %vm118_vm0, %v955_v2  ;;  %3163 = vmatmul.msk.f32.vlgmr.msra.gmra.mxu1 %vm118_vm0, %v978_v3 }
 0x650   :  { %v909_v4 = vpop.f32.mrf.mxu2  ;;  %v932_v5 = vpop.f32.mrf.mxu3 }
 0x651   :  { %3151 = vmatmul.msk.f32.vlgmr.msrb.gmra.mxu2 %vm118_vm0, %v909_v4  ;;  %3155 = vmatmul.msk.f32.vlgmr.msrb.gmra.mxu3 %vm118_vm0, %v932_v5 }
 0x659   :  { %v958_v6 = vpop.f32.mrf.mxu0  ;;  %v981_v7 = vpop.f32.mrf.mxu1 }
 0x65a   :  { %3160 = vmatmul.msk.f32.gmra.mxu0 %vm118_vm0, %v958_v6  ;;  %3164 = vmatmul.msk.f32.gmra.mxu1 %vm118_vm0, %v981_v7 }
 0x65e   :  { %v912_v8 = vpop.f32.mrf.mxu2  ;;  %v935_v10 = vpop.f32.mrf.mxu3 }
 0x65f   :  { %3152 = vmatmul.msk.f32.gmra.mxu2 %vm118_vm0, %v912_v8  ;;  %3156 = vmatmul.msk.f32.gmra.mxu3 %vm118_vm0, %v935_v10 }
 0x662   :  { %3169 = vmatmul.msk.f32.vlgmr.msrb.gmra.mxu0 %vm118_vm0, %v3644_v18 }
 0x667   :  { %3167 = vmatmul.msk.f32.vlgmr.msra.gmra.mxu3 %vm118_vm0, %v3958_v49 }
 0x66a   :  { %3170 = vmatmul.msk.f32.gmra.mxu0 %vm118_vm0, %v3941_v41 }
 0x66f   :  { %3168 = vmatmul.msk.f32.gmra.mxu3 %vm118_vm0, %v3941_v41 }
 0x6c9   :  { %v1065_v9 = vpop.f32.mrf.mxu0  ;;  %v1094_v40 = vpop.f32.mrf.mxu1 }
 0x6ca   :  { %v3907_v11 = vadd.f32 %v1065_v9, %v3686_v28  ;;  %v3946_v42 = vadd.f32 %v1094_v40, %v3686_v28 }
 0x6cc   :  { %v1112_v13 = vsel %vm339_vm1, %v3907_v11, -inf  ;;  %v1118_v18 = vsel %vm339_vm1, %v3946_v42, -inf }
 0x6cd   :  { %1113 = vmax.xlane.f32.xlu1 %v1112_v13 }
 0x6d4   :  { %v1007_v14 = vpop.f32.mrf.mxu2  ;;  %v1036_v21 = vpop.f32.mrf.mxu3 }
 0x6d5   :  { %v3912_v16 = vadd.f32 %v1007_v14, %v3686_v28  ;;  %v3922_v24 = vadd.f32 %v1036_v21, %v3686_v28  ;;  %v854_v28 = vld [vmem:[#allocation5 + $0x80] sm:$0xff] }
 0x6d6   :  { %1203 = vmatpush.msra.mxu2 %v854_v28 }
 0x6d7   :  { %v1068_v17 = vpop.f32.mrf.mxu0  ;;  %v1100_v20 = vsel %vm339_vm1, %v3912_v16, -inf  ;;  %v1106_v25 = vsel %vm339_vm1, %v3922_v24, -inf  ;;  %v1097_v15 = vpop.f32.mrf.mxu1  ;;  %3165 = vmatmul.msk.f32.vlgmr.msra.gmra.mxu2 %vm118_vm0, %v3958_v49 }
 0x6d8   :  { %v3917_v22 = vadd.f32 %v1068_v17, %v3705_v50  ;;  %1101 = vmax.xlane.f32.xlu2 %v1100_v20  ;;  %v3951_v43 = vadd.f32 %v1097_v15, %v3705_v50 }
 0x6da   :  { %v1115_v23 = vsel %vm339_vm1, %v3917_v22, -inf  ;;  %v1121_v44 = vsel %vm339_vm1, %v3951_v43, -inf }
 0x6db   :  { %1116 = vmax.xlane.f32.xlu0 %v1115_v23 }
 0x6df   :  { %3166 = vmatmul.msk.f32.gmra.mxu2 %vm118_vm0, %v3941_v41 }
 0x6e0   :  { %1107 = vmax.xlane.f32.xlu2 %v1106_v25 }
 0x6e2   :  { %v1010_v32 = vpop.f32.mrf.mxu2  ;;  %v1039_v37 = vpop.f32.mrf.mxu3 }
 0x6e3   :  { %v3927_v34 = vadd.f32 %v1010_v32, %v3705_v50  ;;  %v3934_v38 = vadd.f32 %v1039_v37, %v3705_v50  ;;  %v869_v50 = vld [vmem:[#allocation5 + $0xf8] sm:$0xff] }
 0x6e4   :  { %1269 = vmatpush.msrb.mxu1 %v869_v50 }
 0x6e5   :  { %v1103_v36 = vsel %vm339_vm1, %v3927_v34, -inf  ;;  %v1109_v39 = vsel %vm339_vm1, %v3934_v38, -inf }
 0x6e6   :  { %1270 = vmatpush.msrb.mxu1 %v868_v51 }
 0x6e8   :  { %1104 = vmax.xlane.f32.xlu2 %v1103_v36  ;;  %1271 = vmatpush.msrb.mxu1 %v867_v52 }
 0x6ea   :  { %1272 = vmatpush.msrb.mxu1 %v866_v53 }
 0x6eb   :  { %3171 = vmatmul.msk.f32.vlgmr.msrb.gmra.mxu1 %vm118_vm0, %v3958_v49 }
 0x6f0   :  { %1110 = vmax.xlane.f32.xlu2 %v1109_v39  ;;  %v1251_v39 = vpop.f32.mrf.mxu0 }
 0x6f3   :  { %3172 = vmatmul.msk.f32.gmra.mxu1 %vm118_vm0, %v3941_v41 }
 0x6f8   :  { %1119 = vmax.xlane.f32.xlu2 %v1118_v18  ;;  %v1254_v40 = vpop.f32.mrf.mxu0  ;;  %v1228_v18 = vpop.f32.mrf.mxu3 }
 0x6f9   :  { %1358 = vmatpush.msra.mxu0 %v1254_v40 }
 0x6fb   :  { %1359 = vmatpush.msra.mxu0 %v1251_v39 }
 0x700   :  { %1122 = vmax.xlane.f32.xlu2 %v1121_v44 }
 0x740   :  { %v1114_v55 = vpop.xlane.xlu1 %1113 }
 0x741   :  { %v1128_v56 = vsub.f32 %v3907_v11, %v1114_v55 }
 0x743   :  { %v1140_v59 = vmul.f32 1.442695, %v1128_v56 }
 0x745   :  { %3350 = vpow2.f32 %v1140_v59 }
 0x74b   :  { %v3973_v60 = vpop.eup %3350  ;;  %v1102_v26 = vpop.xlane.xlu2 %1101 }
 0x74c   :  { %v1124_v61 = vsub.f32 %v3912_v16, %v1102_v26  ;;  %v1160_v19 = vsel %vm339_vm1, %v3973_v60, 0.0 }
 0x74d   :  { %1161 = vadd.xlane.f32.xlu2 %v1160_v19 }
 0x74e   :  { %v1132_v62 = vmul.f32 1.442695, %v1124_v61  ;;  %v1117_v6 = vpop.xlane.xlu0 %1116 }
 0x74f   :  { %v1129_v9 = vsub.f32 %v3917_v22, %v1117_v6 }
 0x750   :  { %3352 = vpow2.f32 %v1132_v62 }
 0x751   :  { %v1142_v14 = vmul.f32 1.442695, %v1129_v9 }
 0x753   :  { %v1108_v0 = vpop.xlane.xlu2 %1107 }
 0x754   :  { %v1126_v2 = vsub.f32 %v3922_v24, %v1108_v0 }
 0x756   :  { %v3979_v3 = vpop.eup %3352  ;;  %v1136_v4 = vmul.f32 1.442695, %v1126_v2 }
 0x757   :  { %v1148_v5 = vsel %vm339_vm1, %v3979_v3, 0.0 }
 0x758   :  { %3354 = vpow2.f32 %v1136_v4  ;;  %1149 = vadd.xlane.f32.xlu2 %v1148_v5 }
 0x75b   :  { %v1105_v7 = vpop.xlane.xlu2 %1104 }
 0x75c   :  { %v1125_v8 = vsub.f32 %v3927_v34, %v1105_v7 }
 0x75e   :  { %v3984_v10 = vpop.eup %3354  ;;  %v1134_v11 = vmul.f32 1.442695, %v1125_v8 }
 0x75f   :  { %v1154_v13 = vsel %vm339_vm1, %v3984_v10, 0.0 }
 0x760   :  { %3356 = vpow2.f32 %v1134_v11  ;;  %1155 = vadd.xlane.f32.xlu2 %v1154_v13 }
 0x761   :  { %3358 = vpow2.f32 %v1142_v14 }
 0x763   :  { %v1111_v16 = vpop.xlane.xlu2 %1110 }
 0x764   :  { %v1127_v17 = vsub.f32 %v3934_v38, %v1111_v16 }
 0x766   :  { %v3357_v20 = vpop.eup %3356  ;;  %v1138_v21 = vmul.f32 1.442695, %v1127_v17 }
 0x767   :  { %v1151_v23 = vsel %vm339_vm1, %v3357_v20, 0.0  ;;  %v3991_v25 = vpop.eup %3358 }
 0x768   :  { %3360 = vpow2.f32 %v1138_v21  ;;  %1152 = vadd.xlane.f32.xlu2 %v1151_v23  ;;  %v1163_v30 = vsel %vm339_vm1, %v3991_v25, 0.0  ;;  %v1274_v44 = vpop.f32.mrf.mxu1 }
 0x76b   :  { %v1120_v24 = vpop.xlane.xlu2 %1119 }
 0x76c   :  { %v1130_v22 = vsub.f32 %v3946_v42, %v1120_v24  ;;  %v1205_v42 = vpop.f32.mrf.mxu2 }
 0x76e   :  { %v3361_v27 = vpop.eup %3360  ;;  %v1144_v29 = vmul.f32 1.442695, %v1130_v22 }
 0x76f   :  { %v1157_v31 = vsel %vm339_vm1, %v3361_v27, 0.0 }
 0x770   :  { %3362 = vpow2.f32 %v1144_v29  ;;  %1164 = vadd.xlane.f32.xlu2 %v1163_v30  ;;  %1158 = vadd.xlane.f32.xlu1 %v1157_v31  ;;  %v1277_v46 = vpop.f32.mrf.mxu1 }
 0x771   :  { %1387 = vmatpush.msra.mxu1 %v1277_v46 }
 0x773   :  { %v1123_v32 = vpop.xlane.xlu2 %1122  ;;  %1388 = vmatpush.msra.mxu1 %v1274_v44 }
 0x774   :  { %v1131_v33 = vsub.f32 %v3951_v43, %v1123_v32  ;;  %v1208_v15 = vpop.f32.mrf.mxu2  ;;  %v1231_v43 = vpop.f32.mrf.mxu3 }
 0x775   :  { %1300 = vmatpush.msrb.mxu2 %v1208_v15  ;;  %1329 = vmatpush.msrb.mxu3 %v1231_v43 }
 0x776   :  { %v3363_v34 = vpop.eup %3362  ;;  %v1146_v35 = vmul.f32 1.442695, %v1131_v33 }
 0x777   :  { %v1166_v36 = vsel %vm339_vm1, %v3363_v34, 0.0  ;;  %1301 = vmatpush.msrb.mxu2 %v1205_v42  ;;  %1330 = vmatpush.msrb.mxu3 %v1228_v18 }
 0x778   :  { %3364 = vpow2.f32 %v1146_v35  ;;  %1167 = vadd.xlane.f32.xlu1 %v1166_v36 }
 0x77e   :  { %v3365_v37 = vpop.eup %3364 }
 0x77f   :  { %v1169_v38 = vsel %vm339_vm1, %v3365_v37, 0.0 }
 0x780   :  { %1170 = vadd.xlane.f32.xlu0 %v1169_v38 }
 0x7c0   :  { %v1162_v45 = vpop.xlane.xlu2 %1161 }
 0x7c1   :  { %3366 = vrcp.f32 %v1162_v45 }
 0x7c7   :  { %v3367_v47 = vpop.eup %3366 }
 0x7c8   :  { %v1184_v48 = vmul.f32 %v3367_v47, %v3973_v60 }
 0x7ca   :  { %3177 = vmatmul.msk.f32.vlgmr.msra.gmra.mxu0 %vm339_vm1, %v1184_v48  ;;  %v3130_v48 = vld [vmem:[%s4495_s6 + $0x30] sm:$0xff] }
 0x7cb   :  { %v1150_v28 = vpop.xlane.xlu2 %1149 }
 0x7cc   :  { %3368 = vrcp.f32 %v1150_v28  ;;  %v3129_v28 = vld [vmem:[%s4495_s6 + $0x28] sm:$0xff] }
 0x7d2   :  { %v3369_v12 = vpop.eup %3368 }
 0x7d3   :  { %v1180_v50 = vmul.f32 %v3369_v12, %v3979_v3  ;;  %v1156_v51 = vpop.xlane.xlu2 %1155  ;;  %v3128_v12 = vld [vmem:[%s4495_s6 + $0x20] sm:$0xff] }
 0x7d4   :  { %3370 = vrcp.f32 %v1156_v51 }
 0x7d5   :  { %3173 = vmatmul.msk.f32.vlgmr.msrb.gmra.mxu2 %vm339_vm1, %v1180_v50 }
 0x7da   :  { %v3371_v52 = vpop.eup %3370 }
 0x7db   :  { %v1182_v53 = vmul.f32 %v3371_v52, %v3984_v10  ;;  %v1153_v55 = vpop.xlane.xlu2 %1152 }
 0x7dc   :  { %3372 = vrcp.f32 %v1153_v55  ;;  %v3138_v55 = vld [vmem:[%s4496_s7 + $0x70] sm:$0xff] }
 0x7dd   :  { %3175 = vmatmul.msk.f32.vlgmr.msrb.gmra.mxu3 %vm339_vm1, %v1182_v53  ;;  %v3139_v53 = vld [vmem:[%s4496_s7 + $0x78] sm:$0xff] }
 0x7de   :  { %1509 = vmatpush.msra.mxu3 %v3139_v53 }
 0x7e0   :  { %1510 = vmatpush.msra.mxu3 %v3138_v55  ;;  %v1590_v55 = vld [vmem:[#allocation2 + $0x158] sm:$0xff] }
 0x7e2   :  { %v3373_v56 = vpop.eup %3372 }
 0x7e3   :  { %v1159_v59 = vpop.xlane.xlu1 %1158  ;;  %v1165_v60 = vpop.xlane.xlu2 %1164  ;;  %v1181_v26 = vmul.f32 %v3373_v56, %v3357_v20  ;;  %v3137_v56 = vld [vmem:[%s4496_s7 + $0x68] sm:$0xff] }
 0x7e4   :  { %3374 = vrcp.f32 %v1159_v59  ;;  %1511 = vmatpush.msra.mxu3 %v3137_v56  ;;  %v1594_v56 = vld [vmem:[#allocation2 + $0x178] sm:$0xff] }
 0x7e5   :  { %3376 = vrcp.f32 %v1165_v60  ;;  %3174 = vmatmul.msk.f32.gmra.mxu2 %vm339_vm1, %v1181_v26  ;;  %v3136_v26 = vld [vmem:[%s4496_s7 + $0x60] sm:$0xff] }
 0x7e6   :  { %1512 = vmatpush.msra.mxu3 %v3136_v26  ;;  %v1589_v26 = vld [vmem:[#allocation2 + $0x150] sm:$0xff] }
 0x7ea   :  { %v3375_v61 = vpop.eup %3374 }
 0x7eb   :  { %v3377_v19 = vpop.eup %3376  ;;  %v1168_v62 = vpop.xlane.xlu1 %1167  ;;  %v1183_v0 = vmul.f32 %v3375_v61, %v3361_v27 }
 0x7ec   :  { %3378 = vrcp.f32 %v1168_v62  ;;  %v1185_v2 = vmul.f32 %v3377_v19, %v3991_v25  ;;  %v3135_v62 = vld [vmem:[%s4496_s7 + $0x58] sm:$0xff] }
 0x7ed   :  { %3176 = vmatmul.msk.f32.gmra.mxu3 %vm339_vm1, %v1183_v0 }
 0x7ee   :  { %3178 = vmatmul.msk.f32.gmra.mxu0 %vm339_vm1, %v1185_v2  ;;  %v3134_v2 = vld [vmem:[%s4496_s7 + $0x50] sm:$0xff]  ;;  %1513 = vmatpush.msra.mxu3 %v3135_v62 }
 0x7ef   :  { %v1585_v62 = vld [vmem:[#allocation2 + $0x130] sm:$0xff] }
 0x7f0   :  { %1514 = vmatpush.msra.mxu3 %v3134_v2  ;;  %v1592_v2 = vld [vmem:[#allocation2 + $0x168] sm:$0xff] }
 0x7f2   :  { %v3379_v3 = vpop.eup %3378 }
 0x7f3   :  { %v1186_v4 = vmul.f32 %v3379_v3, %v3363_v34  ;;  %v1171_v5 = vpop.xlane.xlu0 %1170 }
 0x7f4   :  { %3380 = vrcp.f32 %v1171_v5  ;;  %v4063_v5 = vld [vmem:[%s4497_s8 + $0x8] sm:$0xff] }
 0x7f5   :  { %3179 = vmatmul.msk.f32.vlgmr.msra.gmra.mxu1 %vm339_vm1, %v1186_v4 }
 0x7fa   :  { %v3381_v6 = vpop.eup %3380 }
 0x7fb   :  { %v1187_v7 = vmul.f32 %v3381_v6, %v3365_v37 }
 0x7fd   :  { %3180 = vmatmul.msk.f32.gmra.mxu1 %vm339_vm1, %v1187_v7 }
 0x847   :  { %v1361_v13 = vpop.f32.mrf.mxu0 }
 0x848   :  { %v1399_v17 = vsel %vm118_vm0, %v1361_v13, 0.0 }
 0x858   :  { %v1303_v10 = vpop.f32.mrf.mxu2 }
 0x859   :  { %v1396_v11 = vsel %vm118_vm0, %v1303_v10, 0.0 }
 0x860   :  { %v1332_v8 = vpop.f32.mrf.mxu3 }
 0x861   :  { %v1397_v9 = vsel %vm118_vm0, %v1332_v8, 0.0 }
 0x862   :  { %v1398_v14 = vadd.f32 %v1397_v9, %v1396_v11  ;;  %v1456_v9 = vperm.slane %v4063_v5, 2 }
 0x864   :  { %v1400_v23 = vadd.f32 %v1399_v17, %v1398_v14 }
 0x868   :  { %v1306_v20 = vpop.f32.mrf.mxu2 }
 0x869   :  { %v1403_v27 = vsel %vm118_vm0, %v1306_v20, 0.0 }
 0x86b   :  { %v1364_v29 = vpop.f32.mrf.mxu0 }
 0x86c   :  { %v1406_v33 = vsel %vm118_vm0, %v1364_v29, 0.0 }
 0x870   :  { %v1335_v16 = vpop.f32.mrf.mxu3 }
 0x871   :  { %v1404_v24 = vsel %vm118_vm0, %v1335_v16, 0.0  ;;  %v1459_v16 = vperm.slane %v4063_v5, 3 }
 0x872   :  { %v1390_v21 = vpop.f32.mrf.mxu1  ;;  %v1405_v30 = vadd.f32 %v1404_v24, %v1403_v27 }
 0x873   :  { %v1401_v25 = vsel %vm118_vm0, %v1390_v21, 0.0 }
 0x874   :  { %v1402_v22 = vadd.f32 %v1401_v25, %v1400_v23  ;;  %v1407_v35 = vadd.f32 %v1406_v33, %v1405_v30  ;;  %v3133_v30 = vld [vmem:[%s4496_s7 + $0x48] sm:$0xff] }
 0x875   :  { %1515 = vmatpush.msra.mxu3 %v3133_v30  ;;  %v1570_v30 = vperm.slane %v4063_v5, 4 }
 0x876   :  { %v1410_v31 = vadd.f32 %v1402_v22, %v3874_v58 }
 0x878   :  { %v1412_v32 = vsel %vm118_vm0, %v1410_v31, 0.0 }
 0x879   :  { %1413 = vadd.xlane.f32.xlu1 %v1412_v32  ;;  %v1462_v32 = vperm.slane %v4063_v5, 0 }
 0x87a   :  { %v1393_v34 = vpop.f32.mrf.mxu1 }
 0x87b   :  { %v1408_v36 = vsel %vm118_vm0, %v1393_v34, 0.0 }
 0x87c   :  { %v1409_v37 = vadd.f32 %v1408_v36, %v1407_v35 }
 0x87e   :  { %v1411_v38 = vadd.f32 %v1409_v37, %v3888_v1  ;;  %v3131_v1 = vld [vmem:[%s4495_s6 + $0x38] sm:$0xff] }
 0x87f   :  { %1481 = vmatpush.msra.mxu2 %v3131_v1 }
 0x880   :  { %v1415_v39 = vsel %vm118_vm0, %v1411_v38, 0.0 }
 0x881   :  { %1416 = vadd.xlane.f32.xlu2 %v1415_v39  ;;  %1482 = vmatpush.msra.mxu2 %v3130_v48  ;;  %v1494_v39 = vperm.slane %v4063_v5, 1 }
 0x883   :  { %1483 = vmatpush.msra.mxu2 %v3129_v28 }
 0x885   :  { %1484 = vmatpush.msra.mxu2 %v3128_v12 }
 0x887   :  { %1692 = vmatpush.msrb.mxu2 %v1590_v55  ;;  %v1611_v55 = vld [vmem:[#allocation5 + $0x178] sm:$0xff] }
 0x889   :  { %1693 = vmatpush.msrb.mxu2 %v1589_v26  ;;  %v1599_v26 = vld [vmem:[#allocation5 + $0x118] sm:$0xff] }
 0x8ec   :  { %v1414_v40 = vpop.xlane.xlu1 %1413 }
 0x8ed   :  { %v1418_v42 = vmul.f32 %v1414_v40, %v3773_v57 }
 0x8ef   :  { %v1420_v18 = vsub.f32 %v1410_v31, %v1418_v42  ;;  %v3132_v31 = vld [vmem:[%s4496_s7 + $0x40] sm:$0xff] }
 0x8f0   :  { %1516 = vmatpush.msra.mxu3 %v3132_v31 }
 0x8f1   :  { %v1422_v58 = vmul.f32 %v1420_v18, %v1420_v18 }
 0x8f2   :  { %1715 = vmatpush.msrb.mxu3 %v1594_v56  ;;  %v1610_v56 = vld [vmem:[#allocation5 + $0x170] sm:$0xff] }
 0x8f3   :  { %v1424_v15 = vsel %vm118_vm0, %v1422_v58, 0.0 }
 0x8f4   :  { %1425 = vadd.xlane.f32.xlu0 %v1424_v15  ;;  %v1417_v43 = vpop.xlane.xlu2 %1416 }
 0x8f5   :  { %v1419_v44 = vmul.f32 %v1417_v43, %v3773_v57 }
 0x8f7   :  { %v1421_v45 = vsub.f32 %v1411_v38, %v1419_v44 }
 0x8f9   :  { %v1423_v46 = vmul.f32 %v1421_v45, %v1421_v45 }
 0x8fb   :  { %v1427_v47 = vsel %vm118_vm0, %v1423_v46, 0.0 }
 0x8fc   :  { %1428 = vadd.xlane.f32.xlu1 %v1427_v47 }
 0x967   :  { %v1426_v50 = vpop.xlane.xlu0 %1425 }
 0x968   :  { %v1430_v51 = vmul.f32 %v1426_v50, %v3773_v57 }
 0x96a   :  { %v1432_v52 = vadd.f32 1e-06, %v1430_v51 }
 0x96c   :  { %3382 = vrsqrt.f32 %v1432_v52  ;;  %vm1440_vm3 = vweird.f32 %v1432_v52 }
 0x96f   :  { %v1429_v59 = vpop.xlane.xlu1 %1428 }
 0x970   :  { %v1431_v60 = vmul.f32 %v1429_v59, %v3773_v57  ;;  %v1582_v59 = vld [vmem:[#allocation2 + $0x118] sm:$0xff] }
 0x971   :  { %1646 = vmatpush.msrb.mxu0 %v1582_v59 }
 0x972   :  { %v3383_v61 = vpop.eup %3382  ;;  %v1433_v19 = vadd.f32 1e-06, %v1431_v60  ;;  %v1586_v60 = vld [vmem:[#allocation2 + $0x138] sm:$0xff] }
 0x973   :  { %v1435_v0 = vmul.f32 %v3383_v61, %v1432_v52  ;;  %vm1441_vm2 = vweird.f32 %v3383_v61  ;;  %1669 = vmatpush.msrb.mxu1 %v1586_v60  ;;  %v1605_v60 = vld [vmem:[#allocation5 + $0x148] sm:$0xff] }
 0x974   :  { %3384 = vrsqrt.f32 %v1433_v19  ;;  %vm1442_vm4 = vmor %vm1440_vm3, %vm1441_vm2  ;;  %vm1450_vm6 = vweird.f32 %v1433_v19 }
 0x975   :  { %v1436_v3 = vmul.f32 %v3383_v61, %v1435_v0  ;;  %v1588_v0 = vld [vmem:[#allocation2 + $0x148] sm:$0xff]  ;;  %1670 = vmatpush.msrb.mxu1 %v1585_v62  ;;  %v1598_v62 = vld [vmem:[#allocation5 + $0x110] sm:$0xff] }
 0x976   :  { %1694 = vmatpush.msrb.mxu2 %v1588_v0  ;;  %v1604_v0 = vld [vmem:[#allocation5 + $0x140] sm:$0xff] }
 0x977   :  { %v1437_v4 = vmul.f32 0.5, %v1436_v3  ;;  %v1580_v3 = vld [vmem:[#allocation2 + $0x108] sm:$0xff] }
 0x979   :  { %v1438_v6 = vsub.f32 1.5, %v1437_v4  ;;  %v1584_v4 = vld [vmem:[#allocation2 + $0x128] sm:$0xff] }
 0x97a   :  { %v3385_v7 = vpop.eup %3384  ;;  %1671 = vmatpush.msrb.mxu1 %v1584_v4  ;;  %v1597_v4 = vld [vmem:[#allocation5 + $0x108] sm:$0xff] }
 0x97b   :  { %v1439_v8 = vmul.f32 %v3383_v61, %v1438_v6  ;;  %v1445_v10 = vmul.f32 %v3385_v7, %v1433_v19  ;;  %vm1451_vm5 = vweird.f32 %v3385_v7  ;;  %v1581_v19 = vld [vmem:[#allocation2 + $0x110] sm:$0xff]  ;;  %v1587_v6 = vld [vmem:[#allocation2 + $0x140] sm:$0xff] }
 0x97c   :  { %vm1452_vm7 = vmor %vm1450_vm6, %vm1451_vm5  ;;  %1647 = vmatpush.msrb.mxu0 %v1581_v19  ;;  %1695 = vmatpush.msrb.mxu2 %v1587_v6  ;;  %v1603_v19 = vld [vmem:[#allocation5 + $0x138] sm:$0xff]  ;;  %v1601_v6 = vld [vmem:[#allocation5 + $0x128] sm:$0xff] }
 0x97d   :  { %v1443_v11 = vsel %vm1442_vm4, %v3383_v61, %v1439_v8  ;;  %v1446_v13 = vmul.f32 %v3385_v7, %v1445_v10  ;;  %v1593_v61 = vld [vmem:[#allocation2 + $0x170] sm:$0xff]  ;;  %v1579_v8 = vld [vmem:[#allocation2 + $0x100] sm:$0xff] }
 0x97e   :  { %v1454_v14 = vmul.f32 %v1443_v11, %v1420_v18  ;;  %1716 = vmatpush.msrb.mxu3 %v1593_v61  ;;  %1648 = vmatpush.msrb.mxu0 %v1580_v3  ;;  %v1583_v10 = vld [vmem:[#allocation2 + $0x120] sm:$0xff]  ;;  %v1609_v61 = vld [vmem:[#allocation5 + $0x168] sm:$0xff] }
 0x97f   :  { %v1447_v17 = vmul.f32 0.5, %v1446_v13  ;;  %1672 = vmatpush.msrb.mxu1 %v1583_v10  ;;  %v1608_v3 = vld [vmem:[#allocation5 + $0x160] sm:$0xff] }
 0x980   :  { %v1457_v20 = vmul.f32 %v1456_v9, %v1454_v14  ;;  %1717 = vmatpush.msrb.mxu3 %v1592_v2  ;;  %1649 = vmatpush.msrb.mxu0 %v1579_v8  ;;  %v1602_v2 = vld [vmem:[#allocation5 + $0x130] sm:$0xff]  ;;  %v1600_v8 = vld [vmem:[#allocation5 + $0x120] sm:$0xff] }
 0x981   :  { %v1448_v21 = vsub.f32 1.5, %v1447_v17  ;;  %3210 = vmatpush.xpose.msk.msra.mxu1 %vm118_vm0, %v3941_v41 }
 0x982   :  { %v1460_v23 = vadd.f32 %v1459_v16, %v1457_v20  ;;  %3206 = vmatpush.xpose.msk.msra.mxu0 %vm118_vm0, %v3941_v41 }
 0x983   :  { %v1449_v24 = vmul.f32 %v3385_v7, %v1448_v21 }
 0x984   :  { %3181 = vmatmul.msk.f32.vlgmr.msra.gmra.mxu2 %vm118_vm0, %v1460_v23 }
 0x985   :  { %v1453_v25 = vsel %vm1452_vm7, %v3385_v7, %v1449_v24  ;;  %v1591_v7 = vld [vmem:[#allocation2 + $0x160] sm:$0xff]  ;;  %3214 = vmatpush.xpose.msk.msra.mxu2 %vm118_vm0, %v3941_v41  ;;  %3211 = vmatpush.xpose.msk.msra.mxu1 %vm118_vm0, %v3958_v49 }
 0x986   :  { %v1455_v22 = vmul.f32 %v1453_v25, %v1421_v45  ;;  %1718 = vmatpush.msrb.mxu3 %v1591_v7  ;;  %3207 = vmatpush.xpose.msk.msra.mxu0 %vm118_vm0, %v3958_v49  ;;  %v1596_v7 = vld [vmem:[#allocation5 + $0x100] sm:$0xff] }
 0x988   :  { %v1458_v27 = vmul.f32 %v1456_v9, %v1455_v22 }
 0x989   :  { %3215 = vmatpush.xpose.msk.msra.mxu2 %vm118_vm0, %v3958_v49 }
 0x98a   :  { %v1461_v29 = vadd.f32 %v1459_v16, %v1458_v27 }
 0x98c   :  { %3182 = vmatmul.msk.f32.gmra.mxu2 %vm118_vm0, %v1461_v29 }
 0xa07   :  { %v1486_v33 = vpop.f32.mrf.mxu2 }
 0xa08   :  { %v1487_v34 = vadd.f32 %v1486_v33, %v1462_v32  ;;  %v1573_v33 = vperm.slane %v4063_v5, 5 }
 0xa0a   :  { %v1492_v35 = vmax.f32 %v1487_v34, 0.0 }
 0xa0c   :  { %3183 = vmatmul.msk.f32.vlgmr.msra.gmra.mxu3 %vm742_vm9, %v1492_v35 }
 0xa0d   :  { %3218 = vmatpush.xpose.msk.msra.mxu3 %vm118_vm0, %v3941_v41 }
 0xa0f   :  { %v1489_v36 = vpop.f32.mrf.mxu2 }
 0xa10   :  { %v1490_v37 = vadd.f32 %v1489_v36, %v1462_v32 }
 0xa11   :  { %3219 = vmatpush.xpose.msk.msra.mxu3 %vm118_vm0, %v3958_v49 }
 0xa12   :  { %v1493_v38 = vmax.f32 %v1490_v37, 0.0 }
 0xa14   :  { %3184 = vmatmul.msk.f32.gmra.mxu3 %vm742_vm9, %v1493_v38 }
 0xa8f   :  { %v1518_v40 = vpop.f32.mrf.mxu3 }
 0xa90   :  { %v1519_v42 = vadd.f32 %v1518_v40, %v1494_v39 }
 0xa92   :  { %v1524_v18 = vadd.f32 %v1519_v42, %v1460_v23 }
 0xa94   :  { %v1526_v58 = vsel %vm118_vm0, %v1524_v18, 0.0 }
 0xa95   :  { %1527 = vadd.xlane.f32.xlu2 %v1526_v58 }
 0xa97   :  { %v1521_v15 = vpop.f32.mrf.mxu3 }
 0xa98   :  { %v1522_v43 = vadd.f32 %v1521_v15, %v1494_v39 }
 0xa9a   :  { %v1525_v44 = vadd.f32 %v1522_v43, %v1461_v29 }
 0xa9c   :  { %v1529_v45 = vsel %vm118_vm0, %v1525_v44, 0.0 }
 0xa9d   :  { %1530 = vadd.xlane.f32.xlu0 %v1529_v45 }
 0xb08   :  { %v1528_v46 = vpop.xlane.xlu2 %1527 }
 0xb09   :  { %v1532_v47 = vmul.f32 %v1528_v46, %v3773_v57 }
 0xb0b   :  { %v4082_v1 = vsub.f32 %v1524_v18, %v1532_v47 }
 0xb0d   :  { %v1536_v48 = vmul.f32 %v4082_v1, %v4082_v1 }
 0xb0f   :  { %v1538_v28 = vsel %vm118_vm0, %v1536_v48, 0.0 }
 0xb10   :  { %v1531_v12 = vpop.xlane.xlu0 %1530  ;;  %1539 = vadd.xlane.f32.xlu1 %v1538_v28 }
 0xb11   :  { %v1533_v50 = vmul.f32 %v1531_v12, %v3773_v57 }
 0xb13   :  { %v4088_v51 = vsub.f32 %v1525_v44, %v1533_v50  ;;  %v4148_v50 = vld [vmem:[%s4491_s2] sm:$0xff] }
 0xb15   :  { %v1537_v52 = vmul.f32 %v4088_v51, %v4088_v51 }
 0xb17   :  { %v1541_v53 = vsel %vm118_vm0, %v1537_v52, 0.0  ;;  %v1607_v52 = vld [vmem:[#allocation5 + $0x158] sm:$0xff] }
 0xb18   :  { %1542 = vadd.xlane.f32.xlu2 %v1541_v53  ;;  %v1606_v53 = vld [vmem:[#allocation5 + $0x150] sm:$0xff] }
 0xb83   :  { %v1540_v9 = vpop.xlane.xlu1 %1539 }
 0xb84   :  { %v1544_v11 = vmul.f32 %v1540_v9, %v3773_v57 }
 0xb86   :  { %v1546_v13 = vadd.f32 1e-06, %v1544_v11 }
 0xb88   :  { %3386 = vrsqrt.f32 %v1546_v13  ;;  %vm1554_vm10 = vweird.f32 %v1546_v13 }
 0xb8b   :  { %v1543_v14 = vpop.xlane.xlu2 %1542 }
 0xb8c   :  { %v1545_v16 = vmul.f32 %v1543_v14, %v3773_v57 }
 0xb8e   :  { %v3387_v17 = vpop.eup %3386  ;;  %v1547_v20 = vadd.f32 1e-06, %v1545_v16 }
 0xb8f   :  { %v1549_v21 = vmul.f32 %v3387_v17, %v1546_v13  ;;  %vm1555_vm8 = vweird.f32 %v3387_v17 }
 0xb90   :  { %3388 = vrsqrt.f32 %v1547_v20  ;;  %vm1556_vm11 = vmor %vm1554_vm10, %vm1555_vm8  ;;  %vm1564_vm13 = vweird.f32 %v1547_v20 }
 0xb91   :  { %v1550_v23 = vmul.f32 %v3387_v17, %v1549_v21 }
 0xb93   :  { %v1551_v24 = vmul.f32 0.5, %v1550_v23 }
 0xb95   :  { %v1552_v25 = vsub.f32 1.5, %v1551_v24 }
 0xb96   :  { %v3389_v22 = vpop.eup %3388 }
 0xb97   :  { %v1553_v27 = vmul.f32 %v3387_v17, %v1552_v25  ;;  %v1559_v29 = vmul.f32 %v3389_v22, %v1547_v20  ;;  %vm1565_vm12 = vweird.f32 %v3389_v22 }
 0xb98   :  { %vm1566_vm14 = vmor %vm1564_vm13, %vm1565_vm12 }
 0xb99   :  { %v1557_v31 = vsel %vm1556_vm11, %v3387_v17, %v1553_v27  ;;  %v1560_v32 = vmul.f32 %v3389_v22, %v1559_v29 }
 0xb9a   :  { %v1568_v34 = vmul.f32 %v1557_v31, %v4082_v1 }
 0xb9b   :  { %v1561_v35 = vmul.f32 0.5, %v1560_v32 }
 0xb9c   :  { %v1571_v36 = vmul.f32 %v1570_v30, %v1568_v34 }
 0xb9d   :  { %v1562_v37 = vsub.f32 1.5, %v1561_v35 }
 0xb9e   :  { %v1574_v38 = vadd.f32 %v1573_v33, %v1571_v36 }
 0xb9f   :  { %v1563_v39 = vmul.f32 %v3389_v22, %v1562_v37 }
 0xba0   :  { %v4115_v40 = vmul.f32 %v1574_v38, %v3871_v54 }
 0xba1   :  { %v1567_v42 = vsel %vm1566_vm14, %v3389_v22, %v1563_v39 }
 0xba2   :  { %v1569_v18 = vmul.f32 %v1567_v42, %v4088_v51  ;;  %3198 = vmatmul.msk.f32.vlgmr.msrb.gmra.mxu0 %vm118_vm0, %v4115_v40  ;;  %3200 = vmatmul.msk.f32.vlgmr.msrb.gmra.mxu1 %vm118_vm0, %v4115_v40 }
 0xba3   :  { %3202 = vmatmul.msk.f32.vlgmr.msrb.gmra.mxu2 %vm118_vm0, %v4115_v40  ;;  %3204 = vmatmul.msk.f32.vlgmr.msrb.gmra.mxu3 %vm118_vm0, %v4115_v40 }
 0xba4   :  { %v1572_v5 = vmul.f32 %v1570_v30, %v1569_v18  ;;  %1988 = vmatpush.msrb.mxu2 %v1607_v52  ;;  %2011 = vmatpush.msrb.mxu3 %v1611_v55 }
 0xba5   :  { %1942 = vmatpush.msrb.mxu0 %v1599_v26  ;;  %1965 = vmatpush.msrb.mxu1 %v1603_v19 }
 0xba6   :  { %v1575_v58 = vadd.f32 %v1573_v33, %v1572_v5  ;;  %1989 = vmatpush.msrb.mxu2 %v1606_v53  ;;  %2012 = vmatpush.msrb.mxu3 %v1610_v56 }
 0xba7   :  { %1943 = vmatpush.msrb.mxu0 %v1598_v62  ;;  %1966 = vmatpush.msrb.mxu1 %v1602_v2 }
 0xba8   :  { %v4127_v15 = vmul.f32 %v1575_v58, %v3885_v63  ;;  %1990 = vmatpush.msrb.mxu2 %v1605_v60  ;;  %2013 = vmatpush.msrb.mxu3 %v1609_v61 }
 0xba9   :  { %1944 = vmatpush.msrb.mxu0 %v1597_v4  ;;  %1967 = vmatpush.msrb.mxu1 %v1601_v6 }
 0xbaa   :  { %3199 = vmatmul.msk.f32.gmra.mxu0 %vm118_vm0, %v4127_v15  ;;  %3201 = vmatmul.msk.f32.gmra.mxu1 %vm118_vm0, %v4127_v15 }
 0xbab   :  { %3203 = vmatmul.msk.f32.gmra.mxu2 %vm118_vm0, %v4127_v15  ;;  %3205 = vmatmul.msk.f32.gmra.mxu3 %vm118_vm0, %v4127_v15 }
 0xbac   :  { %1991 = vmatpush.msrb.mxu2 %v1604_v0  ;;  %2014 = vmatpush.msrb.mxu3 %v1608_v3 }
 0xbad   :  { %1945 = vmatpush.msrb.mxu0 %v1596_v7  ;;  %1968 = vmatpush.msrb.mxu1 %v1600_v8 }
 0xc1f   :  { %v1651_v43 = vpop.f32.mrf.mxu0  ;;  %v1674_v44 = vpop.f32.mrf.mxu1 }
 0xc20   :  { %3208 = vmatmul.msk.f32.vlgmr.msra.gmra.mxu0 %vm118_vm0, %v1651_v43  ;;  %3212 = vmatmul.msk.f32.vlgmr.msra.gmra.mxu1 %vm118_vm0, %v1674_v44 }
 0xc26   :  { %v1697_v45 = vpop.f32.mrf.mxu2  ;;  %v1720_v46 = vpop.f32.mrf.mxu3 }
 0xc27   :  { %3216 = vmatmul.msk.f32.vlgmr.msra.gmra.mxu2 %vm118_vm0, %v1697_v45  ;;  %3220 = vmatmul.msk.f32.vlgmr.msra.gmra.mxu3 %vm118_vm0, %v1720_v46  ;;  %v1654_v47 = vpop.f32.mrf.mxu0  ;;  %v1677_v1 = vpop.f32.mrf.mxu1 }
 0xc28   :  { %3209 = vmatmul.msk.f32.gmra.mxu0 %vm118_vm0, %v1654_v47  ;;  %3213 = vmatmul.msk.f32.gmra.mxu1 %vm118_vm0, %v1677_v1 }
 0xc2e   :  { %v1700_v48 = vpop.f32.mrf.mxu2  ;;  %v1723_v28 = vpop.f32.mrf.mxu3 }
 0xc2f   :  { %3217 = vmatmul.msk.f32.gmra.mxu2 %vm118_vm0, %v1700_v48  ;;  %3221 = vmatmul.msk.f32.gmra.mxu3 %vm118_vm0, %v1723_v28 }
 0xc30   :  { %3222 = vmatmul.msk.f32.vlgmr.msrb.gmra.mxu0 %vm118_vm0, %v3958_v49  ;;  %3224 = vmatmul.msk.f32.vlgmr.msrb.gmra.mxu1 %vm118_vm0, %v3958_v49 }
 0xc37   :  { %3226 = vmatmul.msk.f32.vlgmr.msrb.gmra.mxu2 %vm118_vm0, %v3958_v49  ;;  %3228 = vmatmul.msk.f32.vlgmr.msrb.gmra.mxu3 %vm118_vm0, %v3958_v49  ;;  %v4177_v49 = vld [vmem:[%s4491_s2 + $0x8] sm:$0xff] }
 0xc38   :  { %3223 = vmatmul.msk.f32.gmra.mxu0 %vm118_vm0, %v3941_v41  ;;  %3225 = vmatmul.msk.f32.gmra.mxu1 %vm118_vm0, %v3941_v41 }
 0xc3f   :  { %3227 = vmatmul.msk.f32.gmra.mxu2 %vm118_vm0, %v3941_v41  ;;  %3229 = vmatmul.msk.f32.gmra.mxu3 %vm118_vm0, %v3941_v41 }
 0xc9d   :  { %v1749_v12 = vpop.f32.mrf.mxu0  ;;  %v1778_v14 = vpop.f32.mrf.mxu1 }
 0xc9e   :  { %v4151_v51 = vadd.f32 %v4148_v50, %v1749_v12  ;;  %v1779_v20 = vadd.f32 %v4148_v50, %v1778_v14 }
 0xca0   :  { %v1842_v59 = vsel %vm339_vm1, %v4151_v51, -inf  ;;  %v1848_v27 = vsel %vm339_vm1, %v1779_v20, -inf }
 0xca1   :  { %1843 = vmax.xlane.f32.xlu2 %v1842_v59 }
 0xca5   :  { %v1752_v30 = vpop.f32.mrf.mxu0  ;;  %v1781_v31 = vpop.f32.mrf.mxu1 }
 0xca6   :  { %v1753_v32 = vadd.f32 %v4177_v49, %v1752_v30  ;;  %v1782_v33 = vadd.f32 %v4177_v49, %v1781_v31 }
 0xca8   :  { %v1851_v34 = vsel %vm339_vm1, %v1782_v33, -inf  ;;  %v1845_v35 = vsel %vm339_vm1, %v1753_v32, -inf }
 0xcaa   :  { %v1807_v10 = vpop.f32.mrf.mxu2  ;;  %v1836_v9 = vpop.f32.mrf.mxu3 }
 0xcab   :  { %v1808_v11 = vadd.f32 %v4148_v50, %v1807_v10  ;;  %v1837_v13 = vadd.f32 %v4148_v50, %v1836_v9 }
 0xcad   :  { %v1860_v16 = vsel %vm339_vm1, %v1837_v13, -inf  ;;  %v1854_v17 = vsel %vm339_vm1, %v1808_v11, -inf }
 0xcae   :  { %1861 = vmax.xlane.f32.xlu1 %v1860_v16  ;;  %1855 = vmax.xlane.f32.xlu0 %v1854_v17 }
 0xcb2   :  { %v1810_v21 = vpop.f32.mrf.mxu2  ;;  %v1839_v23 = vpop.f32.mrf.mxu3 }
 0xcb3   :  { %v1811_v24 = vadd.f32 %v4177_v49, %v1810_v21  ;;  %v1840_v25 = vadd.f32 %v4177_v49, %v1839_v23  ;;  %v1970_v21 = vpop.f32.mrf.mxu1 }
 0xcb5   :  { %v1857_v22 = vsel %vm339_vm1, %v1811_v24, -inf  ;;  %v1863_v29 = vsel %vm339_vm1, %v1840_v25, -inf }
 0xcb6   :  { %1858 = vmax.xlane.f32.xlu1 %v1857_v22  ;;  %1849 = vmax.xlane.f32.xlu0 %v1848_v27 }
 0xcb7   :  { %1864 = vmax.xlane.f32.xlu2 %v1863_v29 }
 0xcba   :  { %v1993_v28 = vpop.f32.mrf.mxu2  ;;  %v2016_v17 = vpop.f32.mrf.mxu3 }
 0xcbe   :  { %1852 = vmax.xlane.f32.xlu1 %v1851_v34  ;;  %1846 = vmax.xlane.f32.xlu0 %v1845_v35 }
 0xcc2   :  { %v1996_v0 = vpop.f32.mrf.mxu2  ;;  %v2019_v23 = vpop.f32.mrf.mxu3 }
 0xcc3   :  { %2100 = vmatpush.msra.mxu2 %v1996_v0  ;;  %2129 = vmatpush.msra.mxu3 %v2019_v23 }
 0xcc5   :  { %2101 = vmatpush.msra.mxu2 %v1993_v28  ;;  %2130 = vmatpush.msra.mxu3 %v2016_v17 }
 0xd14   :  { %v1844_v41 = vpop.xlane.xlu2 %1843 }
 0xd15   :  { %v1866_v36 = vsub.f32 %v4151_v51, %v1844_v41 }
 0xd17   :  { %v1874_v37 = vmul.f32 1.442695, %v1866_v36 }
 0xd19   :  { %3390 = vpow2.f32 %v1874_v37 }
 0xd1f   :  { %v4191_v38 = vpop.eup %3390 }
 0xd20   :  { %v1890_v39 = vsel %vm339_vm1, %v4191_v38, 0.0 }
 0xd21   :  { %v1862_v42 = vpop.xlane.xlu1 %1861  ;;  %v1856_v18 = vpop.xlane.xlu0 %1855  ;;  %1891 = vadd.xlane.f32.xlu1 %v1890_v39 }
 0xd22   :  { %v1872_v5 = vsub.f32 %v1837_v13, %v1862_v42  ;;  %v1870_v58 = vsub.f32 %v1808_v11, %v1856_v18 }
 0xd24   :  { %v1886_v43 = vmul.f32 1.442695, %v1872_v5  ;;  %v1882_v44 = vmul.f32 1.442695, %v1870_v58 }
 0xd26   :  { %3392 = vpow2.f32 %v1886_v43 }
 0xd27   :  { %3394 = vpow2.f32 %v1882_v44 }
 0xd29   :  { %v1859_v45 = vpop.xlane.xlu1 %1858  ;;  %v1850_v46 = vpop.xlane.xlu0 %1849 }
 0xd2a   :  { %v1871_v47 = vsub.f32 %v1811_v24, %v1859_v45  ;;  %v1868_v1 = vsub.f32 %v1779_v20, %v1850_v46  ;;  %v1865_v48 = vpop.xlane.xlu2 %1864  ;;  %v1947_v20 = vpop.f32.mrf.mxu0 }
 0xd2b   :  { %v1873_v12 = vsub.f32 %v1840_v25, %v1865_v48  ;;  %v1973_v25 = vpop.f32.mrf.mxu1 }
 0xd2c   :  { %v3393_v51 = vpop.eup %3392  ;;  %v1884_v52 = vmul.f32 1.442695, %v1871_v47  ;;  %v1878_v53 = vmul.f32 1.442695, %v1868_v1  ;;  %2071 = vmatpush.msra.mxu1 %v1973_v25 }
 0xd2d   :  { %v3395_v55 = vpop.eup %3394  ;;  %v1888_v56 = vmul.f32 1.442695, %v1873_v12  ;;  %v1908_v59 = vsel %vm339_vm1, %v3393_v51, 0.0 }
 0xd2e   :  { %3396 = vpow2.f32 %v1884_v52  ;;  %1909 = vadd.xlane.f32.xlu0 %v1908_v59  ;;  %v1902_v60 = vsel %vm339_vm1, %v3395_v55, 0.0  ;;  %2072 = vmatpush.msra.mxu1 %v1970_v21 }
 0xd2f   :  { %3398 = vpow2.f32 %v1878_v53  ;;  %1903 = vadd.xlane.f32.xlu2 %v1902_v60 }
 0xd30   :  { %3400 = vpow2.f32 %v1888_v56 }
 0xd31   :  { %v1853_v26 = vpop.xlane.xlu1 %1852  ;;  %v1847_v61 = vpop.xlane.xlu0 %1846 }
 0xd32   :  { %v1869_v19 = vsub.f32 %v1782_v33, %v1853_v26  ;;  %v1867_v62 = vsub.f32 %v1753_v32, %v1847_v61  ;;  %v1950_v24 = vpop.f32.mrf.mxu0 }
 0xd33   :  { %2042 = vmatpush.msra.mxu0 %v1950_v24 }
 0xd34   :  { %v3397_v2 = vpop.eup %3396  ;;  %v1880_v3 = vmul.f32 1.442695, %v1869_v19  ;;  %v1876_v4 = vmul.f32 1.442695, %v1867_v62 }
 0xd35   :  { %v3399_v6 = vpop.eup %3398  ;;  %v1905_v7 = vsel %vm339_vm1, %v3397_v2, 0.0  ;;  %2043 = vmatpush.msra.mxu0 %v1947_v20 }
 0xd36   :  { %v3401_v8 = vpop.eup %3400  ;;  %3402 = vpow2.f32 %v1880_v3  ;;  %1906 = vadd.xlane.f32.xlu0 %v1905_v7  ;;  %v1896_v10 = vsel %vm339_vm1, %v3399_v6, 0.0 }
 0xd37   :  { %3404 = vpow2.f32 %v1876_v4  ;;  %1897 = vadd.xlane.f32.xlu2 %v1896_v10  ;;  %v1911_v9 = vsel %vm339_vm1, %v3401_v8, 0.0 }
 0xd38   :  { %1912 = vadd.xlane.f32.xlu1 %v1911_v9 }
 0xd3c   :  { %v3403_v11 = vpop.eup %3402 }
 0xd3d   :  { %v3405_v13 = vpop.eup %3404  ;;  %v1899_v14 = vsel %vm339_vm1, %v3403_v11, 0.0 }
 0xd3e   :  { %1900 = vadd.xlane.f32.xlu0 %v1899_v14  ;;  %v1893_v16 = vsel %vm339_vm1, %v3405_v13, 0.0 }
 0xd3f   :  { %1894 = vadd.xlane.f32.xlu2 %v1893_v16 }
 0xd94   :  { %v1892_v22 = vpop.xlane.xlu1 %1891 }
 0xd95   :  { %3406 = vrcp.f32 %v1892_v22 }
 0xd9b   :  { %v3407_v27 = vpop.eup %3406 }
 0xd9c   :  { %v1922_v29 = vmul.f32 %v3407_v27, %v4191_v38 }
 0xd9e   :  { %3230 = vmatmul.msk.f32.vlgmr.msra.gmra.mxu0 %vm339_vm1, %v1922_v29  ;;  %v3187_v29 = vld [vmem:[%s4495_s6 + $0x50] sm:$0xff] }
 0xda1   :  { %v1910_v30 = vpop.xlane.xlu0 %1909 }
 0xda2   :  { %3408 = vrcp.f32 %v1910_v30  ;;  %v1904_v31 = vpop.xlane.xlu2 %1903  ;;  %v3186_v30 = vld [vmem:[%s4495_s6 + $0x48] sm:$0xff] }
 0xda3   :  { %3410 = vrcp.f32 %v1904_v31  ;;  %v3185_v31 = vld [vmem:[%s4495_s6 + $0x40] sm:$0xff] }
 0xda8   :  { %v3409_v32 = vpop.eup %3408 }
 0xda9   :  { %v3411_v33 = vpop.eup %3410  ;;  %v1928_v34 = vmul.f32 %v3409_v32, %v3393_v51  ;;  %v1907_v35 = vpop.xlane.xlu0 %1906 }
 0xdaa   :  { %v1926_v41 = vmul.f32 %v3411_v33, %v3395_v55  ;;  %3412 = vrcp.f32 %v1907_v35  ;;  %v1898_v36 = vpop.xlane.xlu2 %1897  ;;  %v3196_v35 = vld [vmem:[%s4496_s7 + $0xb8] sm:$0xff] }
 0xdab   :  { %v1913_v37 = vpop.xlane.xlu1 %1912  ;;  %3414 = vrcp.f32 %v1898_v36  ;;  %3236 = vmatmul.msk.f32.vlgmr.msra.gmra.mxu3 %vm339_vm1, %v1928_v34  ;;  %2251 = vmatpush.msrb.mxu1 %v3196_v35  ;;  %v3194_v36 = vld [vmem:[%s4496_s7 + $0xa8] sm:$0xff] }
 0xdac   :  { %3416 = vrcp.f32 %v1913_v37  ;;  %3234 = vmatmul.msk.f32.vlgmr.msra.gmra.mxu2 %vm339_vm1, %v1926_v41  ;;  %v3195_v41 = vld [vmem:[%s4496_s7 + $0xb0] sm:$0xff] }
 0xdad   :  { %2252 = vmatpush.msrb.mxu1 %v3195_v41  ;;  %v2324_v41 = vld [vmem:[#allocation2 + $0x198] sm:$0xff] }
 0xdae   :  { %2388 = vmatpush.msrb.mxu2 %v2324_v41  ;;  %v2344_v41 = vld [vmem:[#allocation5 + $0x1b0] sm:$0xff] }
 0xdaf   :  { %2253 = vmatpush.msrb.mxu1 %v3194_v36  ;;  %v2328_v36 = vld [vmem:[#allocation2 + $0x1b8] sm:$0xff] }
 0xdb0   :  { %v3413_v38 = vpop.eup %3412  ;;  %2411 = vmatpush.msrb.mxu3 %v2328_v36  ;;  %v2339_v36 = vld [vmem:[#allocation5 + $0x188] sm:$0xff] }
 0xdb1   :  { %v3415_v39 = vpop.eup %3414  ;;  %v1901_v42 = vpop.xlane.xlu0 %1900  ;;  %v1927_v18 = vmul.f32 %v3413_v38, %v3397_v2 }
 0xdb2   :  { %v3417_v5 = vpop.eup %3416  ;;  %v1924_v58 = vmul.f32 %v3415_v39, %v3399_v6  ;;  %3418 = vrcp.f32 %v1901_v42  ;;  %v1895_v43 = vpop.xlane.xlu2 %1894  ;;  %v3193_v39 = vld [vmem:[%s4496_s7 + $0xa0] sm:$0xff] }
 0xdb3   :  { %3420 = vrcp.f32 %v1895_v43  ;;  %v1929_v44 = vmul.f32 %v3417_v5, %v3401_v8  ;;  %v3192_v5 = vld [vmem:[%s4496_s7 + $0x98] sm:$0xff]  ;;  %2254 = vmatpush.msrb.mxu1 %v3193_v39  ;;  %v3191_v43 = vld [vmem:[%s4496_s7 + $0x90] sm:$0xff] }
 0xdb4   :  { %3232 = vmatmul.msk.f32.vlgmr.msra.gmra.mxu1 %vm339_vm1, %v1924_v58  ;;  %3235 = vmatmul.msk.f32.gmra.mxu2 %vm339_vm1, %v1927_v18  ;;  %v2323_v39 = vld [vmem:[#allocation2 + $0x190] sm:$0xff] }
 0xdb5   :  { %3237 = vmatmul.msk.f32.gmra.mxu3 %vm339_vm1, %v1929_v44  ;;  %2255 = vmatpush.msrb.mxu1 %v3192_v5  ;;  %v2335_v5 = vld [vmem:[#allocation2 + $0x1f0] sm:$0xff] }
 0xdb6   :  { %2389 = vmatpush.msrb.mxu2 %v2323_v39  ;;  %v2348_v39 = vld [vmem:[#allocation5 + $0x1d0] sm:$0xff] }
 0xdb7   :  { %2256 = vmatpush.msrb.mxu1 %v3191_v43  ;;  %v2326_v43 = vld [vmem:[#allocation2 + $0x1a8] sm:$0xff] }
 0xdb8   :  { %v3419_v45 = vpop.eup %3418 }
 0xdb9   :  { %v3421_v46 = vpop.eup %3420  ;;  %v1925_v47 = vmul.f32 %v3419_v45, %v3403_v11 }
 0xdba   :  { %v1923_v1 = vmul.f32 %v3421_v46, %v3405_v13  ;;  %v4262_v46 = vld [vmem:[%s4497_s8 + $0x10] sm:$0xff] }
 0xdbc   :  { %3231 = vmatmul.msk.f32.gmra.mxu0 %vm339_vm1, %v1923_v1  ;;  %3233 = vmatmul.msk.f32.gmra.mxu1 %vm339_vm1, %v1925_v47 }
 0xe1b   :  { %v2045_v48 = vpop.f32.mrf.mxu0 }
 0xe1c   :  { %v2138_v52 = vsel %vm118_vm0, %v2045_v48, 0.0 }
 0xe2e   :  { %v2132_v12 = vpop.f32.mrf.mxu3 }
 0xe2f   :  { %v2103_v28 = vpop.f32.mrf.mxu2  ;;  %v2143_v60 = vsel %vm118_vm0, %v2132_v12, 0.0  ;;  %v2198_v12 = vperm.slane %v4262_v46, 2 }
 0xe30   :  { %v2141_v56 = vsel %vm118_vm0, %v2103_v28, 0.0 }
 0xe31   :  { %v2074_v51 = vpop.f32.mrf.mxu1 }
 0xe32   :  { %v2139_v53 = vsel %vm118_vm0, %v2074_v51, 0.0 }
 0xe33   :  { %v2140_v55 = vadd.f32 %v2139_v53, %v2138_v52  ;;  %v2201_v53 = vperm.slane %v4262_v46, 3 }
 0xe35   :  { %v2142_v59 = vadd.f32 %v2141_v56, %v2140_v55 }
 0xe37   :  { %v2144_v26 = vadd.f32 %v2143_v60, %v2142_v59  ;;  %v2106_v61 = vpop.f32.mrf.mxu2 }
 0xe38   :  { %v2135_v4 = vpop.f32.mrf.mxu3  ;;  %v2148_v8 = vsel %vm118_vm0, %v2106_v61, 0.0 }
 0xe39   :  { %v2048_v19 = vpop.f32.mrf.mxu0  ;;  %v2077_v62 = vpop.f32.mrf.mxu1  ;;  %v2152_v0 = vadd.f32 %v2144_v26, %v4115_v40  ;;  %v2150_v9 = vsel %vm118_vm0, %v2135_v4, 0.0  ;;  %v3189_v4 = vld [vmem:[%s4496_s7 + $0x80] sm:$0xff] }
 0xe3a   :  { %v2145_v2 = vsel %vm118_vm0, %v2048_v19, 0.0  ;;  %v2146_v3 = vsel %vm118_vm0, %v2077_v62, 0.0 }
 0xe3b   :  { %v2147_v6 = vadd.f32 %v2146_v3, %v2145_v2  ;;  %v2154_v7 = vsel %vm118_vm0, %v2152_v0, 0.0  ;;  %v3190_v3 = vld [vmem:[%s4496_s7 + $0x88] sm:$0xff] }
 0xe3c   :  { %2155 = vadd.xlane.f32.xlu1 %v2154_v7  ;;  %2257 = vmatpush.msrb.mxu1 %v3190_v3 }
 0xe3d   :  { %v2149_v10 = vadd.f32 %v2148_v8, %v2147_v6  ;;  %v2204_v6 = vperm.slane %v4262_v46, 0 }
 0xe3e   :  { %2258 = vmatpush.msrb.mxu1 %v3189_v4 }
 0xe3f   :  { %v2151_v11 = vadd.f32 %v2150_v9, %v2149_v10 }
 0xe41   :  { %v2153_v13 = vadd.f32 %v2151_v11, %v4127_v15  ;;  %v3188_v15 = vld [vmem:[%s4495_s6 + $0x58] sm:$0xff] }
 0xe42   :  { %2223 = vmatpush.msrb.mxu0 %v3188_v15 }
 0xe43   :  { %v2157_v14 = vsel %vm118_vm0, %v2153_v13, 0.0 }
 0xe44   :  { %2158 = vadd.xlane.f32.xlu2 %v2157_v14  ;;  %2224 = vmatpush.msrb.mxu0 %v3187_v29  ;;  %v2236_v14 = vperm.slane %v4262_v46, 1 }
 0xe46   :  { %2225 = vmatpush.msrb.mxu0 %v3186_v30 }
 0xe48   :  { %2226 = vmatpush.msrb.mxu0 %v3185_v31 }
 0xeaf   :  { %v2156_v40 = vpop.xlane.xlu1 %2155 }
 0xeb0   :  { %v2160_v16 = vmul.f32 %v2156_v40, %v3773_v57 }
 0xeb2   :  { %v2162_v17 = vsub.f32 %v2152_v0, %v2160_v16 }
 0xeb4   :  { %v2164_v20 = vmul.f32 %v2162_v17, %v2162_v17 }
 0xeb6   :  { %v2166_v21 = vsel %vm118_vm0, %v2164_v20, 0.0 }
 0xeb7   :  { %2167 = vadd.xlane.f32.xlu0 %v2166_v21  ;;  %v2159_v23 = vpop.xlane.xlu2 %2158 }
 0xeb8   :  { %v2161_v24 = vmul.f32 %v2159_v23, %v3773_v57 }
 0xeba   :  { %v2163_v25 = vsub.f32 %v2153_v13, %v2161_v24 }
 0xebc   :  { %v2165_v22 = vmul.f32 %v2163_v25, %v2163_v25 }
 0xebe   :  { %v2169_v27 = vsel %vm118_vm0, %v2165_v22, 0.0 }
 0xebf   :  { %2170 = vadd.xlane.f32.xlu1 %v2169_v27 }
 0xf2a   :  { %v2168_v32 = vpop.xlane.xlu0 %2167 }
 0xf2b   :  { %v2172_v33 = vmul.f32 %v2168_v32, %v3773_v57 }
 0xf2d   :  { %v2174_v34 = vadd.f32 1e-06, %v2172_v33 }
 0xf2f   :  { %3422 = vrsqrt.f32 %v2174_v34  ;;  %vm2182_vm2 = vweird.f32 %v2174_v34 }
 0xf32   :  { %v2171_v37 = vpop.xlane.xlu1 %2170 }
 0xf33   :  { %v2173_v38 = vmul.f32 %v2171_v37, %v3773_v57  ;;  %v2332_v37 = vld [vmem:[#allocation2 + $0x1d8] sm:$0xff] }
 0xf34   :  { %2434 = vmatpush.msra.mxu0 %v2332_v37  ;;  %v2343_v37 = vld [vmem:[#allocation5 + $0x1a8] sm:$0xff] }
 0xf35   :  { %v3423_v42 = vpop.eup %3422  ;;  %v2175_v18 = vadd.f32 1e-06, %v2173_v38  ;;  %v2336_v38 = vld [vmem:[#allocation2 + $0x1f8] sm:$0xff] }
 0xf36   :  { %v2177_v58 = vmul.f32 %v3423_v42, %v2174_v34  ;;  %vm2183_vm15 = vweird.f32 %v3423_v42  ;;  %2457 = vmatpush.msra.mxu1 %v2336_v38  ;;  %v2349_v38 = vld [vmem:[#allocation5 + $0x1d8] sm:$0xff] }
 0xf37   :  { %3424 = vrsqrt.f32 %v2175_v18  ;;  %vm2184_vm3 = vmor %vm2182_vm2, %vm2183_vm15  ;;  %vm2192_vm5 = vweird.f32 %v2175_v18 }
 0xf38   :  { %v2178_v44 = vmul.f32 %v3423_v42, %v2177_v58  ;;  %v2322_v58 = vld [vmem:[#allocation2 + $0x188] sm:$0xff]  ;;  %2458 = vmatpush.msra.mxu1 %v2335_v5  ;;  %v2342_v5 = vld [vmem:[#allocation5 + $0x1a0] sm:$0xff] }
 0xf39   :  { %2390 = vmatpush.msrb.mxu2 %v2322_v58  ;;  %v2352_v58 = vld [vmem:[#allocation5 + $0x1f0] sm:$0xff] }
 0xf3a   :  { %v2179_v45 = vmul.f32 0.5, %v2178_v44  ;;  %v2330_v44 = vld [vmem:[#allocation2 + $0x1c8] sm:$0xff] }
 0xf3c   :  { %v2180_v47 = vsub.f32 1.5, %v2179_v45  ;;  %v2334_v45 = vld [vmem:[#allocation2 + $0x1e8] sm:$0xff] }
 0xf3d   :  { %v3425_v1 = vpop.eup %3424  ;;  %2459 = vmatpush.msra.mxu1 %v2334_v45  ;;  %v2346_v45 = vld [vmem:[#allocation5 + $0x1c0] sm:$0xff] }
 0xf3e   :  { %v2181_v48 = vmul.f32 %v3423_v42, %v2180_v47  ;;  %v2187_v28 = vmul.f32 %v3425_v1, %v2175_v18  ;;  %vm2193_vm4 = vweird.f32 %v3425_v1  ;;  %v2331_v18 = vld [vmem:[#allocation2 + $0x1d0] sm:$0xff]  ;;  %v2321_v47 = vld [vmem:[#allocation2 + $0x180] sm:$0xff] }
 0xf3f   :  { %vm2194_vm6 = vmor %vm2192_vm5, %vm2193_vm4  ;;  %2435 = vmatpush.msra.mxu0 %v2331_v18  ;;  %2391 = vmatpush.msrb.mxu2 %v2321_v47  ;;  %v2338_v18 = vld [vmem:[#allocation5 + $0x180] sm:$0xff] }
 0xf40   :  { %v2185_v51 = vsel %vm2184_vm3, %v3423_v42, %v2181_v48  ;;  %v2188_v52 = vmul.f32 %v3425_v1, %v2187_v28  ;;  %v2327_v42 = vld [vmem:[#allocation2 + $0x1b0] sm:$0xff]  ;;  %v2329_v48 = vld [vmem:[#allocation2 + $0x1c0] sm:$0xff] }
 0xf41   :  { %v2196_v55 = vmul.f32 %v2185_v51, %v2162_v17  ;;  %2412 = vmatpush.msrb.mxu3 %v2327_v42  ;;  %2436 = vmatpush.msra.mxu0 %v2330_v44  ;;  %v2333_v28 = vld [vmem:[#allocation2 + $0x1e0] sm:$0xff]  ;;  %v2353_v42 = vld [vmem:[#allocation5 + $0x1f8] sm:$0xff]  ;;  %v2351_v44 = vld [vmem:[#allocation5 + $0x1e8] sm:$0xff] }
 0xf42   :  { %v2189_v56 = vmul.f32 0.5, %v2188_v52  ;;  %2460 = vmatpush.msra.mxu1 %v2333_v28  ;;  %v4296_v52 = vld [vmem:[%s4490_s1 + $0x8] sm:$0xff]  ;;  %v2350_v47 = vld [vmem:[#allocation5 + $0x1e0] sm:$0xff] }
 0xf43   :  { %v2199_v59 = vmul.f32 %v2198_v12, %v2196_v55  ;;  %2413 = vmatpush.msrb.mxu3 %v2326_v43  ;;  %2437 = vmatpush.msra.mxu0 %v2329_v48  ;;  %v4309_v55 = vld [vmem:[%s4490_s1] sm:$0xff]  ;;  %v2347_v43 = vld [vmem:[#allocation5 + $0x1c8] sm:$0xff] }
 0xf44   :  { %v2190_v60 = vsub.f32 1.5, %v2189_v56  ;;  %3263 = vmatpush.xpose.msk.msra.mxu2 %vm118_vm0, %v4296_v52 }
 0xf45   :  { %v2202_v26 = vadd.f32 %v2201_v53, %v2199_v59 }
 0xf46   :  { %v2191_v61 = vmul.f32 %v3425_v1, %v2190_v60 }
 0xf47   :  { %3238 = vmatmul.msk.f32.vlgmr.msrb.gmra.mxu0 %vm118_vm0, %v2202_v26 }
 0xf48   :  { %v2195_v19 = vsel %vm2194_vm6, %v3425_v1, %v2191_v61  ;;  %v2325_v1 = vld [vmem:[#allocation2 + $0x1a0] sm:$0xff]  ;;  %3271 = vmatpush.xpose.msk.msrb.mxu0 %vm118_vm0, %v4296_v52  ;;  %3264 = vmatpush.xpose.msk.msra.mxu2 %vm118_vm0, %v4309_v55 }
 0xf49   :  { %v2197_v62 = vmul.f32 %v2195_v19, %v2163_v25  ;;  %2414 = vmatpush.msrb.mxu3 %v2325_v1 }
 0xf4b   :  { %v2200_v0 = vmul.f32 %v2198_v12, %v2197_v62  ;;  %3267 = vmatpush.xpose.msk.msra.mxu3 %vm118_vm0, %v4296_v52 }
 0xf4c   :  { %3272 = vmatpush.xpose.msk.msrb.mxu0 %vm118_vm0, %v4309_v55 }
 0xf4d   :  { %v2203_v2 = vadd.f32 %v2201_v53, %v2200_v0 }
 0xf4f   :  { %3239 = vmatmul.msk.f32.gmra.mxu0 %vm118_vm0, %v2203_v2  ;;  %3268 = vmatpush.xpose.msk.msra.mxu3 %vm118_vm0, %v4309_v55 }
 0xfc4   :  { %v2228_v7 = vpop.f32.mrf.mxu0 }
 0xfc5   :  { %v2229_v8 = vadd.f32 %v2228_v7, %v2204_v6 }
 0xfc7   :  { %v2234_v10 = vmax.f32 %v2229_v8, 0.0 }
 0xfc9   :  { %3240 = vmatmul.msk.f32.vlgmr.msrb.gmra.mxu1 %vm742_vm9, %v2234_v10  ;;  %v2315_v10 = vperm.slane %v4262_v46, 5 }
 0xfca   :  { %3275 = vmatpush.xpose.msk.msrb.mxu1 %vm118_vm0, %v4296_v52 }
 0xfcc   :  { %v2231_v9 = vpop.f32.mrf.mxu0 }
 0xfcd   :  { %v2232_v11 = vadd.f32 %v2231_v9, %v2204_v6  ;;  %v2312_v6 = vperm.slane %v4262_v46, 4 }
 0xfce   :  { %3276 = vmatpush.xpose.msk.msrb.mxu1 %vm118_vm0, %v4309_v55 }
 0xfcf   :  { %v2235_v13 = vmax.f32 %v2232_v11, 0.0 }
 0xfd1   :  { %3241 = vmatmul.msk.f32.gmra.mxu1 %vm742_vm9, %v2235_v13 }
0x1046   :  { %v2260_v40 = vpop.f32.mrf.mxu1 }
0x1047   :  { %v2261_v16 = vadd.f32 %v2260_v40, %v2236_v14 }
0x1049   :  { %v2266_v17 = vadd.f32 %v2261_v16, %v2202_v26 }
0x104b   :  { %v2268_v20 = vsel %vm118_vm0, %v2266_v17, 0.0 }
0x104c   :  { %2269 = vadd.xlane.f32.xlu2 %v2268_v20 }
0x104e   :  { %v2263_v21 = vpop.f32.mrf.mxu1 }
0x104f   :  { %v2264_v23 = vadd.f32 %v2263_v21, %v2236_v14 }
0x1051   :  { %v2267_v24 = vadd.f32 %v2264_v23, %v2203_v2 }
0x1053   :  { %v2271_v25 = vsel %vm118_vm0, %v2267_v24, 0.0 }
0x1054   :  { %2272 = vadd.xlane.f32.xlu0 %v2271_v25 }
0x10bf   :  { %v2270_v22 = vpop.xlane.xlu2 %2269 }
0x10c0   :  { %v2274_v27 = vmul.f32 %v2270_v22, %v3773_v57 }
0x10c2   :  { %v4281_v15 = vsub.f32 %v2266_v17, %v2274_v27 }
0x10c4   :  { %v2278_v29 = vmul.f32 %v4281_v15, %v4281_v15 }
0x10c6   :  { %v2280_v30 = vsel %vm118_vm0, %v2278_v29, 0.0 }
0x10c7   :  { %v2273_v31 = vpop.xlane.xlu0 %2272  ;;  %2281 = vadd.xlane.f32.xlu1 %v2280_v30 }
0x10c8   :  { %v2275_v32 = vmul.f32 %v2273_v31, %v3773_v57 }
0x10ca   :  { %v4287_v33 = vsub.f32 %v2267_v24, %v2275_v32 }
0x10cc   :  { %v2279_v34 = vmul.f32 %v4287_v33, %v4287_v33 }
0x10ce   :  { %v2283_v35 = vsel %vm118_vm0, %v2279_v34, 0.0  ;;  %v2345_v34 = vld [vmem:[#allocation5 + $0x1b8] sm:$0xff] }
0x10cf   :  { %2284 = vadd.xlane.f32.xlu2 %v2283_v35  ;;  %v2340_v35 = vld [vmem:[#allocation5 + $0x190] sm:$0xff] }
0x113a   :  { %v2282_v12 = vpop.xlane.xlu1 %2281 }
0x113b   :  { %v2286_v51 = vmul.f32 %v2282_v12, %v3773_v57 }
0x113d   :  { %v2288_v53 = vadd.f32 1e-06, %v2286_v51 }
0x113f   :  { %3426 = vrsqrt.f32 %v2288_v53  ;;  %vm2296_vm8 = vweird.f32 %v2288_v53 }
0x1142   :  { %v2285_v56 = vpop.xlane.xlu2 %2284 }
0x1143   :  { %v2287_v59 = vmul.f32 %v2285_v56, %v3773_v57 }
0x1145   :  { %v3427_v60 = vpop.eup %3426  ;;  %v2289_v26 = vadd.f32 1e-06, %v2287_v59 }
0x1146   :  { %v2291_v61 = vmul.f32 %v3427_v60, %v2288_v53  ;;  %vm2297_vm7 = vweird.f32 %v3427_v60 }
0x1147   :  { %3428 = vrsqrt.f32 %v2289_v26  ;;  %vm2298_vm10 = vmor %vm2296_vm8, %vm2297_vm7  ;;  %vm2306_vm12 = vweird.f32 %v2289_v26 }
0x1148   :  { %v2292_v19 = vmul.f32 %v3427_v60, %v2291_v61 }
0x114a   :  { %v2293_v62 = vmul.f32 0.5, %v2292_v19 }
0x114c   :  { %v2294_v0 = vsub.f32 1.5, %v2293_v62 }
0x114d   :  { %v3429_v2 = vpop.eup %3428 }
0x114e   :  { %v2295_v3 = vmul.f32 %v3427_v60, %v2294_v0  ;;  %v2301_v4 = vmul.f32 %v3429_v2, %v2289_v26  ;;  %vm2307_vm11 = vweird.f32 %v3429_v2 }
0x114f   :  { %vm2308_vm13 = vmor %vm2306_vm12, %vm2307_vm11 }
0x1150   :  { %v2299_v7 = vsel %vm2298_vm10, %v3427_v60, %v2295_v3  ;;  %v2302_v8 = vmul.f32 %v3429_v2, %v2301_v4 }
0x1151   :  { %v2310_v9 = vmul.f32 %v2299_v7, %v4281_v15 }
0x1152   :  { %v2303_v11 = vmul.f32 0.5, %v2302_v8 }
0x1153   :  { %v2313_v13 = vmul.f32 %v2312_v6, %v2310_v9 }
0x1154   :  { %v2304_v14 = vsub.f32 1.5, %v2303_v11 }
0x1155   :  { %v2316_v40 = vadd.f32 %v2315_v10, %v2313_v13 }
0x1156   :  { %v2305_v16 = vmul.f32 %v3429_v2, %v2304_v14 }
0x1157   :  { %v4324_v17 = vmul.f32 %v2316_v40, %v3871_v54 }
0x1158   :  { %v2309_v20 = vsel %vm2308_vm13, %v3429_v2, %v2305_v16 }
0x1159   :  { %v2311_v21 = vmul.f32 %v2309_v20, %v4287_v33  ;;  %3255 = vmatmul.msk.f32.vlgmr.msrb.gmra.mxu2 %vm118_vm0, %v4324_v17  ;;  %3257 = vmatmul.msk.f32.vlgmr.msrb.gmra.mxu3 %vm118_vm0, %v4324_v17  ;;  %v2341_v33 = vld [vmem:[#allocation5 + $0x198] sm:$0xff] }
0x115a   :  { %3259 = vmatmul.msk.f32.vlgmr.msra.gmra.mxu0 %vm118_vm0, %v4324_v17  ;;  %3261 = vmatmul.msk.f32.vlgmr.msra.gmra.mxu1 %vm118_vm0, %v4324_v17 }
0x115b   :  { %v2314_v46 = vmul.f32 %v2312_v6, %v2311_v21  ;;  %2684 = vmatpush.msrb.mxu2 %v2341_v33  ;;  %2707 = vmatpush.msrb.mxu3 %v2345_v34 }
0x115c   :  { %2730 = vmatpush.msra.mxu0 %v2349_v38  ;;  %2753 = vmatpush.msra.mxu1 %v2353_v42 }
0x115d   :  { %v2317_v23 = vadd.f32 %v2315_v10, %v2314_v46  ;;  %2685 = vmatpush.msrb.mxu2 %v2340_v35  ;;  %2708 = vmatpush.msrb.mxu3 %v2344_v41 }
0x115e   :  { %2731 = vmatpush.msra.mxu0 %v2348_v39  ;;  %2754 = vmatpush.msra.mxu1 %v2352_v58 }
0x115f   :  { %v4336_v24 = vmul.f32 %v2317_v23, %v3885_v63  ;;  %2686 = vmatpush.msrb.mxu2 %v2339_v36  ;;  %2709 = vmatpush.msrb.mxu3 %v2343_v37 }
0x1160   :  { %2732 = vmatpush.msra.mxu0 %v2347_v43  ;;  %2755 = vmatpush.msra.mxu1 %v2351_v44 }
0x1161   :  { %3256 = vmatmul.msk.f32.gmra.mxu2 %vm118_vm0, %v4336_v24  ;;  %3258 = vmatmul.msk.f32.gmra.mxu3 %vm118_vm0, %v4336_v24 }
0x1162   :  { %3260 = vmatmul.msk.f32.gmra.mxu0 %vm118_vm0, %v4336_v24  ;;  %3262 = vmatmul.msk.f32.gmra.mxu1 %vm118_vm0, %v4336_v24 }
0x1163   :  { %2687 = vmatpush.msrb.mxu2 %v2338_v18  ;;  %2710 = vmatpush.msrb.mxu3 %v2342_v5 }
0x1164   :  { %2733 = vmatpush.msra.mxu0 %v2346_v45  ;;  %2756 = vmatpush.msra.mxu1 %v2350_v47 }
0x11d7   :  { %v2439_v25 = vpop.f32.mrf.mxu0  ;;  %v2462_v22 = vpop.f32.mrf.mxu1 }
0x11d8   :  { %3273 = vmatmul.msk.f32.vlgmr.msrb.gmra.mxu0 %vm118_vm0, %v2439_v25  ;;  %3277 = vmatmul.msk.f32.vlgmr.msrb.gmra.mxu1 %vm118_vm0, %v2462_v22 }
0x11dc   :  { %v2393_v27 = vpop.f32.mrf.mxu2  ;;  %v2416_v15 = vpop.f32.mrf.mxu3 }
0x11dd   :  { %3265 = vmatmul.msk.f32.vlgmr.msra.gmra.mxu2 %vm118_vm0, %v2393_v27  ;;  %3269 = vmatmul.msk.f32.vlgmr.msra.gmra.mxu3 %vm118_vm0, %v2416_v15 }
0x11df   :  { %v2442_v29 = vpop.f32.mrf.mxu0  ;;  %v2465_v30 = vpop.f32.mrf.mxu1 }
0x11e0   :  { %3274 = vmatmul.msk.f32.gmra.mxu0 %vm118_vm0, %v2442_v29  ;;  %3278 = vmatmul.msk.f32.gmra.mxu1 %vm118_vm0, %v2465_v30 }
0x11e4   :  { %v2396_v31 = vpop.f32.mrf.mxu2  ;;  %v2419_v32 = vpop.f32.mrf.mxu3 }
0x11e5   :  { %3266 = vmatmul.msk.f32.gmra.mxu2 %vm118_vm0, %v2396_v31  ;;  %3270 = vmatmul.msk.f32.gmra.mxu3 %vm118_vm0, %v2419_v32 }
0x11e8   :  { %3283 = vmatmul.msk.f32.vlgmr.msra.gmra.mxu0 %vm118_vm0, %v4309_v55  ;;  %3285 = vmatmul.msk.f32.vlgmr.msra.gmra.mxu1 %vm118_vm0, %v4309_v55 }
0x11ed   :  { %3279 = vmatmul.msk.f32.vlgmr.msrb.gmra.mxu2 %vm118_vm0, %v4309_v55  ;;  %3281 = vmatmul.msk.f32.vlgmr.msrb.gmra.mxu3 %vm118_vm0, %v4309_v55 }
0x11f0   :  { %3284 = vmatmul.msk.f32.gmra.mxu0 %vm118_vm0, %v4296_v52  ;;  %3286 = vmatmul.msk.f32.gmra.mxu1 %vm118_vm0, %v4296_v52 }
0x11f5   :  { %3280 = vmatmul.msk.f32.gmra.mxu2 %vm118_vm0, %v4296_v52  ;;  %3282 = vmatmul.msk.f32.gmra.mxu3 %vm118_vm0, %v4296_v52 }
0x1255   :  { %v2578_v51 = vpop.f32.mrf.mxu1  ;;  %v2549_v53 = vpop.f32.mrf.mxu0 }
0x1256   :  { %v2550_v60 = vadd.f32 %v4148_v50, %v2549_v53  ;;  %v2579_v6 = vadd.f32 %v4148_v50, %v2578_v51 }
0x1258   :  { %v2596_v62 = vsel %vm339_vm1, %v2550_v60, -inf  ;;  %v2602_v52 = vsel %vm339_vm1, %v2579_v6, -inf }
0x125d   :  { %v2581_v3 = vpop.f32.mrf.mxu1  ;;  %v2552_v4 = vpop.f32.mrf.mxu0 }
0x125e   :  { %v2582_v7 = vadd.f32 %v4177_v49, %v2581_v3  ;;  %v2553_v8 = vadd.f32 %v4177_v49, %v2552_v4 }
0x1260   :  { %v2491_v1 = vpop.f32.mrf.mxu2  ;;  %v2520_v48 = vpop.f32.mrf.mxu3  ;;  %v2605_v10 = vsel %vm339_vm1, %v2582_v7, -inf  ;;  %v2599_v9 = vsel %vm339_vm1, %v2553_v8, -inf }
0x1261   :  { %v2492_v28 = vadd.f32 %v4148_v50, %v2491_v1  ;;  %v2521_v12 = vadd.f32 %v4148_v50, %v2520_v48 }
0x1263   :  { %v2590_v56 = vsel %vm339_vm1, %v2521_v12, -inf  ;;  %v2584_v59 = vsel %vm339_vm1, %v2492_v28, -inf }
0x1264   :  { %2591 = vmax.xlane.f32.xlu1 %v2590_v56  ;;  %2585 = vmax.xlane.f32.xlu0 %v2584_v59 }
0x1265   :  { %v2735_v50 = vpop.f32.mrf.mxu0  ;;  %v2758_v21 = vpop.f32.mrf.mxu1 }
0x1268   :  { %v2494_v26 = vpop.f32.mrf.mxu2  ;;  %v2523_v61 = vpop.f32.mrf.mxu3 }
0x1269   :  { %v2495_v55 = vadd.f32 %v4177_v49, %v2494_v26  ;;  %v2524_v19 = vadd.f32 %v4177_v49, %v2523_v61 }
0x126b   :  { %v2587_v0 = vsel %vm339_vm1, %v2495_v55, -inf  ;;  %v2593_v2 = vsel %vm339_vm1, %v2524_v19, -inf }
0x126c   :  { %2597 = vmax.xlane.f32.xlu1 %v2596_v62  ;;  %2588 = vmax.xlane.f32.xlu2 %v2587_v0 }
0x126d   :  { %2594 = vmax.xlane.f32.xlu0 %v2593_v2  ;;  %v2738_v36 = vpop.f32.mrf.mxu0  ;;  %v2761_v37 = vpop.f32.mrf.mxu1 }
0x126e   :  { %2842 = vmatpush.msrb.mxu0 %v2738_v36  ;;  %2871 = vmatpush.msrb.mxu1 %v2761_v37 }
0x1270   :  { %v2689_v27 = vpop.f32.mrf.mxu2  ;;  %v2712_v29 = vpop.f32.mrf.mxu3  ;;  %2843 = vmatpush.msrb.mxu0 %v2735_v50  ;;  %2872 = vmatpush.msrb.mxu1 %v2758_v21 }
0x1274   :  { %2606 = vmax.xlane.f32.xlu1 %v2605_v10  ;;  %2603 = vmax.xlane.f32.xlu2 %v2602_v52 }
0x1275   :  { %2600 = vmax.xlane.f32.xlu0 %v2599_v9 }
0x1278   :  { %v2692_v58 = vpop.f32.mrf.mxu2  ;;  %v2715_v44 = vpop.f32.mrf.mxu3 }
0x1279   :  { %2784 = vmatpush.msra.mxu2 %v2692_v58  ;;  %2813 = vmatpush.msra.mxu3 %v2715_v44 }
0x127b   :  { %2785 = vmatpush.msra.mxu2 %v2689_v27  ;;  %2814 = vmatpush.msra.mxu3 %v2712_v29 }
0x12d7   :  { %v2592_v11 = vpop.xlane.xlu1 %2591  ;;  %v2586_v13 = vpop.xlane.xlu0 %2585 }
0x12d8   :  { %v2610_v14 = vsub.f32 %v2521_v12, %v2592_v11  ;;  %v2608_v40 = vsub.f32 %v2492_v28, %v2586_v13 }
0x12da   :  { %v2620_v16 = vmul.f32 1.442695, %v2610_v14  ;;  %v2616_v20 = vmul.f32 1.442695, %v2608_v40 }
0x12dc   :  { %3430 = vpow2.f32 %v2620_v16 }
0x12dd   :  { %3432 = vpow2.f32 %v2616_v20 }
0x12df   :  { %v2598_v49 = vpop.xlane.xlu1 %2597  ;;  %v2589_v46 = vpop.xlane.xlu2 %2588 }
0x12e0   :  { %v2612_v23 = vsub.f32 %v2550_v60, %v2598_v49  ;;  %v2609_v25 = vsub.f32 %v2495_v55, %v2589_v46  ;;  %v2595_v22 = vpop.xlane.xlu0 %2594 }
0x12e1   :  { %v2611_v15 = vsub.f32 %v2524_v19, %v2595_v22 }
0x12e2   :  { %v3431_v30 = vpop.eup %3430  ;;  %v2624_v31 = vmul.f32 1.442695, %v2612_v23  ;;  %v2618_v32 = vmul.f32 1.442695, %v2609_v25 }
0x12e3   :  { %v3433_v33 = vpop.eup %3432  ;;  %v2622_v34 = vmul.f32 1.442695, %v2611_v15  ;;  %v2638_v35 = vsel %vm339_vm1, %v3431_v30, 0.0 }
0x12e4   :  { %3434 = vpow2.f32 %v2624_v31  ;;  %2639 = vadd.xlane.f32.xlu0 %v2638_v35  ;;  %v2632_v41 = vsel %vm339_vm1, %v3433_v33, 0.0 }
0x12e5   :  { %3436 = vpow2.f32 %v2618_v32  ;;  %2633 = vadd.xlane.f32.xlu2 %v2632_v41 }
0x12e6   :  { %3438 = vpow2.f32 %v2622_v34 }
0x12e7   :  { %v2607_v38 = vpop.xlane.xlu1 %2606  ;;  %v2604_v39 = vpop.xlane.xlu2 %2603 }
0x12e8   :  { %v2615_v42 = vsub.f32 %v2582_v7, %v2607_v38  ;;  %v2614_v18 = vsub.f32 %v2579_v6, %v2604_v39  ;;  %v2601_v5 = vpop.xlane.xlu0 %2600 }
0x12e9   :  { %v2613_v43 = vsub.f32 %v2553_v8, %v2601_v5 }
0x12ea   :  { %v3435_v45 = vpop.eup %3434  ;;  %v2630_v47 = vmul.f32 1.442695, %v2615_v42  ;;  %v2628_v1 = vmul.f32 1.442695, %v2614_v18 }
0x12eb   :  { %v3437_v48 = vpop.eup %3436  ;;  %v2626_v28 = vmul.f32 1.442695, %v2613_v43  ;;  %v2644_v12 = vsel %vm339_vm1, %v3435_v45, 0.0 }
0x12ec   :  { %v3439_v51 = vpop.eup %3438  ;;  %3440 = vpow2.f32 %v2630_v47  ;;  %v2635_v53 = vsel %vm339_vm1, %v3437_v48, 0.0  ;;  %2645 = vadd.xlane.f32.xlu0 %v2644_v12 }
0x12ed   :  { %3442 = vpow2.f32 %v2628_v1  ;;  %2636 = vadd.xlane.f32.xlu1 %v2635_v53  ;;  %v2641_v56 = vsel %vm339_vm1, %v3439_v51, 0.0 }
0x12ee   :  { %3444 = vpow2.f32 %v2626_v28  ;;  %2642 = vadd.xlane.f32.xlu2 %v2641_v56 }
0x12f2   :  { %v3441_v59 = vpop.eup %3440 }
0x12f3   :  { %v3443_v60 = vpop.eup %3442  ;;  %v2653_v26 = vsel %vm339_vm1, %v3441_v59, 0.0 }
0x12f4   :  { %v3445_v61 = vpop.eup %3444  ;;  %v2650_v55 = vsel %vm339_vm1, %v3443_v60, 0.0  ;;  %2654 = vadd.xlane.f32.xlu0 %v2653_v26 }
0x12f5   :  { %2651 = vadd.xlane.f32.xlu1 %v2650_v55  ;;  %v2647_v19 = vsel %vm339_vm1, %v3445_v61, 0.0 }
0x12f6   :  { %2648 = vadd.xlane.f32.xlu2 %v2647_v19 }
0x1357   :  { %v2640_v62 = vpop.xlane.xlu0 %2639 }
0x1358   :  { %v2634_v0 = vpop.xlane.xlu2 %2633  ;;  %3446 = vrcp.f32 %v2640_v62  ;;  %v3244_v62 = vld [vmem:[%s4495_s6 + $0x70] sm:$0xff] }
0x1359   :  { %3448 = vrcp.f32 %v2634_v0  ;;  %v3243_v0 = vld [vmem:[%s4495_s6 + $0x68] sm:$0xff] }
0x135e   :  { %v3447_v2 = vpop.eup %3446 }
0x135f   :  { %v3449_v3 = vpop.eup %3448  ;;  %v2666_v4 = vmul.f32 %v3447_v2, %v3431_v30  ;;  %v2646_v6 = vpop.xlane.xlu0 %2645  ;;  %v3242_v2 = vld [vmem:[%s4495_s6 + $0x60] sm:$0xff] }
0x1360   :  { %v2664_v7 = vmul.f32 %v3449_v3, %v3433_v33  ;;  %v2637_v8 = vpop.xlane.xlu1 %2636  ;;  %3450 = vrcp.f32 %v2646_v6 }
0x1361   :  { %3452 = vrcp.f32 %v2637_v8  ;;  %v2643_v10 = vpop.xlane.xlu2 %2642  ;;  %3289 = vmatmul.msk.f32.vlgmr.msra.gmra.mxu3 %vm339_vm1, %v2666_v4  ;;  %v3252_v8 = vld [vmem:[%s4496_s7 + $0xf0] sm:$0xff] }
0x1362   :  { %3454 = vrcp.f32 %v2643_v10  ;;  %3287 = vmatmul.msk.f32.vlgmr.msra.gmra.mxu2 %vm339_vm1, %v2664_v7  ;;  %v3253_v7 = vld [vmem:[%s4496_s7 + $0xf8] sm:$0xff]  ;;  %v3251_v10 = vld [vmem:[%s4496_s7 + $0xe8] sm:$0xff] }
0x1363   :  { %2993 = vmatpush.msrb.mxu3 %v3253_v7 }
0x1365   :  { %2994 = vmatpush.msrb.mxu3 %v3252_v8 }
0x1366   :  { %v3451_v52 = vpop.eup %3450 }
0x1367   :  { %v3453_v9 = vpop.eup %3452  ;;  %v2668_v11 = vmul.f32 %v3451_v52, %v3435_v45  ;;  %v2655_v50 = vpop.xlane.xlu0 %2654  ;;  %2995 = vmatpush.msrb.mxu3 %v3251_v10 }
0x1368   :  { %v3455_v13 = vpop.eup %3454  ;;  %v2652_v14 = vpop.xlane.xlu1 %2651  ;;  %v2665_v40 = vmul.f32 %v3453_v9, %v3437_v48 }
0x1369   :  { %3456 = vrcp.f32 %v2652_v14  ;;  %v2649_v16 = vpop.xlane.xlu2 %2648  ;;  %v2667_v20 = vmul.f32 %v3455_v13, %v3439_v51  ;;  %3291 = vmatmul.msk.f32.vlgmr.msrb.gmra.mxu0 %vm339_vm1, %v2668_v11  ;;  %v3250_v11 = vld [vmem:[%s4496_s7 + $0xe0] sm:$0xff] }
0x136a   :  { %3458 = vrcp.f32 %v2649_v16  ;;  %3288 = vmatmul.msk.f32.gmra.mxu2 %vm339_vm1, %v2665_v40  ;;  %v3249_v40 = vld [vmem:[%s4496_s7 + $0xd8] sm:$0xff]  ;;  %2996 = vmatpush.msrb.mxu3 %v3250_v11 }
0x136b   :  { %3290 = vmatmul.msk.f32.gmra.mxu3 %vm339_vm1, %v2667_v20  ;;  %3460 = vrcp.f32 %v2655_v50  ;;  %v3248_v20 = vld [vmem:[%s4496_s7 + $0xd0] sm:$0xff] }
0x136c   :  { %2997 = vmatpush.msrb.mxu3 %v3249_v40 }
0x136e   :  { %2998 = vmatpush.msrb.mxu3 %v3248_v20 }
0x136f   :  { %v3457_v21 = vpop.eup %3456 }
0x1370   :  { %v3459_v49 = vpop.eup %3458  ;;  %v2670_v46 = vmul.f32 %v3457_v21, %v3443_v60 }
0x1371   :  { %v2669_v23 = vmul.f32 %v3459_v49, %v3445_v61  ;;  %v3461_v25 = vpop.eup %3460  ;;  %v4453_v49 = vld [vmem:[%s4497_s8 + $0x18] sm:$0xff] }
0x1372   :  { %3293 = vmatmul.msk.f32.vlgmr.msrb.gmra.mxu1 %vm339_vm1, %v2670_v46  ;;  %v2671_v22 = vmul.f32 %v3461_v25, %v3441_v59 }
0x1373   :  { %3292 = vmatmul.msk.f32.gmra.mxu0 %vm339_vm1, %v2669_v23 }
0x137a   :  { %3294 = vmatmul.msk.f32.gmra.mxu1 %vm339_vm1, %v2671_v22 }
0x13e4   :  { %v2816_v27 = vpop.f32.mrf.mxu3 }
0x13e5   :  { %v2787_v15 = vpop.f32.mrf.mxu2  ;;  %v2881_v31 = vsel %vm118_vm0, %v2816_v27, 0.0  ;;  %v2940_v27 = vperm.slane %v4453_v49, 2 }
0x13e6   :  { %v2845_v29 = vpop.f32.mrf.mxu0  ;;  %v2880_v30 = vsel %vm118_vm0, %v2787_v15, 0.0 }
0x13e7   :  { %v2882_v32 = vadd.f32 %v2881_v31, %v2880_v30  ;;  %v2883_v33 = vsel %vm118_vm0, %v2845_v29, 0.0  ;;  %v2943_v30 = vperm.slane %v4453_v49, 3 }
0x13e9   :  { %v2884_v41 = vadd.f32 %v2883_v33, %v2882_v32 }
0x13ed   :  { %v2790_v34 = vpop.f32.mrf.mxu2 }
0x13ee   :  { %v2819_v35 = vpop.f32.mrf.mxu3  ;;  %v2887_v37 = vsel %vm118_vm0, %v2790_v34, 0.0 }
0x13ef   :  { %v2874_v36 = vpop.f32.mrf.mxu1  ;;  %v2888_v38 = vsel %vm118_vm0, %v2819_v35, 0.0 }
0x13f0   :  { %v2885_v39 = vsel %vm118_vm0, %v2874_v36, 0.0  ;;  %v2848_v42 = vpop.f32.mrf.mxu0  ;;  %v2889_v5 = vadd.f32 %v2888_v38, %v2887_v37 }
0x13f1   :  { %v2886_v18 = vadd.f32 %v2885_v39, %v2884_v41  ;;  %v2890_v43 = vsel %vm118_vm0, %v2848_v42, 0.0  ;;  %v3247_v42 = vld [vmem:[%s4496_s7 + $0xc8] sm:$0xff] }
0x13f2   :  { %v2891_v45 = vadd.f32 %v2890_v43, %v2889_v5  ;;  %2999 = vmatpush.msrb.mxu3 %v3247_v42  ;;  %v2946_v5 = vperm.slane %v4453_v49, 0 }
0x13f3   :  { %v2894_v58 = vadd.f32 %v2886_v18, %v4324_v17  ;;  %v3246_v18 = vld [vmem:[%s4496_s7 + $0xc0] sm:$0xff]  ;;  %s3560_s7 = smov [#allocation7]  }
0x13f4   :  { %3000 = vmatpush.msrb.mxu3 %v3246_v18  ;;  %s3068_s30 = sshll.u32 %s3560_s7, 4  ;;  %s3069_s30 = int_to_ptr.vmem [resolvable:$true] %s3068_s30 }
0x13f5   :  { %v2896_v44 = vsel %vm118_vm0, %v2894_v58, 0.0 }
0x13f6   :  { %2897 = vadd.xlane.f32.xlu1 %v2896_v44 }
0x13f7   :  { %v2877_v47 = vpop.f32.mrf.mxu1 }
0x13f8   :  { %v2892_v1 = vsel %vm118_vm0, %v2877_v47, 0.0 }
0x13f9   :  { %v2893_v48 = vadd.f32 %v2892_v1, %v2891_v45 }
0x13fb   :  { %v2895_v28 = vadd.f32 %v2893_v48, %v4336_v24  ;;  %v3245_v24 = vld [vmem:[%s4495_s6 + $0x78] sm:$0xff]  ;;  %v2978_v48 = vperm.slane %v4453_v49, 1 }
0x13fc   :  { %2965 = vmatpush.msrb.mxu2 %v3245_v24 }
0x13fd   :  { %v2899_v12 = vsel %vm118_vm0, %v2895_v28, 0.0 }
0x13fe   :  { %2900 = vadd.xlane.f32.xlu2 %v2899_v12  ;;  %2966 = vmatpush.msrb.mxu2 %v3244_v62 }
0x1400   :  { %2967 = vmatpush.msrb.mxu2 %v3243_v0 }
0x1402   :  { %2968 = vmatpush.msrb.mxu2 %v3242_v2 }
0x1469   :  { %v2898_v51 = vpop.xlane.xlu1 %2897 }
0x146a   :  { %v2902_v53 = vmul.f32 %v2898_v51, %v3773_v57 }
0x146c   :  { %v2904_v56 = vsub.f32 %v2894_v58, %v2902_v53 }
0x146e   :  { %v2906_v17 = vmul.f32 %v2904_v56, %v2904_v56 }
0x1470   :  { %v2908_v59 = vsel %vm118_vm0, %v2906_v17, 0.0 }
0x1471   :  { %2909 = vadd.xlane.f32.xlu0 %v2908_v59  ;;  %v2901_v60 = vpop.xlane.xlu2 %2900 }
0x1472   :  { %v2903_v26 = vmul.f32 %v2901_v60, %v3773_v57 }
0x1474   :  { %v2905_v61 = vsub.f32 %v2895_v28, %v2903_v26 }
0x1476   :  { %v2907_v55 = vmul.f32 %v2905_v61, %v2905_v61 }
0x1478   :  { %v2911_v19 = vsel %vm118_vm0, %v2907_v55, 0.0 }
0x1479   :  { %2912 = vadd.xlane.f32.xlu1 %v2911_v19 }
0x14e4   :  { %v2910_v3 = vpop.xlane.xlu0 %2909 }
0x14e5   :  { %v2914_v4 = vmul.f32 %v2910_v3, %v3773_v57 }
0x14e7   :  { %v2916_v6 = vadd.f32 1e-06, %v2914_v4 }
0x14e9   :  { %3462 = vrsqrt.f32 %v2916_v6  ;;  %vm2924_vm14 = vweird.f32 %v2916_v6 }
0x14ec   :  { %v2913_v52 = vpop.xlane.xlu1 %2912 }
0x14ed   :  { %v2915_v9 = vmul.f32 %v2913_v52, %v3773_v57 }
0x14ef   :  { %v3463_v13 = vpop.eup %3462  ;;  %v2917_v14 = vadd.f32 1e-06, %v2915_v9 }
0x14f0   :  { %v2919_v16 = vmul.f32 %v3463_v13, %v2916_v6  ;;  %vm2925_vm1 = vweird.f32 %v3463_v13 }
0x14f1   :  { %3464 = vrsqrt.f32 %v2917_v14  ;;  %vm2926_vm15 = vmor %vm2924_vm14, %vm2925_vm1  ;;  %vm2934_vm3 = vweird.f32 %v2917_v14 }
0x14f2   :  { %v2920_v50 = vmul.f32 %v3463_v13, %v2919_v16 }
0x14f4   :  { %v2921_v21 = vmul.f32 0.5, %v2920_v50 }
0x14f6   :  { %v2922_v46 = vsub.f32 1.5, %v2921_v21 }
0x14f7   :  { %v3465_v23 = vpop.eup %3464 }
0x14f8   :  { %v2923_v25 = vmul.f32 %v3463_v13, %v2922_v46  ;;  %v2929_v22 = vmul.f32 %v3465_v23, %v2917_v14  ;;  %vm2935_vm2 = vweird.f32 %v3465_v23  ;;  %v3054_v46 = vperm.slane %v4453_v49, 4 }
0x14f9   :  { %vm2936_vm4 = vmor %vm2934_vm3, %vm2935_vm2 }
0x14fa   :  { %v2927_v15 = vsel %vm2926_vm15, %v3463_v13, %v2923_v25  ;;  %v2930_v29 = vmul.f32 %v3465_v23, %v2929_v22 }
0x14fb   :  { %v2938_v31 = vmul.f32 %v2927_v15, %v2904_v56 }
0x14fc   :  { %v2931_v32 = vmul.f32 0.5, %v2930_v29 }
0x14fd   :  { %v2941_v33 = vmul.f32 %v2940_v27, %v2938_v31 }
0x14fe   :  { %v2932_v34 = vsub.f32 1.5, %v2931_v32 }
0x14ff   :  { %v2944_v35 = vadd.f32 %v2943_v30, %v2941_v33 }
0x1500   :  { %v2933_v41 = vmul.f32 %v3465_v23, %v2932_v34 }
0x1501   :  { %3295 = vmatmul.msk.f32.vlgmr.msrb.gmra.mxu2 %vm118_vm0, %v2944_v35 }
0x1502   :  { %v2937_v36 = vsel %vm2936_vm4, %v3465_v23, %v2933_v41 }
0x1503   :  { %v2939_v37 = vmul.f32 %v2937_v36, %v2905_v61 }
0x1505   :  { %v2942_v38 = vmul.f32 %v2940_v27, %v2939_v37 }
0x1507   :  { %v2945_v39 = vadd.f32 %v2943_v30, %v2942_v38 }
0x1509   :  { %3296 = vmatmul.msk.f32.gmra.mxu2 %vm118_vm0, %v2945_v39 }
0x1584   :  { %v2970_v58 = vpop.f32.mrf.mxu2 }
0x1585   :  { %v2971_v43 = vadd.f32 %v2970_v58, %v2946_v5 }
0x1587   :  { %v2976_v44 = vmax.f32 %v2971_v43, 0.0 }
0x1589   :  { %3297 = vmatmul.msk.f32.vlgmr.msrb.gmra.mxu3 %vm742_vm9, %v2976_v44 }
0x158c   :  { %v2973_v45 = vpop.f32.mrf.mxu2 }
0x158d   :  { %v2974_v47 = vadd.f32 %v2973_v45, %v2946_v5 }
0x158f   :  { %v2977_v1 = vmax.f32 %v2974_v47, 0.0 }
0x1591   :  { %3298 = vmatmul.msk.f32.gmra.mxu3 %vm742_vm9, %v2977_v1 }
0x160c   :  { %v3002_v28 = vpop.f32.mrf.mxu3 }
0x160d   :  { %v3003_v12 = vadd.f32 %v3002_v28, %v2978_v48 }
0x160f   :  { %v3008_v51 = vadd.f32 %v3003_v12, %v2944_v35 }
0x1611   :  { %v3010_v53 = vsel %vm118_vm0, %v3008_v51, 0.0 }
0x1612   :  { %3011 = vadd.xlane.f32.xlu2 %v3010_v53 }
0x1614   :  { %v3005_v56 = vpop.f32.mrf.mxu3 }
0x1615   :  { %v3006_v17 = vadd.f32 %v3005_v56, %v2978_v48 }
0x1617   :  { %v3009_v59 = vadd.f32 %v3006_v17, %v2945_v39 }
0x1619   :  { %v3013_v60 = vsel %vm118_vm0, %v3009_v59, 0.0 }
0x161a   :  { %3014 = vadd.xlane.f32.xlu0 %v3013_v60 }
0x1685   :  { %v3012_v26 = vpop.xlane.xlu2 %3011 }
0x1686   :  { %v3016_v61 = vmul.f32 %v3012_v26, %v3773_v57 }
0x1688   :  { %v3018_v55 = vsub.f32 %v3008_v51, %v3016_v61 }
0x168a   :  { %v3020_v19 = vmul.f32 %v3018_v55, %v3018_v55 }
0x168c   :  { %v3022_v24 = vsel %vm118_vm0, %v3020_v19, 0.0 }
0x168d   :  { %v3015_v62 = vpop.xlane.xlu0 %3014  ;;  %3023 = vadd.xlane.f32.xlu1 %v3022_v24 }
0x168e   :  { %v3017_v0 = vmul.f32 %v3015_v62, %v3773_v57 }
0x1690   :  { %v3019_v2 = vsub.f32 %v3009_v59, %v3017_v0 }
0x1692   :  { %v3021_v3 = vmul.f32 %v3019_v2, %v3019_v2 }
0x1694   :  { %v3025_v4 = vsel %vm118_vm0, %v3021_v3, 0.0 }
0x1695   :  { %3026 = vadd.xlane.f32.xlu2 %v3025_v4 }
0x1700   :  { %v3024_v6 = vpop.xlane.xlu1 %3023 }
0x1701   :  { %v3028_v7 = vmul.f32 %v3024_v6, %v3773_v57 }
0x1703   :  { %v3030_v8 = vadd.f32 1e-06, %v3028_v7 }
0x1705   :  { %3466 = vrsqrt.f32 %v3030_v8  ;;  %vm3038_vm5 = vweird.f32 %v3030_v8 }
0x1708   :  { %v3027_v10 = vpop.xlane.xlu2 %3026 }
0x1709   :  { %v3029_v52 = vmul.f32 %v3027_v10, %v3773_v57  ;;  %v3057_v57 = vperm.slane %v4453_v49, 5 }
0x170b   :  { %v3467_v9 = vpop.eup %3466  ;;  %v3031_v11 = vadd.f32 1e-06, %v3029_v52 }
0x170c   :  { %v3033_v13 = vmul.f32 %v3467_v9, %v3030_v8  ;;  %vm3039_vm9 = vweird.f32 %v3467_v9 }
0x170d   :  { %3468 = vrsqrt.f32 %v3031_v11  ;;  %vm3040_vm6 = vmor %vm3038_vm5, %vm3039_vm9  ;;  %vm3048_vm8 = vweird.f32 %v3031_v11 }
0x170e   :  { %v3034_v14 = vmul.f32 %v3467_v9, %v3033_v13 }
0x1710   :  { %v3035_v40 = vmul.f32 0.5, %v3034_v14 }
0x1712   :  { %v3036_v16 = vsub.f32 1.5, %v3035_v40 }
0x1713   :  { %v3469_v20 = vpop.eup %3468 }
0x1714   :  { %v3037_v50 = vmul.f32 %v3467_v9, %v3036_v16  ;;  %v3043_v21 = vmul.f32 %v3469_v20, %v3031_v11  ;;  %vm3049_vm7 = vweird.f32 %v3469_v20 }
0x1715   :  { %vm3050_vm10 = vmor %vm3048_vm8, %vm3049_vm7 }
0x1716   :  { %v3041_v23 = vsel %vm3040_vm6, %v3467_v9, %v3037_v50  ;;  %v3044_v25 = vmul.f32 %v3469_v20, %v3043_v21 }
0x1717   :  { %v3052_v22 = vmul.f32 %v3041_v23, %v3018_v55 }
0x1718   :  { %v3045_v27 = vmul.f32 0.5, %v3044_v25 }
0x1719   :  { %v3055_v15 = vmul.f32 %v3054_v46, %v3052_v22 }
0x171a   :  { %v3046_v29 = vsub.f32 1.5, %v3045_v27 }
0x171b   :  { %v3058_v30 = vadd.f32 %v3057_v57, %v3055_v15 }
0x171c   :  { %v3047_v31 = vmul.f32 %v3469_v20, %v3046_v29 }
0x171d   :  { %v3060_v32 = vmul.f32 %v3058_v30, %v3871_v54 }
0x171e   :  { %v3051_v33 = vsel %vm3050_vm10, %v3469_v20, %v3047_v31 }
0x171f   :  { %v3053_v34 = vmul.f32 %v3051_v33, %v3019_v2  ;;  %3062 = vst.msk [vmem:[#allocation7] sm:$0xff] %vm118_vm0, %v3060_v32 }
0x1721   :  { %v3056_v35 = vmul.f32 %v3054_v46, %v3053_v34 }
0x1723   :  { %v3059_v49 = vadd.f32 %v3057_v57, %v3056_v35 }
0x1725   :  { %v3061_v41 = vmul.f32 %v3059_v49, %v3885_v63 }
0x1727   :  { %3063 = vst.msk [vmem:[#allocation7 + $0x8] sm:$0xff] %vm118_vm0, %v3061_v41 }
0x1728   :  { %3076 = dma.vmem_to_hbm [thread:$0]  %s3069_s30, 256, %s3071_s11, [#allocation4], %s3555_s17, %s3555_s17, %s3556_s18  }
0x1729   :  { %3552 = dma.done.wait [#allocation4], 256  }
0x172a   :  { %3553 = vsyncadd [#allocation4], 4294967040 }
0x172b   :  { %3081 = vsyncpa [#allocation3], 1 }
0x172c   :  { %3082 = vsyncpa [#allocation6], 1 }
0x172d   :  { %3083 = vsyncpa [#allocation4], 1 }

</bundles_post_ra>
